<compile_context>
chip_gen: v7x
topology: tpu7x:2x2x1
jax: 0.10.0
libtpu: 0.0.40
codegen_flags: <defaults>
</compile_context>

<pallas_src>
import functools

import jax
import jax.numpy as jnp
from jax.experimental import pallas as pl
from jax.experimental.pallas import tpu as pltpu

EPS = 1e-5
LANE = 128
# Explicit scoped-VMEM limit: > v5e's 16 MiB default, well under v7x's 64 MiB
# physical capacity (toy tiles need <2 MiB; real-size tiles should be budgeted
# against this number with double-buffering headroom).
_VMEM_LIMIT = 32 * 1024 * 1024


# ------------------------------- helpers ------------------------------------

def _round_up(x, m):
    return ((x + m - 1) // m) * m


def _pick_row_tile(rows, target):
    """Largest multiple of 8 that divides `rows` and is <= target (else rows)."""
    best = None
    t = 8
    while t <= min(target, rows):
        if rows % t == 0:
            best = t
        t += 8
    return best if best is not None else rows


def _pad2d(a, r, c):
    return jnp.pad(a, ((0, r - a.shape[0]), (0, c - a.shape[1])))


def _compiler_params():
    return pltpu.CompilerParams(
        dimension_semantics=("parallel",),
        vmem_limit_bytes=_VMEM_LIMIT,
    )


def _write_partial_stats(st_ref, y):
    """st_ref block is (1, 2, C): row 0 = sum, row 1 = sum of squares (f32)."""
    st_ref[0, 0:1, :] = jnp.sum(y, axis=0, keepdims=True)
    st_ref[0, 1:2, :] = jnp.sum(y * y, axis=0, keepdims=True)


def _fold_bn(partial, count, gamma_p, beta_p):
    """Finish the cross-tile BN reduction and fold gamma/beta -> scale, bias."""
    s = jnp.sum(partial[:, 0, :], axis=0)
    ss = jnp.sum(partial[:, 1, :], axis=0)
    mean = s / count
    var = jnp.maximum(ss / count - mean * mean, 0.0)  # guard cancellation
    scale = gamma_p * jax.lax.rsqrt(var + EPS)
    bias = beta_p - mean * scale
    return scale.reshape(1, -1), bias.reshape(1, -1)


# ----------------------------- Pallas kernels --------------------------------

def p1_kernel(x_ref, w1_ref, wsc_ref, y1_ref, st1_ref, stsc_ref):
    """conv1x1 main branch (stored) + partial BN1 stats; partial BNsc stats."""
    x = x_ref[...]
    y1 = jnp.dot(x, w1_ref[...], preferred_element_type=jnp.float32)
    y1_ref[...] = y1.astype(y1_ref.dtype)
    _write_partial_stats(st1_ref, y1)
    # shortcut conv: only its statistics are needed now; value recomputed in P4
    ysc = jnp.dot(x, wsc_ref[...], preferred_element_type=jnp.float32)
    _write_partial_stats(stsc_ref, ysc)


def p2_kernel(y1_ref, w2_ref, s1_ref, b1_ref, y2_ref, st2_ref, hp_ref):
    """Fused BN1+ReLU -> 3x3 conv (taps folded into K) + partial BN2 stats.

    y1_ref: (1, H, W, C) raw conv1 output for one image.
    w2_ref: (9*C, C) tap-major folded 3x3 weights.
    hp_ref: (H+2, W+2, C) VMEM scratch holding the zero-padded halo tile.
    """
    _, H, W, C = y1_ref.shape
    y1 = y1_ref[0].astype(jnp.float32).reshape(H * W, C)
    h1 = jnp.maximum(y1 * s1_ref[...] + b1_ref[...], 0.0)
    # zero-padded halo tile lives only in VMEM (no HBM im2col)
    hp_ref[...] = jnp.zeros(hp_ref.shape, hp_ref.dtype)
    hp_ref[1:H + 1, 1:W + 1, :] = h1.astype(hp_ref.dtype).reshape(H, W, C)
    # fold the 9 taps into the contraction dim -> one (H*W, 9C) @ (9C, C) matmul
    cols = [hp_ref[dy:dy + H, dx:dx + W, :].reshape(H * W, C)
            for dy in range(3) for dx in range(3)]
    xcol = jnp.concatenate(cols, axis=1)
    y2 = jnp.dot(xcol, w2_ref[...], preferred_element_type=jnp.float32)
    _write_partial_stats(st2_ref, y2)
    y2_ref[...] = y2.reshape(1, H, W, C).astype(y2_ref.dtype)


def p3_kernel(y2_ref, s2_ref, b2_ref, w3_ref, h2_ref, st3_ref):
    """Fused BN2+ReLU (store h2) + partial BN3 stats of h2@W3 (y3 discarded)."""
    y2 = y2_ref[...].astype(jnp.float32)
    h2 = jnp.maximum(y2 * s2_ref[...] + b2_ref[...], 0.0).astype(h2_ref.dtype)
    h2_ref[...] = h2
    y3 = jnp.dot(h2, w3_ref[...], preferred_element_type=jnp.float32)
    _write_partial_stats(st3_ref, y3)


def p4_kernel(h2_ref, x_ref, w3_ref, wsc_ref,
              s3_ref, b3_ref, ssc_ref, bsc_ref, o_ref):
    """conv3+BN3 (recomputed from h2) + shortcut conv+BNsc + add + ReLU."""
    y3 = jnp.dot(h2_ref[...], w3_ref[...], preferred_element_type=jnp.float32)
    main = y3 * s3_ref[...] + b3_ref[...]
    ysc = jnp.dot(x_ref[...], wsc_ref[...], preferred_element_type=jnp.float32)
    sc = ysc * ssc_ref[...] + bsc_ref[...]
    o_ref[...] = jnp.maximum(main + sc, 0.0).astype(o_ref.dtype)


# ------------------------------ block wrapper --------------------------------

@functools.partial(jax.jit, static_argnames=("compute_dtype", "row_tile"))
def resnet_block_bottleneck(x_nchw, params, compute_dtype=jnp.bfloat16,
                            row_tile=512):
    n, cin, h, w = x_nchw.shape
    cmid = params["w1"].shape[1]
    cout = params["w3"].shape[1]
    rows = n * h * w

    cin_p = _round_up(cin, LANE)
    cm_p = _round_up(cmid, LANE)
    co_p = _round_up(cout, LANE)
    cd = compute_dtype
    f32 = jnp.float32

    tr = _pick_row_tile(rows, row_tile)
    nt = rows // tr
    cp = _compiler_params()

    # --- layout: NCHW -> NHWC once, pad channels to 128 lanes, flatten rows
    x_nhwc = jnp.transpose(x_nchw, (0, 2, 3, 1))
    x_flat = jnp.pad(x_nhwc, ((0, 0), (0, 0), (0, 0), (0, cin_p - cin)))
    x_flat = x_flat.reshape(rows, cin_p).astype(cd)

    # --- zero-padded parameters (padded channels stay exactly zero end-to-end)
    w1p = _pad2d(params["w1"], cin_p, cm_p).astype(cd)
    w3p = _pad2d(params["w3"], cm_p, co_p).astype(cd)
    wscp = _pad2d(params["wsc"], cin_p, co_p).astype(cd)
    w2p = jnp.pad(params["w2"], ((0, 0), (0, cm_p - cmid), (0, cm_p - cmid)))
    w2p = w2p.reshape(9 * cm_p, cm_p).astype(cd)

    def padc(v, c_p):  # (1, C) -> (C_p,) f32, zero-padded
        return jnp.pad(v.reshape(-1), (0, c_p - v.shape[-1])).astype(f32)

    g1, b1 = padc(params["g1"], cm_p), padc(params["b1"], cm_p)
    g2, b2 = padc(params["g2"], cm_p), padc(params["b2"], cm_p)
    g3, b3 = padc(params["g3"], co_p), padc(params["b3"], co_p)
    gsc, bsc = padc(params["gsc"], co_p), padc(params["bsc"], co_p)

    # ---- P1: conv1x1 + partial BN1 stats; partial BNsc stats (row-tiled grid)
    y1, st1, stsc = pl.pallas_call(
        p1_kernel,
        grid=(nt,),
        in_specs=[
            pl.BlockSpec((tr, cin_p), lambda i: (i, 0)),
            pl.BlockSpec((cin_p, cm_p), lambda i: (0, 0)),
            pl.BlockSpec((cin_p, co_p), lambda i: (0, 0)),
        ],
        out_specs=[
            pl.BlockSpec((tr, cm_p), lambda i: (i, 0)),
            pl.BlockSpec((1, 2, cm_p), lambda i: (i, 0, 0)),
            pl.BlockSpec((1, 2, co_p), lambda i: (i, 0, 0)),
        ],
        out_shape=[
            jax.ShapeDtypeStruct((rows, cm_p), cd),
            jax.ShapeDtypeStruct((nt, 2, cm_p), f32),
            jax.ShapeDtypeStruct((nt, 2, co_p), f32),
        ],
        compiler_params=cp,
    )(x_flat, w1p, wscp)

    s1, bb1 = _fold_bn(st1, rows, g1, b1)
    ssc, bbsc = _fold_bn(stsc, rows, gsc, bsc)

    # ---- P2: BN1+ReLU fused into the 3x3 conv (per-image tile, halo in VMEM)
    y2, st2 = pl.pallas_call(
        p2_kernel,
        grid=(n,),
        in_specs=[
            pl.BlockSpec((1, h, w, cm_p), lambda i: (i, 0, 0, 0)),
            pl.BlockSpec((9 * cm_p, cm_p), lambda i: (0, 0)),
            pl.BlockSpec((1, cm_p), lambda i: (0, 0)),
            pl.BlockSpec((1, cm_p), lambda i: (0, 0)),
        ],
        out_specs=[
            pl.BlockSpec((1, h, w, cm_p), lambda i: (i, 0, 0, 0)),
            pl.BlockSpec((1, 2, cm_p), lambda i: (i, 0, 0)),
        ],
        out_shape=[
            jax.ShapeDtypeStruct((n, h, w, cm_p), cd),
            jax.ShapeDtypeStruct((n, 2, cm_p), f32),
        ],
        scratch_shapes=[pltpu.VMEM((h + 2, w + 2, cm_p), cd)],
        compiler_params=cp,
    )(y1.reshape(n, h, w, cm_p), w2p, s1, bb1)

    s2, bb2 = _fold_bn(st2, rows, g2, b2)

    # ---- P3: BN2+ReLU (store h2) + partial BN3 stats (row-tiled grid)
    h2, st3 = pl.pallas_call(
        p3_kernel,
        grid=(nt,),
        in_specs=[
            pl.BlockSpec((tr, cm_p), lambda i: (i, 0)),
            pl.BlockSpec((1, cm_p), lambda i: (0, 0)),
            pl.BlockSpec((1, cm_p), lambda i: (0, 0)),
            pl.BlockSpec((cm_p, co_p), lambda i: (0, 0)),
        ],
        out_specs=[
            pl.BlockSpec((tr, cm_p), lambda i: (i, 0)),
            pl.BlockSpec((1, 2, co_p), lambda i: (i, 0, 0)),
        ],
        out_shape=[
            jax.ShapeDtypeStruct((rows, cm_p), cd),
            jax.ShapeDtypeStruct((nt, 2, co_p), f32),
        ],
        compiler_params=cp,
    )(y2.reshape(rows, cm_p), s2, bb2, w3p)

    s3, bb3 = _fold_bn(st3, rows, g3, b3)

    # ---- P4: conv3+BN3, shortcut conv+BNsc, add, ReLU (row-tiled grid)
    out_flat = pl.pallas_call(
        p4_kernel,
        grid=(nt,),
        in_specs=[
            pl.BlockSpec((tr, cm_p), lambda i: (i, 0)),
            pl.BlockSpec((tr, cin_p), lambda i: (i, 0)),
            pl.BlockSpec((cm_p, co_p), lambda i: (0, 0)),
            pl.BlockSpec((cin_p, co_p), lambda i: (0, 0)),
            pl.BlockSpec((1, co_p), lambda i: (0, 0)),
            pl.BlockSpec((1, co_p), lambda i: (0, 0)),
            pl.BlockSpec((1, co_p), lambda i: (0, 0)),
            pl.BlockSpec((1, co_p), lambda i: (0, 0)),
        ],
        out_specs=pl.BlockSpec((tr, co_p), lambda i: (i, 0)),
        out_shape=jax.ShapeDtypeStruct((rows, co_p), f32),
        compiler_params=cp,
    )(h2, x_flat, w3p, wscp, s3, bb3, ssc, bbsc)

    out = out_flat.reshape(n, h, w, co_p)[..., :cout]
    return jnp.transpose(out, (0, 3, 1, 2))  # back to NCHW


# --------------------------- plain-JAX reference ----------------------------

def _bn_nchw(y, gamma, beta):
    mean = jnp.mean(y, axis=(0, 2, 3), keepdims=True)
    var = jnp.mean((y - mean) ** 2, axis=(0, 2, 3), keepdims=True)
    g = gamma.reshape(1, -1, 1, 1)
    b = beta.reshape(1, -1, 1, 1)
    return (y - mean) * jax.lax.rsqrt(var + EPS) * g + b


def _conv_nchw(x, w_oihw, stride=1, pad=0):
    return jax.lax.conv_general_dilated(
        x, w_oihw, window_strides=(stride, stride),
        padding=((pad, pad), (pad, pad)),
        dimension_numbers=("NCHW", "OIHW", "NCHW"))


def reference(x_nchw, params):
    cin = params["w1"].shape[0]
    cmid = params["w1"].shape[1]
    cout = params["w3"].shape[1]
    w1 = params["w1"].T.reshape(cmid, cin, 1, 1)
    w2 = params["w2"].reshape(3, 3, cmid, cmid).transpose(3, 2, 0, 1)
    w3 = params["w3"].T.reshape(cout, cmid, 1, 1)
    wsc = params["wsc"].T.reshape(cout, cin, 1, 1)

    h = _conv_nchw(x_nchw, w1)
    h = jnp.maximum(_bn_nchw(h, params["g1"], params["b1"]), 0.0)
    h = _conv_nchw(h, w2, stride=1, pad=1)
    h = jnp.maximum(_bn_nchw(h, params["g2"], params["b2"]), 0.0)
    h = _conv_nchw(h, w3)
    h = _bn_nchw(h, params["g3"], params["b3"])

    sc = _conv_nchw(x_nchw, wsc)
    sc = _bn_nchw(sc, params["gsc"], params["bsc"])
    return jnp.maximum(h + sc, 0.0)


# --------------------------------- main --------------------------------------

def init_params(key, cin, cout):
    cmid = cout // 4
    ks = jax.random.split(key, 12)
    f32 = jnp.float32
    return {
        "w1":  0.1 * jax.random.normal(ks[0], (cin, cmid), f32),
        "g1":  1.0 + 0.1 * jax.random.normal(ks[1], (1, cmid), f32),
        "b1":  0.1 * jax.random.normal(ks[2], (1, cmid), f32),
        "w2":  0.1 * jax.random.normal(ks[3], (9, cmid, cmid), f32),
        "g2":  1.0 + 0.1 * jax.random.normal(ks[4], (1, cmid), f32),
        "b2":  0.1 * jax.random.normal(ks[5], (1, cmid), f32),
        "w3":  0.1 * jax.random.normal(ks[6], (cmid, cout), f32),
        "g3":  1.0 + 0.1 * jax.random.normal(ks[7], (1, cout), f32),
        "b3":  0.1 * jax.random.normal(ks[8], (1, cout), f32),
        "wsc": 0.1 * jax.random.normal(ks[9], (cin, cout), f32),
        "gsc": 1.0 + 0.1 * jax.random.normal(ks[10], (1, cout), f32),
        "bsc": 0.1 * jax.random.normal(ks[11], (1, cout), f32),
    }


if __name__ == "__main__":
    N, Cin, H, W = 2, 8, 16, 16
    Cout = 16  # internal_channels = Cout // 4 = 4

    key = jax.random.PRNGKey(0)
    kx, kp = jax.random.split(key)
    x = jax.random.normal(kx, (N, Cin, H, W), jnp.float32)
    params = init_params(kp, Cin, Cout)

    ref = jax.block_until_ready(reference(x, params))

    # Exact-mode validation (f32 operands / f32 intermediates): same algorithm,
    # tight tolerance.  row_tile=128 so the toy problem exercises a 4-step grid.
    out_f32 = jax.block_until_ready(
        resnet_block_bottleneck(x, params, compute_dtype=jnp.float32,
                                row_tile=128))
    assert out_f32.shape == (N, Cout, H, W)
    err_f32 = float(jnp.max(jnp.abs(out_f32 - ref)))
    assert err_f32 < 2e-3, f"f32 mismatch vs reference: {err_f32}"

    # Performance mode: bf16 MXU operands + bf16 HBM intermediates, f32
    # accumulation / f32 BN statistics.  Loose tolerance accounts for bf16
    # rounding amplified by the BatchNorm rsqrt(var) scaling.
    out_bf16 = jax.block_until_ready(
        resnet_block_bottleneck(x, params, compute_dtype=jnp.bfloat16,
                                row_tile=128))
    assert out_bf16.shape == (N, Cout, H, W)
    abs_err = jnp.abs(out_bf16 - ref)
    max_err = float(jnp.max(abs_err))
    mean_err = float(jnp.mean(abs_err))
    assert max_err < 2e-1 and mean_err < 3e-2, (
        f"bf16 mismatch vs reference: max={max_err}, mean={mean_err}")

    print("KERNEL_OK")
</pallas_src>

<mosaic_0001>
module attributes {stable_mosaic.version = 11 : i64} {
  func.func @p1_kernel(%arg0: i32, %arg1: memref<128x128xf32, #tpu.memory_space<vmem>>, %arg2: memref<128x128xf32, #tpu.memory_space<vmem>>, %arg3: memref<128x128xf32, #tpu.memory_space<vmem>>, %arg4: memref<128x128xf32, #tpu.memory_space<vmem>>, %arg5: memref<1x2x128xf32, #tpu.memory_space<vmem>>, %arg6: memref<1x2x128xf32, #tpu.memory_space<vmem>>) attributes {dimension_semantics = [#tpu.dimension_semantics<parallel>], iteration_bounds = array<i64: 4>, scalar_prefetch = 0 : i64, scratch_operands = 0 : i64, tpu.core_type = #tpu.core_type<tc>, window_params = [{transform_indices = @transform_0, window_bounds = array<i64: 128, 128>}, {pipeline_mode = #tpu.pipeline_mode<synchronous>, transform_indices = @transform_1, window_bounds = array<i64: 128, 128>}, {pipeline_mode = #tpu.pipeline_mode<synchronous>, transform_indices = @transform_2, window_bounds = array<i64: 128, 128>}, {transform_indices = @transform_3, window_bounds = array<i64: 128, 128>}, {transform_indices = @transform_4, window_bounds = array<i64: 1, 2, 128>}, {transform_indices = @transform_5, window_bounds = array<i64: 1, 2, 128>}]} {
    %c0 = arith.constant 0 : index
    %c0_0 = arith.constant 0 : index
    %0 = vector.load %arg1[%c0, %c0_0] : memref<128x128xf32, #tpu.memory_space<vmem>>, vector<128x128xf32>
    %c0_1 = arith.constant 0 : index
    %c0_2 = arith.constant 0 : index
    %1 = vector.load %arg2[%c0_1, %c0_2] : memref<128x128xf32, #tpu.memory_space<vmem>>, vector<128x128xf32>
    %cst = arith.constant dense<0.000000e+00> : vector<128x128xf32>
    %2 = tpu.matmul %0, %1, %cst {dimension_numbers = #tpu.dot_dimension_numbers<[1], [0], [0], [1], [0, 0, 1, 1], [], []>} : vector<128x128xf32>, vector<128x128xf32>, vector<128x128xf32> -> vector<128x128xf32>
    %c0_3 = arith.constant 0 : index
    %c0_4 = arith.constant 0 : index
    %3 = vector.load %arg4[%c0_3, %c0_4] : memref<128x128xf32, #tpu.memory_space<vmem>>, vector<128x128xf32>
    tpu.vector_store %arg4[%c0_3, %c0_4], %2 {strides = array<i32>} : memref<128x128xf32, #tpu.memory_space<vmem>>, vector<128x128xf32>,
    %cst_5 = arith.constant dense<0.000000e+00> : vector<128xf32>
    %4 = vector.multi_reduction <add>, %2, %cst_5 [0] : vector<128x128xf32> to vector<128xf32>
    %5 = vector.shape_cast %4 : vector<128xf32> to vector<1x128xf32>
    %c0_6 = arith.constant 0 : index
    %c0_7 = arith.constant 0 : index
    %c0_8 = arith.constant 0 : index
    %6 = vector.load %arg5[%c0_6, %c0_7, %c0_8] : memref<1x2x128xf32, #tpu.memory_space<vmem>>, vector<1x1x128xf32>
    %7 = vector.shape_cast %6 : vector<1x1x128xf32> to vector<1x128xf32>
    %8 = vector.shape_cast %5 : vector<1x128xf32> to vector<1x1x128xf32>
    tpu.vector_store %arg5[%c0_6, %c0_7, %c0_8], %8 {strides = array<i32>} : memref<1x2x128xf32, #tpu.memory_space<vmem>>, vector<1x1x128xf32>,
    %9 = arith.mulf %2, %2 : vector<128x128xf32>
    %cst_9 = arith.constant dense<0.000000e+00> : vector<128xf32>
    %10 = vector.multi_reduction <add>, %9, %cst_9 [0] : vector<128x128xf32> to vector<128xf32>
    %11 = vector.shape_cast %10 : vector<128xf32> to vector<1x128xf32>
    %c0_10 = arith.constant 0 : index
    %c1 = arith.constant 1 : index
    %c0_11 = arith.constant 0 : index
    %12 = vector.load %arg5[%c0_10, %c1, %c0_11] : memref<1x2x128xf32, #tpu.memory_space<vmem>>, vector<1x1x128xf32>
    %13 = vector.shape_cast %12 : vector<1x1x128xf32> to vector<1x128xf32>
    %14 = vector.shape_cast %11 : vector<1x128xf32> to vector<1x1x128xf32>
    tpu.vector_store %arg5[%c0_10, %c1, %c0_11], %14 {strides = array<i32>} : memref<1x2x128xf32, #tpu.memory_space<vmem>>, vector<1x1x128xf32>,
    %c0_12 = arith.constant 0 : index
    %c0_13 = arith.constant 0 : index
    %15 = vector.load %arg3[%c0_12, %c0_13] : memref<128x128xf32, #tpu.memory_space<vmem>>, vector<128x128xf32>
    %cst_14 = arith.constant dense<0.000000e+00> : vector<128x128xf32>
    %16 = tpu.matmul %0, %15, %cst_14 {dimension_numbers = #tpu.dot_dimension_numbers<[1], [0], [0], [1], [0, 0, 1, 1], [], []>} : vector<128x128xf32>, vector<128x128xf32>, vector<128x128xf32> -> vector<128x128xf32>
    %cst_15 = arith.constant dense<0.000000e+00> : vector<128xf32>
    %17 = vector.multi_reduction <add>, %16, %cst_15 [0] : vector<128x128xf32> to vector<128xf32>
    %18 = vector.shape_cast %17 : vector<128xf32> to vector<1x128xf32>
    %c0_16 = arith.constant 0 : index
    %c0_17 = arith.constant 0 : index
    %c0_18 = arith.constant 0 : index
    %19 = vector.load %arg6[%c0_16, %c0_17, %c0_18] : memref<1x2x128xf32, #tpu.memory_space<vmem>>, vector<1x1x128xf32>
    %20 = vector.shape_cast %19 : vector<1x1x128xf32> to vector<1x128xf32>
    %21 = vector.shape_cast %18 : vector<1x128xf32> to vector<1x1x128xf32>
    tpu.vector_store %arg6[%c0_16, %c0_17, %c0_18], %21 {strides = array<i32>} : memref<1x2x128xf32, #tpu.memory_space<vmem>>, vector<1x1x128xf32>,
    %22 = arith.mulf %16, %16 : vector<128x128xf32>
    %cst_19 = arith.constant dense<0.000000e+00> : vector<128xf32>
    %23 = vector.multi_reduction <add>, %22, %cst_19 [0] : vector<128x128xf32> to vector<128xf32>
    %24 = vector.shape_cast %23 : vector<128xf32> to vector<1x128xf32>
    %c0_20 = arith.constant 0 : index
    %c1_21 = arith.constant 1 : index
    %c0_22 = arith.constant 0 : index
    %25 = vector.load %arg6[%c0_20, %c1_21, %c0_22] : memref<1x2x128xf32, #tpu.memory_space<vmem>>, vector<1x1x128xf32>
    %26 = vector.shape_cast %25 : vector<1x1x128xf32> to vector<1x128xf32>
    %27 = vector.shape_cast %24 : vector<1x128xf32> to vector<1x1x128xf32>
    tpu.vector_store %arg6[%c0_20, %c1_21, %c0_22], %27 {strides = array<i32>} : memref<1x2x128xf32, #tpu.memory_space<vmem>>, vector<1x1x128xf32>,
    return
  }
  func.func @transform_0(%arg0: i32) -> (i32, i32) {
    %c0_i32 = arith.constant 0 : i32
    %c0_i32_0 = arith.constant 0 : i32
    return %arg0, %c0_i32 : i32, i32
  }
  func.func @transform_1(%arg0: i32) -> (i32, i32) {
    %c0_i32 = arith.constant 0 : i32
    %c0_i32_0 = arith.constant 0 : i32
    %c0_i32_1 = arith.constant 0 : i32
    return %c0_i32, %c0_i32_0 : i32, i32
  }
  func.func @transform_2(%arg0: i32) -> (i32, i32) {
    %c0_i32 = arith.constant 0 : i32
    %c0_i32_0 = arith.constant 0 : i32
    %c0_i32_1 = arith.constant 0 : i32
    return %c0_i32, %c0_i32_0 : i32, i32
  }
  func.func @transform_3(%arg0: i32) -> (i32, i32) {
    %c0_i32 = arith.constant 0 : i32
    %c0_i32_0 = arith.constant 0 : i32
    return %arg0, %c0_i32 : i32, i32
  }
  func.func @transform_4(%arg0: i32) -> (i32, i32, i32) {
    %c0_i32 = arith.constant 0 : i32
    %c0_i32_0 = arith.constant 0 : i32
    %c0_i32_1 = arith.constant 0 : i32
    return %arg0, %c0_i32, %c0_i32_0 : i32, i32, i32
  }
  func.func @transform_5(%arg0: i32) -> (i32, i32, i32) {
    %c0_i32 = arith.constant 0 : i32
    %c0_i32_0 = arith.constant 0 : i32
    %c0_i32_1 = arith.constant 0 : i32
    return %arg0, %c0_i32, %c0_i32_0 : i32, i32, i32
  }
}

module attributes {stable_mosaic.version = 11 : i64} {
  func.func @p2_kernel(%arg0: i32, %arg1: memref<1x16x16x128xf32, #tpu.memory_space<vmem>>, %arg2: memref<1152x128xf32, #tpu.memory_space<vmem>>, %arg3: memref<1x128xf32, #tpu.memory_space<vmem>>, %arg4: memref<1x128xf32, #tpu.memory_space<vmem>>, %arg5: memref<1x16x16x128xf32, #tpu.memory_space<vmem>>, %arg6: memref<1x2x128xf32, #tpu.memory_space<vmem>>, %arg7: memref<18x18x128xf32, #tpu.memory_space<vmem>>) attributes {dimension_semantics = [#tpu.dimension_semantics<parallel>], iteration_bounds = array<i64: 2>, scalar_prefetch = 0 : i64, scratch_operands = 1 : i64, tpu.core_type = #tpu.core_type<tc>, window_params = [{transform_indices = @transform_0, window_bounds = array<i64: 1, 16, 16, 128>}, {pipeline_mode = #tpu.pipeline_mode<synchronous>, transform_indices = @transform_1, window_bounds = array<i64: 1152, 128>}, {pipeline_mode = #tpu.pipeline_mode<synchronous>, transform_indices = @transform_2, window_bounds = array<i64: 1, 128>}, {pipeline_mode = #tpu.pipeline_mode<synchronous>, transform_indices = @transform_3, window_bounds = array<i64: 1, 128>}, {transform_indices = @transform_4, window_bounds = array<i64: 1, 16, 16, 128>}, {transform_indices = @transform_5, window_bounds = array<i64: 1, 2, 128>}]} {
    %c0 = arith.constant 0 : index
    %c0_0 = arith.constant 0 : index
    %c0_1 = arith.constant 0 : index
    %c0_2 = arith.constant 0 : index
    %0 = vector.load %arg1[%c0, %c0_0, %c0_1, %c0_2] : memref<1x16x16x128xf32, #tpu.memory_space<vmem>>, vector<1x16x16x128xf32>
    %1 = vector.shape_cast %0 : vector<1x16x16x128xf32> to vector<16x16x128xf32>
    %2 = vector.shape_cast %1 : vector<16x16x128xf32> to vector<256x128xf32>
    %c0_3 = arith.constant 0 : index
    %c0_4 = arith.constant 0 : index
    %3 = vector.load %arg3[%c0_3, %c0_4] : memref<1x128xf32, #tpu.memory_space<vmem>>, vector<1x128xf32>
    %4 = vector.broadcast %3 : vector<1x128xf32> to vector<256x128xf32>
    %5 = arith.mulf %2, %4 : vector<256x128xf32>
    %c0_5 = arith.constant 0 : index
    %c0_6 = arith.constant 0 : index
    %6 = vector.load %arg4[%c0_5, %c0_6] : memref<1x128xf32, #tpu.memory_space<vmem>>, vector<1x128xf32>
    %7 = vector.broadcast %6 : vector<1x128xf32> to vector<256x128xf32>
    %8 = arith.addf %5, %7 : vector<256x128xf32>
    %cst = arith.constant 0.000000e+00 : f32
    %9 = vector.broadcast %cst : f32 to vector<256x128xf32>
    %10 = arith.maximumf %8, %9 : vector<256x128xf32>
    %cst_7 = arith.constant 0.000000e+00 : f32
    %11 = vector.broadcast %cst_7 : f32 to vector<18x18x128xf32>
    %c0_8 = arith.constant 0 : index
    %c0_9 = arith.constant 0 : index
    %c0_10 = arith.constant 0 : index
    %12 = vector.load %arg7[%c0_8, %c0_9, %c0_10] : memref<18x18x128xf32, #tpu.memory_space<vmem>>, vector<18x18x128xf32>
    tpu.vector_store %arg7[%c0_8, %c0_9, %c0_10], %11 {strides = array<i32>} : memref<18x18x128xf32, #tpu.memory_space<vmem>>, vector<18x18x128xf32>,
    %13 = vector.shape_cast %10 : vector<256x128xf32> to vector<16x16x128xf32>
    %c1 = arith.constant 1 : index
    %c1_11 = arith.constant 1 : index
    %c0_12 = arith.constant 0 : index
    %14 = vector.load %arg7[%c1, %c1_11, %c0_12] : memref<18x18x128xf32, #tpu.memory_space<vmem>>, vector<16x16x128xf32>
    tpu.vector_store %arg7[%c1, %c1_11, %c0_12], %13 {strides = array<i32>} : memref<18x18x128xf32, #tpu.memory_space<vmem>>, vector<16x16x128xf32>,
    %c0_13 = arith.constant 0 : index
    %c0_14 = arith.constant 0 : index
    %c0_15 = arith.constant 0 : index
    %15 = vector.load %arg7[%c0_13, %c0_14, %c0_15] : memref<18x18x128xf32, #tpu.memory_space<vmem>>, vector<16x16x128xf32>
    %16 = vector.shape_cast %15 : vector<16x16x128xf32> to vector<256x128xf32>
    %c0_16 = arith.constant 0 : index
    %c1_17 = arith.constant 1 : index
    %c0_18 = arith.constant 0 : index
    %17 = vector.load %arg7[%c0_16, %c1_17, %c0_18] : memref<18x18x128xf32, #tpu.memory_space<vmem>>, vector<16x16x128xf32>
    %18 = vector.shape_cast %17 : vector<16x16x128xf32> to vector<256x128xf32>
    %c0_19 = arith.constant 0 : index
    %c2 = arith.constant 2 : index
    %c0_20 = arith.constant 0 : index
    %19 = vector.load %arg7[%c0_19, %c2, %c0_20] : memref<18x18x128xf32, #tpu.memory_space<vmem>>, vector<16x16x128xf32>
    %20 = vector.shape_cast %19 : vector<16x16x128xf32> to vector<256x128xf32>
    %c1_21 = arith.constant 1 : index
    %c0_22 = arith.constant 0 : index
    %c0_23 = arith.constant 0 : index
    %21 = vector.load %arg7[%c1_21, %c0_22, %c0_23] : memref<18x18x128xf32, #tpu.memory_space<vmem>>, vector<16x16x128xf32>
    %22 = vector.shape_cast %21 : vector<16x16x128xf32> to vector<256x128xf32>
    %c1_24 = arith.constant 1 : index
    %c1_25 = arith.constant 1 : index
    %c0_26 = arith.constant 0 : index
    %23 = vector.load %arg7[%c1_24, %c1_25, %c0_26] : memref<18x18x128xf32, #tpu.memory_space<vmem>>, vector<16x16x128xf32>
    %24 = vector.shape_cast %23 : vector<16x16x128xf32> to vector<256x128xf32>
    %c1_27 = arith.constant 1 : index
    %c2_28 = arith.constant 2 : index
    %c0_29 = arith.constant 0 : index
    %25 = vector.load %arg7[%c1_27, %c2_28, %c0_29] : memref<18x18x128xf32, #tpu.memory_space<vmem>>, vector<16x16x128xf32>
    %26 = vector.shape_cast %25 : vector<16x16x128xf32> to vector<256x128xf32>
    %c2_30 = arith.constant 2 : index
    %c0_31 = arith.constant 0 : index
    %c0_32 = arith.constant 0 : index
    %27 = vector.load %arg7[%c2_30, %c0_31, %c0_32] : memref<18x18x128xf32, #tpu.memory_space<vmem>>, vector<16x16x128xf32>
    %28 = vector.shape_cast %27 : vector<16x16x128xf32> to vector<256x128xf32>
    %c2_33 = arith.constant 2 : index
    %c1_34 = arith.constant 1 : index
    %c0_35 = arith.constant 0 : index
    %29 = vector.load %arg7[%c2_33, %c1_34, %c0_35] : memref<18x18x128xf32, #tpu.memory_space<vmem>>, vector<16x16x128xf32>
    %30 = vector.shape_cast %29 : vector<16x16x128xf32> to vector<256x128xf32>
    %c2_36 = arith.constant 2 : index
    %c2_37 = arith.constant 2 : index
    %c0_38 = arith.constant 0 : index
    %31 = vector.load %arg7[%c2_36, %c2_37, %c0_38] : memref<18x18x128xf32, #tpu.memory_space<vmem>>, vector<16x16x128xf32>
    %32 = vector.shape_cast %31 : vector<16x16x128xf32> to vector<256x128xf32>
    %33 = tpu.concatenate %16, %18, %20, %22, %24, %26, %28, %30, %32 in 1 : vector<256x128xf32>, vector<256x128xf32>, vector<256x128xf32>, vector<256x128xf32>, vector<256x128xf32>, vector<256x128xf32>, vector<256x128xf32>, vector<256x128xf32>, vector<256x128xf32> -> vector<256x1152xf32>
    %c0_39 = arith.constant 0 : index
    %c0_40 = arith.constant 0 : index
    %34 = vector.load %arg2[%c0_39, %c0_40] : memref<1152x128xf32, #tpu.memory_space<vmem>>, vector<1152x128xf32>
    %cst_41 = arith.constant dense<0.000000e+00> : vector<256x128xf32>
    %35 = tpu.matmul %33, %34, %cst_41 {dimension_numbers = #tpu.dot_dimension_numbers<[1], [0], [0], [1], [0, 0, 1, 1], [], []>} : vector<256x1152xf32>, vector<1152x128xf32>, vector<256x128xf32> -> vector<256x128xf32>
    %cst_42 = arith.constant dense<0.000000e+00> : vector<128xf32>
    %36 = vector.multi_reduction <add>, %35, %cst_42 [0] : vector<256x128xf32> to vector<128xf32>
    %37 = vector.shape_cast %36 : vector<128xf32> to vector<1x128xf32>
    %c0_43 = arith.constant 0 : index
    %c0_44 = arith.constant 0 : index
    %c0_45 = arith.constant 0 : index
    %38 = vector.load %arg6[%c0_43, %c0_44, %c0_45] : memref<1x2x128xf32, #tpu.memory_space<vmem>>, vector<1x1x128xf32>
    %39 = vector.shape_cast %38 : vector<1x1x128xf32> to vector<1x128xf32>
    %40 = vector.shape_cast %37 : vector<1x128xf32> to vector<1x1x128xf32>
    tpu.vector_store %arg6[%c0_43, %c0_44, %c0_45], %40 {strides = array<i32>} : memref<1x2x128xf32, #tpu.memory_space<vmem>>, vector<1x1x128xf32>,
    %41 = arith.mulf %35, %35 : vector<256x128xf32>
    %cst_46 = arith.constant dense<0.000000e+00> : vector<128xf32>
    %42 = vector.multi_reduction <add>, %41, %cst_46 [0] : vector<256x128xf32> to vector<128xf32>
    %43 = vector.shape_cast %42 : vector<128xf32> to vector<1x128xf32>
    %c0_47 = arith.constant 0 : index
    %c1_48 = arith.constant 1 : index
    %c0_49 = arith.constant 0 : index
    %44 = vector.load %arg6[%c0_47, %c1_48, %c0_49] : memref<1x2x128xf32, #tpu.memory_space<vmem>>, vector<1x1x128xf32>
    %45 = vector.shape_cast %44 : vector<1x1x128xf32> to vector<1x128xf32>
    %46 = vector.shape_cast %43 : vector<1x128xf32> to vector<1x1x128xf32>
    tpu.vector_store %arg6[%c0_47, %c1_48, %c0_49], %46 {strides = array<i32>} : memref<1x2x128xf32, #tpu.memory_space<vmem>>, vector<1x1x128xf32>,
    %47 = vector.shape_cast %35 : vector<256x128xf32> to vector<1x16x16x128xf32>
    %c0_50 = arith.constant 0 : index
    %c0_51 = arith.constant 0 : index
    %c0_52 = arith.constant 0 : index
    %c0_53 = arith.constant 0 : index
    %48 = vector.load %arg5[%c0_50, %c0_51, %c0_52, %c0_53] : memref<1x16x16x128xf32, #tpu.memory_space<vmem>>, vector<1x16x16x128xf32>
    tpu.vector_store %arg5[%c0_50, %c0_51, %c0_52, %c0_53], %47 {strides = array<i32>} : memref<1x16x16x128xf32, #tpu.memory_space<vmem>>, vector<1x16x16x128xf32>,
    return
  }
  func.func @transform_0(%arg0: i32) -> (i32, i32, i32, i32) {
    %c0_i32 = arith.constant 0 : i32
    %c0_i32_0 = arith.constant 0 : i32
    %c0_i32_1 = arith.constant 0 : i32
    %c0_i32_2 = arith.constant 0 : i32
    return %arg0, %c0_i32, %c0_i32_0, %c0_i32_1 : i32, i32, i32, i32
  }
  func.func @transform_1(%arg0: i32) -> (i32, i32) {
    %c0_i32 = arith.constant 0 : i32
    %c0_i32_0 = arith.constant 0 : i32
    %c0_i32_1 = arith.constant 0 : i32
    return %c0_i32, %c0_i32_0 : i32, i32
  }
  func.func @transform_2(%arg0: i32) -> (i32, i32) {
    %c0_i32 = arith.constant 0 : i32
    %c0_i32_0 = arith.constant 0 : i32
    %c0_i32_1 = arith.constant 0 : i32
    return %c0_i32, %c0_i32_0 : i32, i32
  }
  func.func @transform_3(%arg0: i32) -> (i32, i32) {
    %c0_i32 = arith.constant 0 : i32
    %c0_i32_0 = arith.constant 0 : i32
    %c0_i32_1 = arith.constant 0 : i32
    return %c0_i32, %c0_i32_0 : i32, i32
  }
  func.func @transform_4(%arg0: i32) -> (i32, i32, i32, i32) {
    %c0_i32 = arith.constant 0 : i32
    %c0_i32_0 = arith.constant 0 : i32
    %c0_i32_1 = arith.constant 0 : i32
    %c0_i32_2 = arith.constant 0 : i32
    return %arg0, %c0_i32, %c0_i32_0, %c0_i32_1 : i32, i32, i32, i32
  }
  func.func @transform_5(%arg0: i32) -> (i32, i32, i32) {
    %c0_i32 = arith.constant 0 : i32
    %c0_i32_0 = arith.constant 0 : i32
    %c0_i32_1 = arith.constant 0 : i32
    return %arg0, %c0_i32, %c0_i32_0 : i32, i32, i32
  }
}

module attributes {stable_mosaic.version = 11 : i64} {
  func.func @p3_kernel(%arg0: i32, %arg1: memref<128x128xf32, #tpu.memory_space<vmem>>, %arg2: memref<1x128xf32, #tpu.memory_space<vmem>>, %arg3: memref<1x128xf32, #tpu.memory_space<vmem>>, %arg4: memref<128x128xf32, #tpu.memory_space<vmem>>, %arg5: memref<128x128xf32, #tpu.memory_space<vmem>>, %arg6: memref<1x2x128xf32, #tpu.memory_space<vmem>>) attributes {dimension_semantics = [#tpu.dimension_semantics<parallel>], iteration_bounds = array<i64: 4>, scalar_prefetch = 0 : i64, scratch_operands = 0 : i64, tpu.core_type = #tpu.core_type<tc>, window_params = [{transform_indices = @transform_0, window_bounds = array<i64: 128, 128>}, {pipeline_mode = #tpu.pipeline_mode<synchronous>, transform_indices = @transform_1, window_bounds = array<i64: 1, 128>}, {pipeline_mode = #tpu.pipeline_mode<synchronous>, transform_indices = @transform_2, window_bounds = array<i64: 1, 128>}, {pipeline_mode = #tpu.pipeline_mode<synchronous>, transform_indices = @transform_3, window_bounds = array<i64: 128, 128>}, {transform_indices = @transform_4, window_bounds = array<i64: 128, 128>}, {transform_indices = @transform_5, window_bounds = array<i64: 1, 2, 128>}]} {
    %c0 = arith.constant 0 : index
    %c0_0 = arith.constant 0 : index
    %0 = vector.load %arg1[%c0, %c0_0] : memref<128x128xf32, #tpu.memory_space<vmem>>, vector<128x128xf32>
    %c0_1 = arith.constant 0 : index
    %c0_2 = arith.constant 0 : index
    %1 = vector.load %arg2[%c0_1, %c0_2] : memref<1x128xf32, #tpu.memory_space<vmem>>, vector<1x128xf32>
    %2 = vector.broadcast %1 : vector<1x128xf32> to vector<128x128xf32>
    %3 = arith.mulf %0, %2 : vector<128x128xf32>
    %c0_3 = arith.constant 0 : index
    %c0_4 = arith.constant 0 : index
    %4 = vector.load %arg3[%c0_3, %c0_4] : memref<1x128xf32, #tpu.memory_space<vmem>>, vector<1x128xf32>
    %5 = vector.broadcast %4 : vector<1x128xf32> to vector<128x128xf32>
    %6 = arith.addf %3, %5 : vector<128x128xf32>
    %cst = arith.constant 0.000000e+00 : f32
    %7 = vector.broadcast %cst : f32 to vector<128x128xf32>
    %8 = arith.maximumf %6, %7 : vector<128x128xf32>
    %c0_5 = arith.constant 0 : index
    %c0_6 = arith.constant 0 : index
    %9 = vector.load %arg5[%c0_5, %c0_6] : memref<128x128xf32, #tpu.memory_space<vmem>>, vector<128x128xf32>
    tpu.vector_store %arg5[%c0_5, %c0_6], %8 {strides = array<i32>} : memref<128x128xf32, #tpu.memory_space<vmem>>, vector<128x128xf32>,
    %c0_7 = arith.constant 0 : index
    %c0_8 = arith.constant 0 : index
    %10 = vector.load %arg4[%c0_7, %c0_8] : memref<128x128xf32, #tpu.memory_space<vmem>>, vector<128x128xf32>
    %cst_9 = arith.constant dense<0.000000e+00> : vector<128x128xf32>
    %11 = tpu.matmul %8, %10, %cst_9 {dimension_numbers = #tpu.dot_dimension_numbers<[1], [0], [0], [1], [0, 0, 1, 1], [], []>} : vector<128x128xf32>, vector<128x128xf32>, vector<128x128xf32> -> vector<128x128xf32>
    %cst_10 = arith.constant dense<0.000000e+00> : vector<128xf32>
    %12 = vector.multi_reduction <add>, %11, %cst_10 [0] : vector<128x128xf32> to vector<128xf32>
    %13 = vector.shape_cast %12 : vector<128xf32> to vector<1x128xf32>
    %c0_11 = arith.constant 0 : index
    %c0_12 = arith.constant 0 : index
    %c0_13 = arith.constant 0 : index
    %14 = vector.load %arg6[%c0_11, %c0_12, %c0_13] : memref<1x2x128xf32, #tpu.memory_space<vmem>>, vector<1x1x128xf32>
    %15 = vector.shape_cast %14 : vector<1x1x128xf32> to vector<1x128xf32>
    %16 = vector.shape_cast %13 : vector<1x128xf32> to vector<1x1x128xf32>
    tpu.vector_store %arg6[%c0_11, %c0_12, %c0_13], %16 {strides = array<i32>} : memref<1x2x128xf32, #tpu.memory_space<vmem>>, vector<1x1x128xf32>,
    %17 = arith.mulf %11, %11 : vector<128x128xf32>
    %cst_14 = arith.constant dense<0.000000e+00> : vector<128xf32>
    %18 = vector.multi_reduction <add>, %17, %cst_14 [0] : vector<128x128xf32> to vector<128xf32>
    %19 = vector.shape_cast %18 : vector<128xf32> to vector<1x128xf32>
    %c0_15 = arith.constant 0 : index
    %c1 = arith.constant 1 : index
    %c0_16 = arith.constant 0 : index
    %20 = vector.load %arg6[%c0_15, %c1, %c0_16] : memref<1x2x128xf32, #tpu.memory_space<vmem>>, vector<1x1x128xf32>
    %21 = vector.shape_cast %20 : vector<1x1x128xf32> to vector<1x128xf32>
    %22 = vector.shape_cast %19 : vector<1x128xf32> to vector<1x1x128xf32>
    tpu.vector_store %arg6[%c0_15, %c1, %c0_16], %22 {strides = array<i32>} : memref<1x2x128xf32, #tpu.memory_space<vmem>>, vector<1x1x128xf32>,
    return
  }
  func.func @transform_0(%arg0: i32) -> (i32, i32) {
    %c0_i32 = arith.constant 0 : i32
    %c0_i32_0 = arith.constant 0 : i32
    return %arg0, %c0_i32 : i32, i32
  }
  func.func @transform_1(%arg0: i32) -> (i32, i32) {
    %c0_i32 = arith.constant 0 : i32
    %c0_i32_0 = arith.constant 0 : i32
    %c0_i32_1 = arith.constant 0 : i32
    return %c0_i32, %c0_i32_0 : i32, i32
  }
  func.func @transform_2(%arg0: i32) -> (i32, i32) {
    %c0_i32 = arith.constant 0 : i32
    %c0_i32_0 = arith.constant 0 : i32
    %c0_i32_1 = arith.constant 0 : i32
    return %c0_i32, %c0_i32_0 : i32, i32
  }
  func.func @transform_3(%arg0: i32) -> (i32, i32) {
    %c0_i32 = arith.constant 0 : i32
    %c0_i32_0 = arith.constant 0 : i32
    %c0_i32_1 = arith.constant 0 : i32
    return %c0_i32, %c0_i32_0 : i32, i32
  }
  func.func @transform_4(%arg0: i32) -> (i32, i32) {
    %c0_i32 = arith.constant 0 : i32
    %c0_i32_0 = arith.constant 0 : i32
    return %arg0, %c0_i32 : i32, i32
  }
  func.func @transform_5(%arg0: i32) -> (i32, i32, i32) {
    %c0_i32 = arith.constant 0 : i32
    %c0_i32_0 = arith.constant 0 : i32
    %c0_i32_1 = arith.constant 0 : i32
    return %arg0, %c0_i32, %c0_i32_0 : i32, i32, i32
  }
}

module attributes {stable_mosaic.version = 11 : i64} {
  func.func @p4_kernel(%arg0: i32, %arg1: memref<128x128xf32, #tpu.memory_space<vmem>>, %arg2: memref<128x128xf32, #tpu.memory_space<vmem>>, %arg3: memref<128x128xf32, #tpu.memory_space<vmem>>, %arg4: memref<128x128xf32, #tpu.memory_space<vmem>>, %arg5: memref<1x128xf32, #tpu.memory_space<vmem>>, %arg6: memref<1x128xf32, #tpu.memory_space<vmem>>, %arg7: memref<1x128xf32, #tpu.memory_space<vmem>>, %arg8: memref<1x128xf32, #tpu.memory_space<vmem>>, %arg9: memref<128x128xf32, #tpu.memory_space<vmem>>) attributes {dimension_semantics = [#tpu.dimension_semantics<parallel>], iteration_bounds = array<i64: 4>, scalar_prefetch = 0 : i64, scratch_operands = 0 : i64, tpu.core_type = #tpu.core_type<tc>, window_params = [{transform_indices = @transform_0, window_bounds = array<i64: 128, 128>}, {transform_indices = @transform_1, window_bounds = array<i64: 128, 128>}, {pipeline_mode = #tpu.pipeline_mode<synchronous>, transform_indices = @transform_2, window_bounds = array<i64: 128, 128>}, {pipeline_mode = #tpu.pipeline_mode<synchronous>, transform_indices = @transform_3, window_bounds = array<i64: 128, 128>}, {pipeline_mode = #tpu.pipeline_mode<synchronous>, transform_indices = @transform_4, window_bounds = array<i64: 1, 128>}, {pipeline_mode = #tpu.pipeline_mode<synchronous>, transform_indices = @transform_5, window_bounds = array<i64: 1, 128>}, {pipeline_mode = #tpu.pipeline_mode<synchronous>, transform_indices = @transform_6, window_bounds = array<i64: 1, 128>}, {pipeline_mode = #tpu.pipeline_mode<synchronous>, transform_indices = @transform_7, window_bounds = array<i64: 1, 128>}, {transform_indices = @transform_8, window_bounds = array<i64: 128, 128>}]} {
    %c0 = arith.constant 0 : index
    %c0_0 = arith.constant 0 : index
    %0 = vector.load %arg1[%c0, %c0_0] : memref<128x128xf32, #tpu.memory_space<vmem>>, vector<128x128xf32>
    %c0_1 = arith.constant 0 : index
    %c0_2 = arith.constant 0 : index
    %1 = vector.load %arg3[%c0_1, %c0_2] : memref<128x128xf32, #tpu.memory_space<vmem>>, vector<128x128xf32>
    %cst = arith.constant dense<0.000000e+00> : vector<128x128xf32>
    %2 = tpu.matmul %0, %1, %cst {dimension_numbers = #tpu.dot_dimension_numbers<[1], [0], [0], [1], [0, 0, 1, 1], [], []>} : vector<128x128xf32>, vector<128x128xf32>, vector<128x128xf32> -> vector<128x128xf32>
    %c0_3 = arith.constant 0 : index
    %c0_4 = arith.constant 0 : index
    %3 = vector.load %arg5[%c0_3, %c0_4] : memref<1x128xf32, #tpu.memory_space<vmem>>, vector<1x128xf32>
    %4 = vector.broadcast %3 : vector<1x128xf32> to vector<128x128xf32>
    %5 = arith.mulf %2, %4 : vector<128x128xf32>
    %c0_5 = arith.constant 0 : index
    %c0_6 = arith.constant 0 : index
    %6 = vector.load %arg6[%c0_5, %c0_6] : memref<1x128xf32, #tpu.memory_space<vmem>>, vector<1x128xf32>
    %7 = vector.broadcast %6 : vector<1x128xf32> to vector<128x128xf32>
    %8 = arith.addf %5, %7 : vector<128x128xf32>
    %c0_7 = arith.constant 0 : index
    %c0_8 = arith.constant 0 : index
    %9 = vector.load %arg2[%c0_7, %c0_8] : memref<128x128xf32, #tpu.memory_space<vmem>>, vector<128x128xf32>
    %c0_9 = arith.constant 0 : index
    %c0_10 = arith.constant 0 : index
    %10 = vector.load %arg4[%c0_9, %c0_10] : memref<128x128xf32, #tpu.memory_space<vmem>>, vector<128x128xf32>
    %cst_11 = arith.constant dense<0.000000e+00> : vector<128x128xf32>
    %11 = tpu.matmul %9, %10, %cst_11 {dimension_numbers = #tpu.dot_dimension_numbers<[1], [0], [0], [1], [0, 0, 1, 1], [], []>} : vector<128x128xf32>, vector<128x128xf32>, vector<128x128xf32> -> vector<128x128xf32>
    %c0_12 = arith.constant 0 : index
    %c0_13 = arith.constant 0 : index
    %12 = vector.load %arg7[%c0_12, %c0_13] : memref<1x128xf32, #tpu.memory_space<vmem>>, vector<1x128xf32>
    %13 = vector.broadcast %12 : vector<1x128xf32> to vector<128x128xf32>
    %14 = arith.mulf %11, %13 : vector<128x128xf32>
    %c0_14 = arith.constant 0 : index
    %c0_15 = arith.constant 0 : index
    %15 = vector.load %arg8[%c0_14, %c0_15] : memref<1x128xf32, #tpu.memory_space<vmem>>, vector<1x128xf32>
    %16 = vector.broadcast %15 : vector<1x128xf32> to vector<128x128xf32>
    %17 = arith.addf %14, %16 : vector<128x128xf32>
    %18 = arith.addf %8, %17 : vector<128x128xf32>
    %cst_16 = arith.constant 0.000000e+00 : f32
    %19 = vector.broadcast %cst_16 : f32 to vector<128x128xf32>
    %20 = arith.maximumf %18, %19 : vector<128x128xf32>
    %c0_17 = arith.constant 0 : index
    %c0_18 = arith.constant 0 : index
    %21 = vector.load %arg9[%c0_17, %c0_18] : memref<128x128xf32, #tpu.memory_space<vmem>>, vector<128x128xf32>
    tpu.vector_store %arg9[%c0_17, %c0_18], %20 {strides = array<i32>} : memref<128x128xf32, #tpu.memory_space<vmem>>, vector<128x128xf32>,
    return
  }
  func.func @transform_0(%arg0: i32) -> (i32, i32) {
    %c0_i32 = arith.constant 0 : i32
    %c0_i32_0 = arith.constant 0 : i32
    return %arg0, %c0_i32 : i32, i32
  }
  func.func @transform_1(%arg0: i32) -> (i32, i32) {
    %c0_i32 = arith.constant 0 : i32
    %c0_i32_0 = arith.constant 0 : i32
    return %arg0, %c0_i32 : i32, i32
  }
  func.func @transform_2(%arg0: i32) -> (i32, i32) {
    %c0_i32 = arith.constant 0 : i32
    %c0_i32_0 = arith.constant 0 : i32
    %c0_i32_1 = arith.constant 0 : i32
    return %c0_i32, %c0_i32_0 : i32, i32
  }
  func.func @transform_3(%arg0: i32) -> (i32, i32) {
    %c0_i32 = arith.constant 0 : i32
    %c0_i32_0 = arith.constant 0 : i32
    %c0_i32_1 = arith.constant 0 : i32
    return %c0_i32, %c0_i32_0 : i32, i32
  }
  func.func @transform_4(%arg0: i32) -> (i32, i32) {
    %c0_i32 = arith.constant 0 : i32
    %c0_i32_0 = arith.constant 0 : i32
    %c0_i32_1 = arith.constant 0 : i32
    return %c0_i32, %c0_i32_0 : i32, i32
  }
  func.func @transform_5(%arg0: i32) -> (i32, i32) {
    %c0_i32 = arith.constant 0 : i32
    %c0_i32_0 = arith.constant 0 : i32
    %c0_i32_1 = arith.constant 0 : i32
    return %c0_i32, %c0_i32_0 : i32, i32
  }
  func.func @transform_6(%arg0: i32) -> (i32, i32) {
    %c0_i32 = arith.constant 0 : i32
    %c0_i32_0 = arith.constant 0 : i32
    %c0_i32_1 = arith.constant 0 : i32
    return %c0_i32, %c0_i32_0 : i32, i32
  }
  func.func @transform_7(%arg0: i32) -> (i32, i32) {
    %c0_i32 = arith.constant 0 : i32
    %c0_i32_0 = arith.constant 0 : i32
    %c0_i32_1 = arith.constant 0 : i32
    return %c0_i32, %c0_i32_0 : i32, i32
  }
  func.func @transform_8(%arg0: i32) -> (i32, i32) {
    %c0_i32 = arith.constant 0 : i32
    %c0_i32_0 = arith.constant 0 : i32
    return %arg0, %c0_i32 : i32, i32
  }
}

</mosaic_0001>

<bundles_post_ra>
// kernel: resnet_block_bottleneck.6
= control target key start
LH: loop header
LB: loop body
LE: loop exit
PB: predicated region body
PF: predicated region fallthrough
CT: control target
= control target key end

     0   :  { %s837_s18 = smov 0   ;;  %s1062_s0 = inlined_call_operand.vmem [shape: f32[512,128], index: 0, kind: input, shape index: {}]   ;;  %s1063_s1 = inlined_call_operand.vmem [shape: f32[1,128], index: 1, kind: input, shape index: {}]   ;;  %s1064_s2 = inlined_call_operand.vmem [shape: f32[1,128], index: 2, kind: input, shape index: {}]   ;;  %s1065_s3 = inlined_call_operand.vmem [shape: f32[128,128], index: 3, kind: input, shape index: {}]   ;;  %s1066_s4 = inlined_call_operand.vmem [shape: f32[512,128], index: 4, kind: output, shape index: {0}]   ;;  %s1067_s5 = inlined_call_operand.vmem [shape: f32[4,2,128], index: 5, kind: output, shape index: {1}]  }
   0x1 LB: > { %s843_s19 = sadd.s32 4294967295, %s805_s18   ;;  %p645_p0 = scmp.ge.s32.totalorder %s805_s18, 1  ;;  %s805_s18 = sphi %s837_s18, %s16_s18  }
   0x2   : > { %p191_p1 = scmp.lt.s32.totalorder %s805_s18, 5 }
   0x4   : > { %p192_p2 = pnand %p645_p0, %p191_p1 }
   0x5   : > { %v333_v0 = vld [vmem:[%s1065_s3] sm:$0xff] (!%p192_p2)  ;;  %v334_v1 = vld [vmem:[%s1065_s3 + $0x8] sm:$0xff] (!%p192_p2)  ;;  %v335_v2 = vld [vmem:[%s1065_s3 + $0x10] sm:$0xff] (!%p192_p2)  ;;  %s646_s26 = sshll.u32 (!%p192_p2), %s843_s19, 4  ;;  %p235_p4 = scmp.lt.s32.totalorder (!%p192_p2), %s843_s19, 3 }
   0x6   : > { %195 = sbr.rel (%p192_p2) target bundleno = 300 (0x12c), region = 36  ;;  %v743_v3 = vpack.c.bf16 (!%p192_p2), %v334_v1, %v333_v0  ;;  %v336_v4 = vld [vmem:[%s1065_s3 + $0x18] sm:$0xff] (!%p192_p2)  ;;  %p224_p3 = scmp.lt.s32.totalorder (!%p192_p2), %s646_s26, 63  ;;  %v337_v6 = vld [vmem:[%s1065_s3 + $0x20] sm:$0xff] (!%p192_p2)  ;;  %v338_v7 = vld [vmem:[%s1065_s3 + $0x28] sm:$0xff] (!%p192_p2) }
   0x7   : > { %v747_v5 = vpack.c.bf16 (!%p192_p2), %v336_v4, %v335_v2  ;;  %v339_v8 = vld [vmem:[%s1065_s3 + $0x30] sm:$0xff] (!%p192_p2)  ;;  %v340_v9 = vld [vmem:[%s1065_s3 + $0x38] sm:$0xff] (!%p192_p2)  ;;  %v341_v10 = vld [vmem:[%s1065_s3 + $0x40] sm:$0xff] (!%p192_p2)  ;;  %v751_v14 = vpack.c.bf16 (!%p192_p2), %v338_v7, %v337_v6 }
   0x8   : > { %744 = vmatprep.subr.bf16.mxu0 (!%p192_p2), %v743_v3  ;;  %775 = vmatprep.subr.bf16.mxu1 (!%p192_p2), %v743_v3  ;;  %v342_v11 = vld [vmem:[%s1065_s3 + $0x48] sm:$0xff] (!%p192_p2)  ;;  %v343_v12 = vld [vmem:[%s1065_s3 + $0x50] sm:$0xff] (!%p192_p2)  ;;  %v344_v13 = vld [vmem:[%s1065_s3 + $0x58] sm:$0xff] (!%p192_p2)  ;;  %v904_v17 = vpack.c.bf16 (!%p192_p2), %v340_v9, %v339_v8 }
   0x9   : > { %746 = vmatpush3.bf16.msra.mxu0 (!%p192_p2), %v743_v3  ;;  %783 = vmatpush3.bf16.msra.mxu1 (!%p192_p2), %v743_v3  ;;  %v890_v15 = vld [vmem:[%s1063_s1] ss:$0 sm:$0xff] (!%p192_p2)  ;;  %v906_v18 = vpack.c.bf16 (!%p192_p2), %v342_v11, %v341_v10  ;;  %v908_v19 = vpack.c.bf16 (!%p192_p2), %v344_v13, %v343_v12  ;;  %v346_v9 = vld [vmem:[%s1065_s3 + $0x68] sm:$0xff] (!%p192_p2) }
   0xa   : > { %748 = vmatprep.subr.bf16.mxu0 (!%p192_p2), %v747_v5  ;;  %776 = vmatprep.subr.bf16.mxu1 (!%p192_p2), %v747_v5  ;;  %v902_v16 = vld [vmem:[%s1064_s2] ss:$0 sm:$0xff] (!%p192_p2) }
   0xb   : > { %v345_v8 = vld [vmem:[%s1065_s3 + $0x60] sm:$0xff] (!%p192_p2) }
   0xd   : > { %s1069_s26 = smov (!%p224_p3, %s646_s26), 63  ;;  %750 = vmatpush3.bf16.msra.mxu0 %v747_v5  ;;  %784 = vmatpush3.bf16.msra.mxu1 %v747_v5  ;;  %s1071_s19 = smov (!%p235_p4, %s843_s19), 3 }
   0xe   : > { %s647_s22 = sshll.u32 %s1069_s26, 3  ;;  %752 = vmatprep.subr.bf16.mxu0 %v751_v14  ;;  %777 = vmatprep.subr.bf16.mxu1 %v751_v14  ;;  %s650_s16 = sshll.u32 %s1071_s19, 1 }
   0xf   : > { %s897_s28 = scalar_lea.vmem %s1062_s0, %s647_s22  ;;  %s937_s8 = scalar_lea.vmem %s1066_s4, %s647_s22 }
  0x10   : > { %v239_v20 = vld [vmem:[%s897_s28] sm:$0xff]  ;;  %v240_v21 = vld [vmem:[%s897_s28 + $0x8] sm:$0xff]  ;;  %v241_v22 = vld [vmem:[%s897_s28 + $0x10] sm:$0xff]  ;;  %s238_s21 = scalar_lea.vmem %s1067_s5, %s650_s16 }
  0x11   : > { %v262_v23 = vmul.f32 %v890_v15, %v239_v20  ;;  %v263_v24 = vmul.f32 %v890_v15, %v240_v21  ;;  %v264_v25 = vmul.f32 %v890_v15, %v241_v22  ;;  %v242_v26 = vld [vmem:[%s897_s28 + $0x18] sm:$0xff]  ;;  %v243_v27 = vld [vmem:[%s897_s28 + $0x20] sm:$0xff]  ;;  %v244_v28 = vld [vmem:[%s897_s28 + $0x28] sm:$0xff]  ;;  %754 = vmatpush3.bf16.msra.mxu0 %v751_v14  ;;  %785 = vmatpush3.bf16.msra.mxu1 %v751_v14 }
  0x12   : > { %v265_v29 = vmul.f32 %v890_v15, %v242_v26  ;;  %v266_v30 = vmul.f32 %v890_v15, %v243_v27  ;;  %v267_v31 = vmul.f32 %v890_v15, %v244_v28  ;;  %v245_v32 = vld [vmem:[%s897_s28 + $0x30] sm:$0xff]  ;;  %v246_v33 = vld [vmem:[%s897_s28 + $0x38] sm:$0xff]  ;;  %v247_v42 = vld [vmem:[%s897_s28 + $0x40] sm:$0xff]  ;;  %756 = vmatprep.subr.bf16.mxu0 %v904_v17  ;;  %778 = vmatprep.subr.bf16.mxu1 %v904_v17 }
  0x13   : > { %v285_v34 = vadd.f32 %v902_v16, %v262_v23  ;;  %v926_v35 = vadd.f32 %v902_v16, %v263_v24  ;;  %v929_v36 = vadd.f32 %v902_v16, %v264_v25  ;;  %v268_v37 = vmul.f32 %v890_v15, %v245_v32  ;;  %v248_v43 = vld [vmem:[%s897_s28 + $0x48] sm:$0xff]  ;;  %v249_v44 = vld [vmem:[%s897_s28 + $0x50] sm:$0xff]  ;;  %v250_v49 = vld [vmem:[%s897_s28 + $0x58] sm:$0xff] }
  0x14   : > { %v940_v38 = vadd.f32 %v902_v16, %v265_v29  ;;  %v943_v39 = vadd.f32 %v902_v16, %v266_v30  ;;  %v946_v40 = vadd.f32 %v902_v16, %v267_v31  ;;  %v269_v41 = vmul.f32 %v890_v15, %v246_v33  ;;  %v251_v50 = vld [vmem:[%s897_s28 + $0x60] sm:$0xff]  ;;  %v252_v51 = vld [vmem:[%s897_s28 + $0x68] sm:$0xff]  ;;  %v253_v0 = vld [vmem:[%s897_s28 + $0x70] sm:$0xff] }
  0x15   : > { %v301_v45 = vmax.f32 %v285_v34, 0.0  ;;  %v302_v46 = vmax.f32 %v926_v35, 0.0  ;;  %v303_v47 = vmax.f32 %v929_v36, 0.0  ;;  %v955_v48 = vadd.f32 %v902_v16, %v268_v37  ;;  %758 = vmatpush3.bf16.msra.mxu0 %v904_v17  ;;  %786 = vmatpush3.bf16.msra.mxu1 %v904_v17  ;;  %v254_v4 = vld [vmem:[%s897_s28 + $0x78] sm:$0xff] }
  0x16   : > { %v304_v52 = vmax.f32 %v940_v38, 0.0  ;;  %v305_v53 = vmax.f32 %v943_v39, 0.0  ;;  %v306_v54 = vmax.f32 %v946_v40, 0.0  ;;  %v966_v55 = vadd.f32 %v902_v16, %v269_v41  ;;  %760 = vmatprep.subr.bf16.mxu0 %v906_v18  ;;  %779 = vmatprep.subr.bf16.mxu1 %v906_v18  ;;  %v348_v24 = vld [vmem:[%s1065_s3 + $0x78] sm:$0xff] }
  0x17   : > { %317 = vst [vmem:[%s937_s8] sm:$0xff] %v301_v45  ;;  %719 = vmatprep.mubr.f32.mxu0 %v301_v45  ;;  %318 = vst [vmem:[%s937_s8 + $0x8] sm:$0xff] %v302_v46  ;;  %v307_v56 = vmax.f32 %v955_v48, 0.0  ;;  %v270_v57 = vmul.f32 %v890_v15, %v247_v42  ;;  %v271_v58 = vmul.f32 %v890_v15, %v248_v43 }
  0x18   : > { %319 = vst [vmem:[%s937_s8 + $0x10] sm:$0xff] %v303_v47  ;;  %v272_v59 = vmul.f32 %v890_v15, %v249_v44  ;;  %320 = vst [vmem:[%s937_s8 + $0x18] sm:$0xff] %v304_v52  ;;  %v308_v60 = vmax.f32 %v966_v55, 0.0  ;;  %v273_v61 = vmul.f32 %v890_v15, %v250_v49  ;;  %v274_v62 = vmul.f32 %v890_v15, %v251_v50 }
  0x19   : > { %321 = vst [vmem:[%s937_s8 + $0x20] sm:$0xff] %v305_v53  ;;  %322 = vst [vmem:[%s937_s8 + $0x28] sm:$0xff] %v306_v54  ;;  %v275_v63 = vmul.f32 %v890_v15, %v252_v51  ;;  %v293_v1 = vadd.f32 %v902_v16, %v270_v57  ;;  %v294_v2 = vadd.f32 %v902_v16, %v271_v58  ;;  %762 = vmatpush3.bf16.msra.mxu0 %v906_v18 }
  0x1a   : > { %323 = vst [vmem:[%s937_s8 + $0x30] sm:$0xff] %v307_v56  ;;  %v295_v3 = vadd.f32 %v902_v16, %v272_v59  ;;  %324 = vst [vmem:[%s937_s8 + $0x38] sm:$0xff] %v308_v60  ;;  %v296_v5 = vadd.f32 %v902_v16, %v273_v61  ;;  %v297_v6 = vadd.f32 %v902_v16, %v274_v62  ;;  %787 = vmatpush3.bf16.msra.mxu1 %v906_v18  ;;  %v347_v18 = vld [vmem:[%s1065_s3 + $0x70] sm:$0xff] }
  0x1b   : > { %v298_v7 = vadd.f32 %v902_v16, %v275_v63  ;;  %v309_v10 = vmax.f32 %v293_v1, 0.0  ;;  %v310_v11 = vmax.f32 %v294_v2, 0.0  ;;  %v276_v13 = vmul.f32 %v890_v15, %v253_v0  ;;  %764 = vmatprep.subr.bf16.mxu0 %v908_v19  ;;  %780 = vmatprep.subr.bf16.mxu1 %v908_v19 }
  0x1c   : > { %v311_v12 = vmax.f32 %v295_v3, 0.0  ;;  %v312_v14 = vmax.f32 %v296_v5, 0.0  ;;  %v313_v17 = vmax.f32 %v297_v6, 0.0  ;;  %v277_v21 = vmul.f32 %v890_v15, %v254_v4 }
  0x1d   : > { %v314_v20 = vmax.f32 %v298_v7, 0.0  ;;  %325 = vst [vmem:[%s937_s8 + $0x40] sm:$0xff] %v309_v10  ;;  %326 = vst [vmem:[%s937_s8 + $0x48] sm:$0xff] %v310_v11  ;;  %v299_v22 = vadd.f32 %v902_v16, %v276_v13  ;;  %v767_v23 = vpack.c.bf16 %v346_v9, %v345_v8  ;;  %731 = vmatprep.mubr.f32.mxu1 %v309_v10  ;;  %766 = vmatpush3.bf16.msra.mxu0 %v908_v19 }
  0x1e   : > { %327 = vst [vmem:[%s937_s8 + $0x50] sm:$0xff] %v311_v12  ;;  %328 = vst [vmem:[%s937_s8 + $0x58] sm:$0xff] %v312_v14  ;;  %v300_v15 = vadd.f32 %v902_v16, %v277_v21  ;;  %788 = vmatpush3.bf16.msra.mxu1 %v908_v19  ;;  %v771_v27 = vpack.c.bf16 %v348_v24, %v347_v18 }
  0x1f   : > { %329 = vst [vmem:[%s937_s8 + $0x60] sm:$0xff] %v313_v17  ;;  %330 = vst [vmem:[%s937_s8 + $0x68] sm:$0xff] %v314_v20  ;;  %v315_v25 = vmax.f32 %v299_v22, 0.0  ;;  %768 = vmatprep.subr.bf16.mxu0 %v767_v23  ;;  %781 = vmatprep.subr.bf16.mxu1 %v767_v23 }
  0x20   : > { %v316_v26 = vmax.f32 %v300_v15, 0.0 }
  0x21   : > { %331 = vst [vmem:[%s937_s8 + $0x70] sm:$0xff] %v315_v25  ;;  %770 = vmatpush3.bf16.msra.mxu0 %v767_v23 }
  0x22   : > { %332 = vst [vmem:[%s937_s8 + $0x78] sm:$0xff] %v316_v26  ;;  %789 = vmatpush3.bf16.msra.mxu1 %v767_v23  ;;  %772 = vmatprep.subr.bf16.mxu0 %v771_v27 }
  0x23   : > { %782 = vmatprep.subr.bf16.mxu1 %v771_v27 }
  0x25   : > { %774 = vmatpush3.bf16.msra.mxu0 %v771_v27 }
  0x26   : > { %790 = vmatpush3.bf16.msra.mxu1 %v771_v27 }
  0x28   : > { %720 = vmatmul.mubr.f32.vlgmr.msra.gmra.mrb[0].mxu0 %v302_v46 }
  0x29   : > { %732 = vmatmul.mubr.f32.vlgmr.msra.gmra.mrb[0].mxu1 %v310_v11  ;;  %722 = vmatprep.mubr.f32.mxu0 %v303_v47 }
  0x2a   : > { %734 = vmatprep.mubr.f32.mxu1 %v311_v12 }
  0x2c   : > { %723 = vmatmul.mubr.f32.gmra.mrb[2].mxu0 %v304_v52 }
  0x2d   : > { %735 = vmatmul.mubr.f32.gmra.mrb[2].mxu1 %v312_v14  ;;  %725 = vmatprep.mubr.f32.mxu0 %v305_v53 }
  0x2e   : > { %737 = vmatprep.mubr.f32.mxu1 %v313_v17 }
  0x30   : > { %726 = vmatmul.mubr.f32.gmra.mrb[4].mxu0 %v306_v54 }
  0x31   : > { %738 = vmatmul.mubr.f32.gmra.mrb[4].mxu1 %v314_v20  ;;  %728 = vmatprep.mubr.f32.mxu0 %v307_v56 }
  0x32   : > { %740 = vmatprep.mubr.f32.mxu1 %v315_v25 }
  0x34   : > { %729 = vmatmul.mubr.f32.gmra.mrb[6].mxu0 %v308_v60 }
  0x35   : > { %741 = vmatmul.mubr.f32.gmra.mrb[6].mxu1 %v316_v26 }
  0xfb   : > { %v721_v16 = vpop.f32.mrb[0].mxu0 }
  0xfc   : > { %v733_v19 = vpop.f32.mrb[0].mxu1  ;;  %v517_v28 = vmul.f32 %v721_v16, %v721_v16  ;;  %v415_v29 = vpop.f32.mrb[1].mxu0 }
  0xfd   : > { %v455_v30 = vpop.f32.mrb[1].mxu1  ;;  %v494_v31 = vadd.f32 %v721_v16, %v415_v29  ;;  %v516_v32 = vmul.f32 %v415_v29, %v415_v29  ;;  %v525_v2 = vmul.f32 %v733_v19, %v733_v19 }
  0xfe   : > { %v524_v63 = vmul.f32 %v455_v30, %v455_v30 }
  0xff   : > { %v532_v33 = vadd.f32 %v517_v28, %v516_v32  ;;  %v724_v34 = vpop.f32.mrb[2].mxu0 }
 0x100   : > { %v736_v35 = vpop.f32.mrb[2].mxu1  ;;  %v425_v36 = vpop.f32.mrb[3].mxu0  ;;  %v519_v40 = vmul.f32 %v724_v34, %v724_v34 }
 0x101   : > { %v465_v37 = vpop.f32.mrb[3].mxu1  ;;  %v495_v38 = vadd.f32 %v494_v31, %v425_v36  ;;  %v518_v39 = vmul.f32 %v425_v36, %v425_v36  ;;  %v527_v8 = vmul.f32 %v736_v35, %v736_v35 }
 0x102   : > { %v526_v5 = vmul.f32 %v465_v37, %v465_v37 }
 0x103   : > { %v533_v41 = vadd.f32 %v532_v33, %v518_v39  ;;  %v727_v42 = vpop.f32.mrb[4].mxu0  ;;  %v496_v43 = vadd.f32 %v724_v34, %v495_v38 }
 0x104   : > { %v739_v44 = vpop.f32.mrb[4].mxu1  ;;  %v435_v45 = vpop.f32.mrb[5].mxu0  ;;  %v521_v50 = vmul.f32 %v727_v42, %v727_v42 }
 0x105   : > { %v475_v46 = vpop.f32.mrb[5].mxu1  ;;  %v497_v47 = vadd.f32 %v496_v43, %v435_v45  ;;  %v520_v48 = vmul.f32 %v435_v45, %v435_v45  ;;  %v534_v49 = vadd.f32 %v533_v41, %v519_v40  ;;  %v529_v14 = vmul.f32 %v739_v44, %v739_v44 }
 0x106   : > { %v528_v11 = vmul.f32 %v475_v46, %v475_v46 }
 0x107   : > { %v535_v51 = vadd.f32 %v534_v49, %v520_v48  ;;  %v730_v52 = vpop.f32.mrb[6].mxu0  ;;  %v498_v53 = vadd.f32 %v727_v42, %v497_v47 }
 0x108   : > { %v742_v54 = vpop.f32.mrb[6].mxu1  ;;  %v445_v55 = vpop.f32.mrb[7].mxu0  ;;  %v523_v60 = vmul.f32 %v730_v52, %v730_v52 }
 0x109   : > { %v485_v56 = vpop.f32.mrb[7].mxu1  ;;  %v499_v57 = vadd.f32 %v498_v53, %v445_v55  ;;  %v522_v58 = vmul.f32 %v445_v55, %v445_v55  ;;  %v536_v59 = vadd.f32 %v535_v51, %v521_v50  ;;  %v531_v15 = vmul.f32 %v742_v54, %v742_v54 }
 0x10a   : > { %v530_v21 = vmul.f32 %v485_v56, %v485_v56 }
 0x10b   : > { %v500_v61 = vadd.f32 %v730_v52, %v499_v57  ;;  %v537_v62 = vadd.f32 %v536_v59, %v522_v58 }
 0x10d   : > { %v538_v0 = vadd.f32 %v537_v62, %v523_v60  ;;  %v501_v1 = vadd.f32 %v500_v61, %v455_v30 }
 0x10f   : > { %v539_v3 = vadd.f32 %v538_v0, %v524_v63  ;;  %v502_v4 = vadd.f32 %v733_v19, %v501_v1 }
 0x111   : > { %v503_v6 = vadd.f32 %v502_v4, %v465_v37  ;;  %v540_v7 = vadd.f32 %v539_v3, %v525_v2 }
 0x113   : > { %v541_v9 = vadd.f32 %v540_v7, %v526_v5  ;;  %v504_v10 = vadd.f32 %v736_v35, %v503_v6 }
 0x115   : > { %v505_v12 = vadd.f32 %v504_v10, %v475_v46  ;;  %v542_v13 = vadd.f32 %v541_v9, %v527_v8 }
 0x117   : > { %v543_v17 = vadd.f32 %v542_v13, %v528_v11  ;;  %v506_v20 = vadd.f32 %v739_v44, %v505_v12 }
 0x119   : > { %v507_v22 = vadd.f32 %v506_v20, %v485_v56  ;;  %v544_v23 = vadd.f32 %v543_v17, %v529_v14 }
 0x11b   : > { %v508_v18 = vadd.f32 %v742_v54, %v507_v22  ;;  %v545_v24 = vadd.f32 %v544_v23, %v530_v21 }
 0x11d   : > { %v509_v25 = vrot.slane %v508_v18, 4  ;;  %v546_v26 = vadd.f32 %v545_v24, %v531_v15 }
 0x11f   : > { %v510_v27 = vadd.f32 %v509_v25, %v508_v18  ;;  %v547_v16 = vrot.slane %v546_v26, 4 }
 0x121   : > { %v511_v19 = vrot.slane %v510_v27, 2  ;;  %v548_v28 = vadd.f32 %v547_v16, %v546_v26 }
 0x123   : > { %v512_v29 = vadd.f32 %v511_v19, %v510_v27  ;;  %v549_v30 = vrot.slane %v548_v28, 2 }
 0x125   : > { %v513_v31 = vrot.slane %v512_v29, 1  ;;  %v550_v32 = vadd.f32 %v549_v30, %v548_v28 }
 0x127   : > { %v514_v33 = vadd.f32 %v513_v31, %v512_v29  ;;  %v551_v34 = vrot.slane %v550_v32, 1 }
 0x129   : > { %515 = vst [vmem:[%s238_s21] sm:$0x1] %v514_v33  ;;  %v552_v35 = vadd.f32 %v551_v34, %v550_v32 }
 0x12b   : > { %553 = vst [vmem:[%s238_s21 + $0x1] sm:$0x1] %v552_v35 }
 0x12c PF: > { %s16_s18 = sadd.s32 1, %s805_s18  }
 0x12d   : > { %p13_p5 = scmp.ge.s32.totalorder %s16_s18, 6  }
 0x12f   :  { %15 = sbr.rel (!%p13_p5) target bundleno = 1 (0x1), region = 78 }

// kernel: resnet_block_bottleneck.4
= control target key start
LH: loop header
LB: loop body
LE: loop exit
PB: predicated region body
PF: predicated region fallthrough
CT: control target
= control target key end

     0   :  { %s1140_s18 = smov 0   ;;  %s1307_s0 = inlined_call_operand.vmem [shape: f32[512,128], index: 0, kind: input, shape index: {}]   ;;  %s1308_s1 = inlined_call_operand.vmem [shape: f32[128,128], index: 1, kind: input, shape index: {}]   ;;  %s1309_s2 = inlined_call_operand.vmem [shape: f32[128,128], index: 2, kind: input, shape index: {}]   ;;  %s1310_s3 = inlined_call_operand.vmem [shape: f32[512,128], index: 3, kind: output, shape index: {0}]   ;;  %s1311_s4 = inlined_call_operand.vmem [shape: f32[4,2,128], index: 4, kind: output, shape index: {1}]   ;;  %s1312_s5 = inlined_call_operand.vmem [shape: f32[4,2,128], index: 5, kind: output, shape index: {2}]  }
   0x1 LB: > { %s1146_s19 = sadd.s32 4294967295, %s1108_s18   ;;  %p845_p0 = scmp.ge.s32.totalorder %s1108_s18, 1  ;;  %s1108_s18 = sphi %s1140_s18, %s16_s18  }
   0x2   : > { %p193_p1 = scmp.lt.s32.totalorder %s1108_s18, 5 }
   0x4   : > { %p194_p2 = pnand %p845_p0, %p193_p1 }
   0x5   : > { %v265_v0 = vld [vmem:[%s1308_s1] sm:$0xff] (!%p194_p2)  ;;  %v266_v1 = vld [vmem:[%s1308_s1 + $0x8] sm:$0xff] (!%p194_p2)  ;;  %s846_s26 = sshll.u32 (!%p194_p2), %s1146_s19, 4  ;;  %v267_v5 = vld [vmem:[%s1308_s1 + $0x10] sm:$0xff] (!%p194_p2)  ;;  %p241_p4 = scmp.lt.s32.totalorder (!%p194_p2), %s1146_s19, 3 }
   0x6   : > { %197 = sbr.rel (%p194_p2) target bundleno = 302 (0x12e), region = 32  ;;  %v502_v2 = vld [vmem:[%s1309_s2] sm:$0xff] (!%p194_p2)  ;;  %v1030_v3 = vpack.c.bf16 (!%p194_p2), %v266_v1, %v265_v0  ;;  %v503_v4 = vld [vmem:[%s1309_s2 + $0x8] sm:$0xff] (!%p194_p2)  ;;  %v268_v6 = vld [vmem:[%s1308_s1 + $0x18] sm:$0xff] (!%p194_p2)  ;;  %p230_p3 = scmp.lt.s32.totalorder (!%p194_p2), %s846_s26, 63 }
   0x7   : > { %v1062_v7 = vpack.c.bf16 (!%p194_p2), %v503_v4, %v502_v2  ;;  %v1034_v8 = vpack.c.bf16 (!%p194_p2), %v268_v6, %v267_v5  ;;  %v504_v9 = vld [vmem:[%s1309_s2 + $0x10] sm:$0xff] (!%p194_p2)  ;;  %v505_v10 = vld [vmem:[%s1309_s2 + $0x18] sm:$0xff] (!%p194_p2)  ;;  %v269_v11 = vld [vmem:[%s1308_s1 + $0x20] sm:$0xff] (!%p194_p2) }
   0x8   : > { %1031 = vmatprep.subr.bf16.mxu0 (!%p194_p2), %v1030_v3  ;;  %v1066_v12 = vpack.c.bf16 (!%p194_p2), %v505_v10, %v504_v9  ;;  %v270_v13 = vld [vmem:[%s1308_s1 + $0x28] sm:$0xff] (!%p194_p2)  ;;  %v506_v14 = vld [vmem:[%s1309_s2 + $0x20] sm:$0xff] (!%p194_p2)  ;;  %v271_v18 = vld [vmem:[%s1308_s1 + $0x30] sm:$0xff] (!%p194_p2) }
   0x9   : > { %v507_v15 = vld [vmem:[%s1309_s2 + $0x28] sm:$0xff] (!%p194_p2)  ;;  %1063 = vmatprep.subr.bf16.mxu1 (!%p194_p2), %v1062_v7  ;;  %1033 = vmatpush3.bf16.msra.mxu0 (!%p194_p2), %v1030_v3  ;;  %v1038_v16 = vpack.c.bf16 (!%p194_p2), %v270_v13, %v269_v11  ;;  %v272_v19 = vld [vmem:[%s1308_s1 + $0x38] sm:$0xff] (!%p194_p2)  ;;  %v508_v20 = vld [vmem:[%s1309_s2 + $0x30] sm:$0xff] (!%p194_p2) }
   0xa   : > { %1065 = vmatpush3.bf16.msra.mxu1 (!%p194_p2), %v1062_v7  ;;  %1035 = vmatprep.subr.bf16.mxu0 (!%p194_p2), %v1034_v8  ;;  %v1070_v17 = vpack.c.bf16 (!%p194_p2), %v507_v15, %v506_v14  ;;  %v509_v21 = vld [vmem:[%s1309_s2 + $0x38] sm:$0xff] (!%p194_p2)  ;;  %v1042_v22 = vpack.c.bf16 (!%p194_p2), %v272_v19, %v271_v18  ;;  %v273_v24 = vld [vmem:[%s1308_s1 + $0x40] sm:$0xff] (!%p194_p2)  ;;  %v274_v25 = vld [vmem:[%s1308_s1 + $0x48] sm:$0xff] (!%p194_p2) }
   0xb   : > { %1067 = vmatprep.subr.bf16.mxu1 (!%p194_p2), %v1066_v12  ;;  %v1074_v23 = vpack.c.bf16 (!%p194_p2), %v509_v21, %v508_v20  ;;  %v510_v27 = vld [vmem:[%s1309_s2 + $0x40] sm:$0xff] (!%p194_p2)  ;;  %v511_v28 = vld [vmem:[%s1309_s2 + $0x48] sm:$0xff] (!%p194_p2)  ;;  %v1046_v29 = vpack.c.bf16 (!%p194_p2), %v274_v25, %v273_v24  ;;  %v275_v31 = vld [vmem:[%s1308_s1 + $0x50] sm:$0xff] (!%p194_p2) }
   0xc   : > { %v1078_v30 = vpack.c.bf16 (!%p194_p2), %v511_v28, %v510_v27  ;;  %v276_v32 = vld [vmem:[%s1308_s1 + $0x58] sm:$0xff] (!%p194_p2)  ;;  %v512_v33 = vld [vmem:[%s1309_s2 + $0x50] sm:$0xff] (!%p194_p2)  ;;  %v277_v37 = vld [vmem:[%s1308_s1 + $0x60] sm:$0xff] (!%p194_p2) }
   0xd   : > { %s1314_s26 = smov (!%p230_p3, %s846_s26), 63  ;;  %1037 = vmatpush3.bf16.msra.mxu0 %v1034_v8  ;;  %v513_v34 = vld [vmem:[%s1309_s2 + $0x58] sm:$0xff]  ;;  %v1050_v35 = vpack.c.bf16 %v276_v32, %v275_v31  ;;  %v278_v38 = vld [vmem:[%s1308_s1 + $0x68] sm:$0xff]  ;;  %v514_v39 = vld [vmem:[%s1309_s2 + $0x60] sm:$0xff]  ;;  %s1316_s19 = smov (!%p241_p4, %s1146_s19), 3 }
   0xe   : > { %s847_s22 = sshll.u32 %s1314_s26, 3  ;;  %1069 = vmatpush3.bf16.msra.mxu1 %v1066_v12  ;;  %1039 = vmatprep.subr.bf16.mxu0 %v1038_v16  ;;  %v1082_v36 = vpack.c.bf16 %v513_v34, %v512_v33  ;;  %v515_v40 = vld [vmem:[%s1309_s2 + $0x68] sm:$0xff]  ;;  %v1054_v41 = vpack.c.bf16 %v278_v38, %v277_v37  ;;  %v279_v43 = vld [vmem:[%s1308_s1 + $0x70] sm:$0xff]  ;;  %v280_v44 = vld [vmem:[%s1308_s1 + $0x78] sm:$0xff]  ;;  %s850_s26 = sshll.u32 %s1316_s19, 1 }
   0xf   : > { %s1207_s9 = scalar_lea.vmem %s1307_s0, %s847_s22  ;;  %1071 = vmatprep.subr.bf16.mxu1 %v1070_v17  ;;  %v1086_v42 = vpack.c.bf16 %v515_v40, %v514_v39  ;;  %v516_v45 = vld [vmem:[%s1309_s2 + $0x70] sm:$0xff]  ;;  %v517_v46 = vld [vmem:[%s1309_s2 + $0x78] sm:$0xff]  ;;  %v1058_v47 = vpack.c.bf16 %v280_v44, %v279_v43  ;;  %s1278_s28 = scalar_lea.vmem %s1310_s3, %s847_s22 }
  0x10   : > { %v249_v26 = vld [vmem:[%s1207_s9] sm:$0xff]  ;;  %v1090_v48 = vpack.c.bf16 %v517_v46, %v516_v45  ;;  %v250_v49 = vld [vmem:[%s1207_s9 + $0x8] sm:$0xff]  ;;  %v251_v50 = vld [vmem:[%s1207_s9 + $0x10] sm:$0xff]  ;;  %s244_s29 = scalar_lea.vmem %s1311_s4, %s850_s26  ;;  %s248_s7 = scalar_lea.vmem %s1312_s5, %s850_s26 }
  0x11   : > { %950 = vmatprep.mubr.f32.mxu0 %v249_v26  ;;  %1006 = vmatprep.mubr.f32.mxu1 %v249_v26  ;;  %v252_v51 = vld [vmem:[%s1207_s9 + $0x18] sm:$0xff]  ;;  %v253_v52 = vld [vmem:[%s1207_s9 + $0x20] sm:$0xff]  ;;  %v254_v53 = vld [vmem:[%s1207_s9 + $0x28] sm:$0xff] }
  0x12   : > { %1041 = vmatpush3.bf16.msra.mxu0 %v1038_v16  ;;  %1073 = vmatpush3.bf16.msra.mxu1 %v1070_v17  ;;  %v255_v54 = vld [vmem:[%s1207_s9 + $0x30] sm:$0xff]  ;;  %v256_v55 = vld [vmem:[%s1207_s9 + $0x38] sm:$0xff]  ;;  %v257_v56 = vld [vmem:[%s1207_s9 + $0x40] sm:$0xff] }
  0x13   : > { %1043 = vmatprep.subr.bf16.mxu0 %v1042_v22  ;;  %1075 = vmatprep.subr.bf16.mxu1 %v1074_v23  ;;  %v258_v57 = vld [vmem:[%s1207_s9 + $0x48] sm:$0xff]  ;;  %v259_v58 = vld [vmem:[%s1207_s9 + $0x50] sm:$0xff]  ;;  %v260_v59 = vld [vmem:[%s1207_s9 + $0x58] sm:$0xff] }
  0x14   : > { %v261_v60 = vld [vmem:[%s1207_s9 + $0x60] sm:$0xff]  ;;  %v262_v61 = vld [vmem:[%s1207_s9 + $0x68] sm:$0xff]  ;;  %v263_v62 = vld [vmem:[%s1207_s9 + $0x70] sm:$0xff] }
  0x15   : > { %v264_v63 = vld [vmem:[%s1207_s9 + $0x78] sm:$0xff] }
  0x16   : > { %1045 = vmatpush3.bf16.msra.mxu0 %v1042_v22  ;;  %1077 = vmatpush3.bf16.msra.mxu1 %v1074_v23 }
  0x17   : > { %1047 = vmatprep.subr.bf16.mxu0 %v1046_v29  ;;  %1079 = vmatprep.subr.bf16.mxu1 %v1078_v30 }
  0x1a   : > { %1049 = vmatpush3.bf16.msra.mxu0 %v1046_v29  ;;  %1081 = vmatpush3.bf16.msra.mxu1 %v1078_v30 }
  0x1b   : > { %1051 = vmatprep.subr.bf16.mxu0 %v1050_v35  ;;  %1083 = vmatprep.subr.bf16.mxu1 %v1082_v36 }
  0x1e   : > { %1053 = vmatpush3.bf16.msra.mxu0 %v1050_v35  ;;  %1085 = vmatpush3.bf16.msra.mxu1 %v1082_v36 }
  0x1f   : > { %1055 = vmatprep.subr.bf16.mxu0 %v1054_v41  ;;  %1087 = vmatprep.subr.bf16.mxu1 %v1086_v42 }
  0x22   : > { %1057 = vmatpush3.bf16.msra.mxu0 %v1054_v41  ;;  %1089 = vmatpush3.bf16.msra.mxu1 %v1086_v42 }
  0x23   : > { %1059 = vmatprep.subr.bf16.mxu0 %v1058_v47  ;;  %1091 = vmatprep.subr.bf16.mxu1 %v1090_v48 }
  0x26   : > { %1061 = vmatpush3.bf16.msra.mxu0 %v1058_v47  ;;  %1093 = vmatpush3.bf16.msra.mxu1 %v1090_v48 }
  0x29   : > { %951 = vmatmul.mubr.f32.vlgmr.msra.gmra.mrb[0].mxu0 %v250_v49  ;;  %1007 = vmatmul.mubr.f32.vlgmr.msra.gmra.mrb[0].mxu1 %v250_v49 }
  0x2a   : > { %953 = vmatprep.mubr.f32.mxu0 %v251_v50  ;;  %1009 = vmatprep.mubr.f32.mxu1 %v251_v50 }
  0x2d   : > { %954 = vmatmul.mubr.f32.gmra.mrb[2].mxu0 %v252_v51  ;;  %1010 = vmatmul.mubr.f32.gmra.mrb[2].mxu1 %v252_v51 }
  0x2e   : > { %956 = vmatprep.mubr.f32.mxu0 %v253_v52  ;;  %1012 = vmatprep.mubr.f32.mxu1 %v253_v52 }
  0x31   : > { %957 = vmatmul.mubr.f32.gmra.mrb[4].mxu0 %v254_v53  ;;  %1013 = vmatmul.mubr.f32.gmra.mrb[4].mxu1 %v254_v53 }
  0x32   : > { %959 = vmatprep.mubr.f32.mxu0 %v255_v54  ;;  %1015 = vmatprep.mubr.f32.mxu1 %v255_v54 }
  0x35   : > { %960 = vmatmul.mubr.f32.gmra.mrb[6].mxu0 %v256_v55  ;;  %1016 = vmatmul.mubr.f32.gmra.mrb[6].mxu1 %v256_v55 }
  0x36   : > { %962 = vmatprep.mubr.f32.mxu0 %v257_v56  ;;  %1018 = vmatprep.mubr.f32.mxu1 %v257_v56 }
  0x39   : > { %963 = vmatmul.mubr.f32.gmra.mrb[8].mxu0 %v258_v57  ;;  %1019 = vmatmul.mubr.f32.gmra.mrb[8].mxu1 %v258_v57 }
  0x3a   : > { %965 = vmatprep.mubr.f32.mxu0 %v259_v58  ;;  %1021 = vmatprep.mubr.f32.mxu1 %v259_v58 }
  0x3d   : > { %966 = vmatmul.mubr.f32.gmra.mrb[10].mxu0 %v260_v59  ;;  %1022 = vmatmul.mubr.f32.gmra.mrb[10].mxu1 %v260_v59 }
  0x3e   : > { %968 = vmatprep.mubr.f32.mxu0 %v261_v60  ;;  %1024 = vmatprep.mubr.f32.mxu1 %v261_v60 }
  0x41   : > { %969 = vmatmul.mubr.f32.gmra.mrb[12].mxu0 %v262_v61  ;;  %1025 = vmatmul.mubr.f32.gmra.mrb[12].mxu1 %v262_v61 }
  0x42   : > { %971 = vmatprep.mubr.f32.mxu0 %v263_v62  ;;  %1027 = vmatprep.mubr.f32.mxu1 %v263_v62 }
  0x45   : > { %972 = vmatmul.mubr.f32.gmra.mrb[14].mxu0 %v264_v63  ;;  %1028 = vmatmul.mubr.f32.gmra.mrb[14].mxu1 %v264_v63 }
  0xfc   : > { %v952_v0 = vpop.f32.mrb[0].mxu0  ;;  %v1008_v2 = vpop.f32.mrb[0].mxu1 }
  0xfd   : > { %427 = vst [vmem:[%s1278_s28 + $0x8] sm:$0xff] %v952_v0  ;;  %v465_v1 = vmul.f32 %v952_v0, %v952_v0  ;;  %v347_v3 = vpop.f32.mrb[1].mxu0  ;;  %v686_v4 = vmul.f32 %v1008_v2, %v1008_v2  ;;  %v584_v7 = vpop.f32.mrb[1].mxu1 }
  0xfe   : > { %426 = vst [vmem:[%s1278_s28] sm:$0xff] %v347_v3  ;;  %v442_v5 = vadd.f32 %v952_v0, %v347_v3  ;;  %v464_v6 = vmul.f32 %v347_v3, %v347_v3  ;;  %v663_v8 = vadd.f32 %v1008_v2, %v584_v7  ;;  %v685_v9 = vmul.f32 %v584_v7, %v584_v7 }
 0x100   : > { %v480_v10 = vadd.f32 %v465_v1, %v464_v6  ;;  %v955_v11 = vpop.f32.mrb[2].mxu0  ;;  %v701_v12 = vadd.f32 %v686_v4, %v685_v9  ;;  %v1011_v13 = vpop.f32.mrb[2].mxu1 }
 0x101   : > { %429 = vst [vmem:[%s1278_s28 + $0x18] sm:$0xff] %v955_v11  ;;  %v357_v14 = vpop.f32.mrb[3].mxu0  ;;  %v594_v17 = vpop.f32.mrb[3].mxu1  ;;  %v467_v20 = vmul.f32 %v955_v11, %v955_v11  ;;  %v688_v24 = vmul.f32 %v1011_v13, %v1011_v13 }
 0x102   : > { %428 = vst [vmem:[%s1278_s28 + $0x10] sm:$0xff] %v357_v14  ;;  %v443_v15 = vadd.f32 %v442_v5, %v357_v14  ;;  %v466_v16 = vmul.f32 %v357_v14, %v357_v14  ;;  %v664_v18 = vadd.f32 %v663_v8, %v594_v17  ;;  %v687_v19 = vmul.f32 %v594_v17, %v594_v17 }
 0x104   : > { %v481_v21 = vadd.f32 %v480_v10, %v466_v16  ;;  %v958_v22 = vpop.f32.mrb[4].mxu0  ;;  %v444_v23 = vadd.f32 %v955_v11, %v443_v15  ;;  %v702_v25 = vadd.f32 %v701_v12, %v687_v19  ;;  %v1014_v26 = vpop.f32.mrb[4].mxu1  ;;  %v665_v28 = vadd.f32 %v1011_v13, %v664_v18 }
 0x105   : > { %431 = vst [vmem:[%s1278_s28 + $0x28] sm:$0xff] %v958_v22  ;;  %v367_v27 = vpop.f32.mrb[5].mxu0  ;;  %v604_v32 = vpop.f32.mrb[5].mxu1  ;;  %v469_v36 = vmul.f32 %v958_v22, %v958_v22  ;;  %v690_v40 = vmul.f32 %v1014_v26, %v1014_v26 }
 0x106   : > { %430 = vst [vmem:[%s1278_s28 + $0x20] sm:$0xff] %v367_v27  ;;  %v445_v29 = vadd.f32 %v444_v23, %v367_v27  ;;  %v468_v30 = vmul.f32 %v367_v27, %v367_v27  ;;  %v482_v31 = vadd.f32 %v481_v21, %v467_v20  ;;  %v666_v33 = vadd.f32 %v665_v28, %v604_v32 }
 0x107   : > { %v689_v34 = vmul.f32 %v604_v32, %v604_v32  ;;  %v703_v35 = vadd.f32 %v702_v25, %v688_v24 }
 0x108   : > { %v483_v37 = vadd.f32 %v482_v31, %v468_v30  ;;  %v961_v38 = vpop.f32.mrb[6].mxu0  ;;  %v446_v39 = vadd.f32 %v958_v22, %v445_v29  ;;  %v1017_v42 = vpop.f32.mrb[6].mxu1  ;;  %v667_v44 = vadd.f32 %v1014_v26, %v666_v33 }
 0x109   : > { %v704_v41 = vadd.f32 %v703_v35, %v689_v34  ;;  %433 = vst [vmem:[%s1278_s28 + $0x38] sm:$0xff] %v961_v38  ;;  %v377_v43 = vpop.f32.mrb[7].mxu0  ;;  %v614_v48 = vpop.f32.mrb[7].mxu1  ;;  %v471_v52 = vmul.f32 %v961_v38, %v961_v38  ;;  %v692_v56 = vmul.f32 %v1017_v42, %v1017_v42 }
 0x10a   : > { %432 = vst [vmem:[%s1278_s28 + $0x30] sm:$0xff] %v377_v43  ;;  %v447_v45 = vadd.f32 %v446_v39, %v377_v43  ;;  %v470_v46 = vmul.f32 %v377_v43, %v377_v43  ;;  %v484_v47 = vadd.f32 %v483_v37, %v469_v36  ;;  %v668_v49 = vadd.f32 %v667_v44, %v614_v48 }
 0x10b   : > { %v691_v50 = vmul.f32 %v614_v48, %v614_v48  ;;  %v705_v51 = vadd.f32 %v704_v41, %v690_v40 }
 0x10c   : > { %v485_v53 = vadd.f32 %v484_v47, %v470_v46  ;;  %v964_v54 = vpop.f32.mrb[8].mxu0  ;;  %v448_v55 = vadd.f32 %v961_v38, %v447_v45  ;;  %v1020_v58 = vpop.f32.mrb[8].mxu1  ;;  %v669_v60 = vadd.f32 %v1017_v42, %v668_v49 }
 0x10d   : > { %v706_v57 = vadd.f32 %v705_v51, %v691_v50  ;;  %435 = vst [vmem:[%s1278_s28 + $0x48] sm:$0xff] %v964_v54  ;;  %v387_v59 = vpop.f32.mrb[9].mxu0  ;;  %v624_v0 = vpop.f32.mrb[9].mxu1  ;;  %v473_v4 = vmul.f32 %v964_v54, %v964_v54  ;;  %v694_v8 = vmul.f32 %v1020_v58, %v1020_v58 }
 0x10e   : > { %434 = vst [vmem:[%s1278_s28 + $0x40] sm:$0xff] %v387_v59  ;;  %v449_v61 = vadd.f32 %v448_v55, %v387_v59  ;;  %v472_v62 = vmul.f32 %v387_v59, %v387_v59  ;;  %v486_v63 = vadd.f32 %v485_v53, %v471_v52  ;;  %v670_v1 = vadd.f32 %v669_v60, %v624_v0 }
 0x10f   : > { %v693_v2 = vmul.f32 %v624_v0, %v624_v0  ;;  %v707_v3 = vadd.f32 %v706_v57, %v692_v56 }
 0x110   : > { %v487_v5 = vadd.f32 %v486_v63, %v472_v62  ;;  %v967_v6 = vpop.f32.mrb[10].mxu0  ;;  %v450_v7 = vadd.f32 %v964_v54, %v449_v61  ;;  %v1023_v10 = vpop.f32.mrb[10].mxu1  ;;  %v671_v12 = vadd.f32 %v1020_v58, %v670_v1 }
 0x111   : > { %v708_v9 = vadd.f32 %v707_v3, %v693_v2  ;;  %437 = vst [vmem:[%s1278_s28 + $0x58] sm:$0xff] %v967_v6  ;;  %v397_v11 = vpop.f32.mrb[11].mxu0  ;;  %v634_v16 = vpop.f32.mrb[11].mxu1  ;;  %v475_v20 = vmul.f32 %v967_v6, %v967_v6  ;;  %v696_v24 = vmul.f32 %v1023_v10, %v1023_v10 }
 0x112   : > { %436 = vst [vmem:[%s1278_s28 + $0x50] sm:$0xff] %v397_v11  ;;  %v451_v13 = vadd.f32 %v450_v7, %v397_v11  ;;  %v474_v14 = vmul.f32 %v397_v11, %v397_v11  ;;  %v488_v15 = vadd.f32 %v487_v5, %v473_v4  ;;  %v672_v17 = vadd.f32 %v671_v12, %v634_v16 }
 0x113   : > { %v695_v18 = vmul.f32 %v634_v16, %v634_v16  ;;  %v709_v19 = vadd.f32 %v708_v9, %v694_v8 }
 0x114   : > { %v489_v21 = vadd.f32 %v488_v15, %v474_v14  ;;  %v970_v22 = vpop.f32.mrb[12].mxu0  ;;  %v452_v23 = vadd.f32 %v967_v6, %v451_v13  ;;  %v1026_v26 = vpop.f32.mrb[12].mxu1  ;;  %v673_v28 = vadd.f32 %v1023_v10, %v672_v17 }
 0x115   : > { %v710_v25 = vadd.f32 %v709_v19, %v695_v18  ;;  %439 = vst [vmem:[%s1278_s28 + $0x68] sm:$0xff] %v970_v22  ;;  %v407_v27 = vpop.f32.mrb[13].mxu0  ;;  %v644_v32 = vpop.f32.mrb[13].mxu1  ;;  %v477_v36 = vmul.f32 %v970_v22, %v970_v22  ;;  %v698_v40 = vmul.f32 %v1026_v26, %v1026_v26 }
 0x116   : > { %438 = vst [vmem:[%s1278_s28 + $0x60] sm:$0xff] %v407_v27  ;;  %v453_v29 = vadd.f32 %v452_v23, %v407_v27  ;;  %v476_v30 = vmul.f32 %v407_v27, %v407_v27  ;;  %v490_v31 = vadd.f32 %v489_v21, %v475_v20  ;;  %v674_v33 = vadd.f32 %v673_v28, %v644_v32 }
 0x117   : > { %v697_v34 = vmul.f32 %v644_v32, %v644_v32  ;;  %v711_v35 = vadd.f32 %v710_v25, %v696_v24 }
 0x118   : > { %v491_v37 = vadd.f32 %v490_v31, %v476_v30  ;;  %v973_v38 = vpop.f32.mrb[14].mxu0  ;;  %v454_v39 = vadd.f32 %v970_v22, %v453_v29  ;;  %v1029_v42 = vpop.f32.mrb[14].mxu1  ;;  %v675_v44 = vadd.f32 %v1026_v26, %v674_v33 }
 0x119   : > { %v712_v41 = vadd.f32 %v711_v35, %v697_v34  ;;  %441 = vst [vmem:[%s1278_s28 + $0x78] sm:$0xff] %v973_v38  ;;  %v417_v43 = vpop.f32.mrb[15].mxu0  ;;  %v654_v48 = vpop.f32.mrb[15].mxu1  ;;  %v479_v52 = vmul.f32 %v973_v38, %v973_v38  ;;  %v700_v55 = vmul.f32 %v1029_v42, %v1029_v42 }
 0x11a   : > { %440 = vst [vmem:[%s1278_s28 + $0x70] sm:$0xff] %v417_v43  ;;  %v455_v45 = vadd.f32 %v454_v39, %v417_v43  ;;  %v478_v46 = vmul.f32 %v417_v43, %v417_v43  ;;  %v492_v47 = vadd.f32 %v491_v37, %v477_v36  ;;  %v676_v49 = vadd.f32 %v675_v44, %v654_v48 }
 0x11b   : > { %v699_v50 = vmul.f32 %v654_v48, %v654_v48  ;;  %v713_v51 = vadd.f32 %v712_v41, %v698_v40 }
 0x11c   : > { %v456_v53 = vadd.f32 %v973_v38, %v455_v45  ;;  %v493_v54 = vadd.f32 %v492_v47, %v478_v46  ;;  %v677_v56 = vadd.f32 %v1029_v42, %v676_v49 }
 0x11d   : > { %v714_v57 = vadd.f32 %v713_v51, %v699_v50 }
 0x11e   : > { %v457_v58 = vrot.slane %v456_v53, 4  ;;  %v494_v59 = vadd.f32 %v493_v54, %v479_v52  ;;  %v678_v60 = vrot.slane %v677_v56, 4 }
 0x11f   : > { %v715_v61 = vadd.f32 %v714_v57, %v700_v55 }
 0x120   : > { %v458_v62 = vadd.f32 %v457_v58, %v456_v53  ;;  %v495_v63 = vrot.slane %v494_v59, 4  ;;  %v679_v0 = vadd.f32 %v678_v60, %v677_v56 }
 0x121   : > { %v716_v1 = vrot.slane %v715_v61, 4 }
 0x122   : > { %v459_v2 = vrot.slane %v458_v62, 2  ;;  %v496_v3 = vadd.f32 %v495_v63, %v494_v59  ;;  %v680_v4 = vrot.slane %v679_v0, 2 }
 0x123   : > { %v717_v5 = vadd.f32 %v716_v1, %v715_v61 }
 0x124   : > { %v460_v6 = vadd.f32 %v459_v2, %v458_v62  ;;  %v497_v7 = vrot.slane %v496_v3, 2  ;;  %v681_v8 = vadd.f32 %v680_v4, %v679_v0 }
 0x125   : > { %v718_v9 = vrot.slane %v717_v5, 2 }
 0x126   : > { %v461_v10 = vrot.slane %v460_v6, 1  ;;  %v498_v11 = vadd.f32 %v497_v7, %v496_v3  ;;  %v682_v12 = vrot.slane %v681_v8, 1 }
 0x127   : > { %v719_v13 = vadd.f32 %v718_v9, %v717_v5 }
 0x128   : > { %v462_v14 = vadd.f32 %v461_v10, %v460_v6  ;;  %v499_v15 = vrot.slane %v498_v11, 1  ;;  %v683_v16 = vadd.f32 %v682_v12, %v681_v8 }
 0x129   : > { %v720_v17 = vrot.slane %v719_v13, 1 }
 0x12a   : > { %463 = vst [vmem:[%s244_s29] sm:$0x1] %v462_v14  ;;  %v500_v18 = vadd.f32 %v499_v15, %v498_v11  ;;  %684 = vst [vmem:[%s248_s7] sm:$0x1] %v683_v16 }
 0x12b   : > { %v721_v19 = vadd.f32 %v720_v17, %v719_v13 }
 0x12c   : > { %501 = vst [vmem:[%s244_s29 + $0x1] sm:$0x1] %v500_v18 }
 0x12d   : > { %722 = vst [vmem:[%s248_s7 + $0x1] sm:$0x1] %v721_v19 }
 0x12e PF: > { %s16_s18 = sadd.s32 1, %s1108_s18  }
 0x12f   : > { %p13_p5 = scmp.ge.s32.totalorder %s16_s18, 6  }
 0x131   :  { %15 = sbr.rel (!%p13_p5) target bundleno = 1 (0x1), region = 86 }

// kernel: resnet_block_bottleneck.7
= control target key start
LH: loop header
LB: loop body
LE: loop exit
PB: predicated region body
PF: predicated region fallthrough
CT: control target
= control target key end

     0   :  { %s1211_s27 = smov 0   ;;  %s1470_s0 = inlined_call_operand.vmem [shape: f32[512,128], index: 0, kind: input, shape index: {}]   ;;  %s1471_s1 = inlined_call_operand.vmem [shape: f32[512,128], index: 1, kind: input, shape index: {}]   ;;  %s1472_s2 = inlined_call_operand.vmem [shape: f32[128,128], index: 2, kind: input, shape index: {}]   ;;  %s1473_s3 = inlined_call_operand.vmem [shape: f32[128,128], index: 3, kind: input, shape index: {}]   ;;  %s1474_s4 = inlined_call_operand.vmem [shape: f32[1,128], index: 4, kind: input, shape index: {}]   ;;  %s1475_s5 = inlined_call_operand.vmem [shape: f32[1,128], index: 5, kind: input, shape index: {}]   ;;  %s1476_s6 = inlined_call_operand.vmem [shape: f32[1,128], index: 6, kind: input, shape index: {}]   ;;  %s1477_s7 = inlined_call_operand.vmem [shape: f32[1,128], index: 7, kind: input, shape index: {}]   ;;  %s1478_s8 = inlined_call_operand.vmem [shape: f32[512,128], index: 8, kind: output, shape index: {}]  }
   0x1 LB: > { %s893_s28 = sadd.s32 4294967295, %s1164_s27   ;;  %p897_p0 = scmp.ge.s32.totalorder %s1164_s27, 1  ;;  %s1164_s27 = sphi %s1211_s27, %s18_s27  }
   0x2   : > { %p274_p1 = scmp.lt.s32.totalorder %s1164_s27, 5 }
   0x4   : > { %p275_p2 = pnand %p897_p0, %p274_p1 }
   0x5   : > { %v347_v0 = vld [vmem:[%s1472_s2] sm:$0xff] (!%p275_p2)  ;;  %v348_v1 = vld [vmem:[%s1472_s2 + $0x8] sm:$0xff] (!%p275_p2)  ;;  %s898_s13 = sshll.u32 (!%p275_p2), %s893_s28, 4  ;;  %v349_v5 = vld [vmem:[%s1472_s2 + $0x10] sm:$0xff] (!%p275_p2) }
   0x6   : > { %278 = sbr.rel (%p275_p2) target bundleno = 291 (0x123), region = 52  ;;  %v570_v2 = vld [vmem:[%s1473_s3] sm:$0xff] (!%p275_p2)  ;;  %v1086_v3 = vpack.c.bf16 (!%p275_p2), %v348_v1, %v347_v0  ;;  %v571_v4 = vld [vmem:[%s1473_s3 + $0x8] sm:$0xff] (!%p275_p2)  ;;  %v350_v6 = vld [vmem:[%s1472_s2 + $0x18] sm:$0xff] (!%p275_p2)  ;;  %p314_p3 = scmp.lt.s32.totalorder (!%p275_p2), %s898_s13, 63 }
   0x7   : > { %v1118_v7 = vpack.c.bf16 (!%p275_p2), %v571_v4, %v570_v2  ;;  %v1090_v8 = vpack.c.bf16 (!%p275_p2), %v350_v6, %v349_v5  ;;  %v572_v9 = vld [vmem:[%s1473_s3 + $0x10] sm:$0xff] (!%p275_p2)  ;;  %v573_v10 = vld [vmem:[%s1473_s3 + $0x18] sm:$0xff] (!%p275_p2)  ;;  %v351_v11 = vld [vmem:[%s1472_s2 + $0x20] sm:$0xff] (!%p275_p2) }
   0x8   : > { %1087 = vmatprep.subr.bf16.mxu0 (!%p275_p2), %v1086_v3  ;;  %v1122_v12 = vpack.c.bf16 (!%p275_p2), %v573_v10, %v572_v9  ;;  %v352_v13 = vld [vmem:[%s1472_s2 + $0x28] sm:$0xff] (!%p275_p2)  ;;  %v574_v14 = vld [vmem:[%s1473_s3 + $0x20] sm:$0xff] (!%p275_p2)  ;;  %v353_v18 = vld [vmem:[%s1472_s2 + $0x30] sm:$0xff] (!%p275_p2) }
   0x9   : > { %v575_v15 = vld [vmem:[%s1473_s3 + $0x28] sm:$0xff] (!%p275_p2)  ;;  %1119 = vmatprep.subr.bf16.mxu1 (!%p275_p2), %v1118_v7  ;;  %1089 = vmatpush3.bf16.msra.mxu0 (!%p275_p2), %v1086_v3  ;;  %v1094_v16 = vpack.c.bf16 (!%p275_p2), %v352_v13, %v351_v11  ;;  %v354_v19 = vld [vmem:[%s1472_s2 + $0x38] sm:$0xff] (!%p275_p2)  ;;  %v576_v20 = vld [vmem:[%s1473_s3 + $0x30] sm:$0xff] (!%p275_p2) }
   0xa   : > { %1121 = vmatpush3.bf16.msra.mxu1 (!%p275_p2), %v1118_v7  ;;  %1091 = vmatprep.subr.bf16.mxu0 (!%p275_p2), %v1090_v8  ;;  %v1126_v17 = vpack.c.bf16 (!%p275_p2), %v575_v15, %v574_v14  ;;  %v577_v21 = vld [vmem:[%s1473_s3 + $0x38] sm:$0xff] (!%p275_p2)  ;;  %v1098_v22 = vpack.c.bf16 (!%p275_p2), %v354_v19, %v353_v18  ;;  %v355_v24 = vld [vmem:[%s1472_s2 + $0x40] sm:$0xff] (!%p275_p2)  ;;  %v356_v25 = vld [vmem:[%s1472_s2 + $0x48] sm:$0xff] (!%p275_p2) }
   0xb   : > { %1123 = vmatprep.subr.bf16.mxu1 (!%p275_p2), %v1122_v12  ;;  %v1130_v23 = vpack.c.bf16 (!%p275_p2), %v577_v21, %v576_v20  ;;  %v578_v27 = vld [vmem:[%s1473_s3 + $0x40] sm:$0xff] (!%p275_p2)  ;;  %v579_v28 = vld [vmem:[%s1473_s3 + $0x48] sm:$0xff] (!%p275_p2)  ;;  %v1102_v30 = vpack.c.bf16 (!%p275_p2), %v356_v25, %v355_v24  ;;  %v357_v32 = vld [vmem:[%s1472_s2 + $0x50] sm:$0xff] (!%p275_p2) }
   0xc   : > { %v1134_v31 = vpack.c.bf16 (!%p275_p2), %v579_v28, %v578_v27  ;;  %v358_v33 = vld [vmem:[%s1472_s2 + $0x58] sm:$0xff] (!%p275_p2)  ;;  %v580_v34 = vld [vmem:[%s1473_s3 + $0x50] sm:$0xff] (!%p275_p2)  ;;  %v359_v38 = vld [vmem:[%s1472_s2 + $0x60] sm:$0xff] (!%p275_p2) }
   0xd   : > { %s1480_s13 = smov (!%p314_p3, %s898_s13), 63  ;;  %1093 = vmatpush3.bf16.msra.mxu0 %v1090_v8  ;;  %v581_v35 = vld [vmem:[%s1473_s3 + $0x58] sm:$0xff]  ;;  %v1106_v36 = vpack.c.bf16 %v358_v33, %v357_v32  ;;  %v360_v39 = vld [vmem:[%s1472_s2 + $0x68] sm:$0xff]  ;;  %v582_v40 = vld [vmem:[%s1473_s3 + $0x60] sm:$0xff] }
   0xe   : > { %s1255_s11 = sshll.u32 %s1480_s13, 3  ;;  %1125 = vmatpush3.bf16.msra.mxu1 %v1122_v12  ;;  %1095 = vmatprep.subr.bf16.mxu0 %v1094_v16  ;;  %v1138_v37 = vpack.c.bf16 %v581_v35, %v580_v34  ;;  %v583_v41 = vld [vmem:[%s1473_s3 + $0x68] sm:$0xff]  ;;  %v1110_v42 = vpack.c.bf16 %v360_v39, %v359_v38  ;;  %v361_v44 = vld [vmem:[%s1472_s2 + $0x70] sm:$0xff]  ;;  %v362_v45 = vld [vmem:[%s1472_s2 + $0x78] sm:$0xff] }
   0xf   : > { %s1273_s22 = scalar_lea.vmem %s1470_s0, %s1255_s11  ;;  %s1279_s25 = scalar_lea.vmem %s1471_s1, %s1255_s11  ;;  %1127 = vmatprep.subr.bf16.mxu1 %v1126_v17  ;;  %v1142_v43 = vpack.c.bf16 %v583_v41, %v582_v40  ;;  %v584_v46 = vld [vmem:[%s1473_s3 + $0x70] sm:$0xff]  ;;  %v585_v47 = vld [vmem:[%s1473_s3 + $0x78] sm:$0xff]  ;;  %v1114_v48 = vpack.c.bf16 %v362_v45, %v361_v44  ;;  %v1374_v19 = vld [vmem:[%s1475_s5] ss:$0 sm:$0xff] }
  0x10   : > { %v331_v26 = vld [vmem:[%s1273_s22] sm:$0xff]  ;;  %v1146_v49 = vpack.c.bf16 %v585_v47, %v584_v46  ;;  %v332_v50 = vld [vmem:[%s1273_s22 + $0x8] sm:$0xff]  ;;  %v333_v52 = vld [vmem:[%s1273_s22 + $0x10] sm:$0xff]  ;;  %s1396_s9 = scalar_lea.vmem %s1478_s8, %s1255_s11 }
  0x11   : > { %1006 = vmatprep.mubr.f32.mxu0 %v331_v26  ;;  %v554_v29 = vld [vmem:[%s1279_s25] sm:$0xff]  ;;  %1097 = vmatpush3.bf16.msra.mxu0 %v1094_v16  ;;  %v555_v51 = vld [vmem:[%s1279_s25 + $0x8] sm:$0xff]  ;;  %v556_v53 = vld [vmem:[%s1279_s25 + $0x10] sm:$0xff] }
  0x12   : > { %1062 = vmatprep.mubr.f32.mxu1 %v554_v29  ;;  %1129 = vmatpush3.bf16.msra.mxu1 %v1126_v17  ;;  %v334_v54 = vld [vmem:[%s1273_s22 + $0x18] sm:$0xff]  ;;  %v335_v56 = vld [vmem:[%s1273_s22 + $0x20] sm:$0xff]  ;;  %v336_v58 = vld [vmem:[%s1273_s22 + $0x28] sm:$0xff] }
  0x13   : > { %1099 = vmatprep.subr.bf16.mxu0 %v1098_v22  ;;  %1131 = vmatprep.subr.bf16.mxu1 %v1130_v23  ;;  %v557_v55 = vld [vmem:[%s1279_s25 + $0x18] sm:$0xff]  ;;  %v558_v57 = vld [vmem:[%s1279_s25 + $0x20] sm:$0xff]  ;;  %v559_v59 = vld [vmem:[%s1279_s25 + $0x28] sm:$0xff] }
  0x14   : > { %v337_v60 = vld [vmem:[%s1273_s22 + $0x30] sm:$0xff]  ;;  %v338_v62 = vld [vmem:[%s1273_s22 + $0x38] sm:$0xff]  ;;  %v339_v0 = vld [vmem:[%s1273_s22 + $0x40] sm:$0xff] }
  0x15   : > { %1101 = vmatpush3.bf16.msra.mxu0 %v1098_v22  ;;  %v560_v61 = vld [vmem:[%s1279_s25 + $0x30] sm:$0xff]  ;;  %v561_v63 = vld [vmem:[%s1279_s25 + $0x38] sm:$0xff]  ;;  %v562_v1 = vld [vmem:[%s1279_s25 + $0x40] sm:$0xff] }
  0x16   : > { %1133 = vmatpush3.bf16.msra.mxu1 %v1130_v23  ;;  %1103 = vmatprep.subr.bf16.mxu0 %v1102_v30  ;;  %v340_v2 = vld [vmem:[%s1273_s22 + $0x48] sm:$0xff]  ;;  %v341_v4 = vld [vmem:[%s1273_s22 + $0x50] sm:$0xff]  ;;  %v342_v6 = vld [vmem:[%s1273_s22 + $0x58] sm:$0xff] }
  0x17   : > { %1135 = vmatprep.subr.bf16.mxu1 %v1134_v31  ;;  %v563_v3 = vld [vmem:[%s1279_s25 + $0x48] sm:$0xff]  ;;  %v564_v5 = vld [vmem:[%s1279_s25 + $0x50] sm:$0xff]  ;;  %v565_v7 = vld [vmem:[%s1279_s25 + $0x58] sm:$0xff] }
  0x18   : > { %v343_v8 = vld [vmem:[%s1273_s22 + $0x60] sm:$0xff]  ;;  %v344_v10 = vld [vmem:[%s1273_s22 + $0x68] sm:$0xff]  ;;  %v345_v12 = vld [vmem:[%s1273_s22 + $0x70] sm:$0xff] }
  0x19   : > { %1105 = vmatpush3.bf16.msra.mxu0 %v1102_v30  ;;  %v566_v9 = vld [vmem:[%s1279_s25 + $0x60] sm:$0xff]  ;;  %v567_v11 = vld [vmem:[%s1279_s25 + $0x68] sm:$0xff]  ;;  %v568_v13 = vld [vmem:[%s1279_s25 + $0x70] sm:$0xff] }
  0x1a   : > { %1137 = vmatpush3.bf16.msra.mxu1 %v1134_v31  ;;  %1107 = vmatprep.subr.bf16.mxu0 %v1106_v36  ;;  %v346_v14 = vld [vmem:[%s1273_s22 + $0x78] sm:$0xff]  ;;  %v1364_v16 = vld [vmem:[%s1474_s4] ss:$0 sm:$0xff] }
  0x1b   : > { %1139 = vmatprep.subr.bf16.mxu1 %v1138_v37  ;;  %v569_v15 = vld [vmem:[%s1279_s25 + $0x78] sm:$0xff]  ;;  %v1369_v17 = vld [vmem:[%s1476_s6] ss:$0 sm:$0xff] }
  0x1c   : > { %v1380_v22 = vld [vmem:[%s1477_s7] ss:$0 sm:$0xff] }
  0x1d   : > { %1109 = vmatpush3.bf16.msra.mxu0 %v1106_v36 }
  0x1e   : > { %1141 = vmatpush3.bf16.msra.mxu1 %v1138_v37  ;;  %1111 = vmatprep.subr.bf16.mxu0 %v1110_v42 }
  0x1f   : > { %1143 = vmatprep.subr.bf16.mxu1 %v1142_v43 }
  0x21   : > { %1113 = vmatpush3.bf16.msra.mxu0 %v1110_v42 }
  0x22   : > { %1145 = vmatpush3.bf16.msra.mxu1 %v1142_v43  ;;  %1115 = vmatprep.subr.bf16.mxu0 %v1114_v48 }
  0x23   : > { %1147 = vmatprep.subr.bf16.mxu1 %v1146_v49 }
  0x25   : > { %1117 = vmatpush3.bf16.msra.mxu0 %v1114_v48 }
  0x26   : > { %1149 = vmatpush3.bf16.msra.mxu1 %v1146_v49 }
  0x28   : > { %1007 = vmatmul.mubr.f32.vlgmr.msra.gmra.mrb[0].mxu0 %v332_v50 }
  0x29   : > { %1063 = vmatmul.mubr.f32.vlgmr.msra.gmra.mrb[0].mxu1 %v555_v51  ;;  %1009 = vmatprep.mubr.f32.mxu0 %v333_v52 }
  0x2a   : > { %1065 = vmatprep.mubr.f32.mxu1 %v556_v53 }
  0x2c   : > { %1010 = vmatmul.mubr.f32.gmra.mrb[2].mxu0 %v334_v54 }
  0x2d   : > { %1066 = vmatmul.mubr.f32.gmra.mrb[2].mxu1 %v557_v55  ;;  %1012 = vmatprep.mubr.f32.mxu0 %v335_v56 }
  0x2e   : > { %1068 = vmatprep.mubr.f32.mxu1 %v558_v57 }
  0x30   : > { %1013 = vmatmul.mubr.f32.gmra.mrb[4].mxu0 %v336_v58 }
  0x31   : > { %1069 = vmatmul.mubr.f32.gmra.mrb[4].mxu1 %v559_v59  ;;  %1015 = vmatprep.mubr.f32.mxu0 %v337_v60 }
  0x32   : > { %1071 = vmatprep.mubr.f32.mxu1 %v560_v61 }
  0x34   : > { %1016 = vmatmul.mubr.f32.gmra.mrb[6].mxu0 %v338_v62 }
  0x35   : > { %1072 = vmatmul.mubr.f32.gmra.mrb[6].mxu1 %v561_v63  ;;  %1018 = vmatprep.mubr.f32.mxu0 %v339_v0 }
  0x36   : > { %1074 = vmatprep.mubr.f32.mxu1 %v562_v1 }
  0x38   : > { %1019 = vmatmul.mubr.f32.gmra.mrb[8].mxu0 %v340_v2 }
  0x39   : > { %1075 = vmatmul.mubr.f32.gmra.mrb[8].mxu1 %v563_v3  ;;  %1021 = vmatprep.mubr.f32.mxu0 %v341_v4 }
  0x3a   : > { %1077 = vmatprep.mubr.f32.mxu1 %v564_v5 }
  0x3c   : > { %1022 = vmatmul.mubr.f32.gmra.mrb[10].mxu0 %v342_v6 }
  0x3d   : > { %1078 = vmatmul.mubr.f32.gmra.mrb[10].mxu1 %v565_v7  ;;  %1024 = vmatprep.mubr.f32.mxu0 %v343_v8 }
  0x3e   : > { %1080 = vmatprep.mubr.f32.mxu1 %v566_v9 }
  0x40   : > { %1025 = vmatmul.mubr.f32.gmra.mrb[12].mxu0 %v344_v10 }
  0x41   : > { %1081 = vmatmul.mubr.f32.gmra.mrb[12].mxu1 %v567_v11  ;;  %1027 = vmatprep.mubr.f32.mxu0 %v345_v12 }
  0x42   : > { %1083 = vmatprep.mubr.f32.mxu1 %v568_v13 }
  0x44   : > { %1028 = vmatmul.mubr.f32.gmra.mrb[14].mxu0 %v346_v14 }
  0x45   : > { %1084 = vmatmul.mubr.f32.gmra.mrb[14].mxu1 %v569_v15 }
  0xfb   : > { %v1008_v18 = vpop.f32.mrb[0].mxu0 }
  0xfc   : > { %v516_v20 = vmul.f32 %v1008_v18, %v1364_v16  ;;  %v1064_v21 = vpop.f32.mrb[0].mxu1  ;;  %v429_v23 = vpop.f32.mrb[1].mxu0 }
  0xfd   : > { %v739_v24 = vmul.f32 %v1064_v21, %v1369_v17  ;;  %v515_v25 = vmul.f32 %v1364_v16, %v429_v23  ;;  %v652_v26 = vpop.f32.mrb[1].mxu1 }
  0xfe   : > { %v539_v27 = vadd.f32 %v1374_v19, %v516_v20  ;;  %v738_v28 = vmul.f32 %v1369_v17, %v652_v26 }
  0xff   : > { %v762_v29 = vadd.f32 %v1380_v22, %v739_v24  ;;  %v538_v30 = vadd.f32 %v1374_v19, %v515_v25  ;;  %v1011_v31 = vpop.f32.mrb[2].mxu0 }
 0x100   : > { %v761_v32 = vadd.f32 %v1380_v22, %v738_v28  ;;  %v518_v33 = vmul.f32 %v1011_v31, %v1364_v16  ;;  %v1067_v34 = vpop.f32.mrb[2].mxu1  ;;  %v439_v35 = vpop.f32.mrb[3].mxu0 }
 0x101   : > { %v778_v36 = vadd.f32 %v762_v29, %v539_v27  ;;  %v741_v37 = vmul.f32 %v1067_v34, %v1369_v17  ;;  %v517_v38 = vmul.f32 %v1364_v16, %v439_v35  ;;  %v662_v39 = vpop.f32.mrb[3].mxu1 }
 0x102   : > { %v777_v40 = vadd.f32 %v761_v32, %v538_v30  ;;  %v541_v41 = vadd.f32 %v1374_v19, %v518_v33  ;;  %v740_v42 = vmul.f32 %v1369_v17, %v662_v39 }
 0x103   : > { %v794_v43 = vmax.f32 %v778_v36, 0.0  ;;  %v764_v44 = vadd.f32 %v1380_v22, %v741_v37  ;;  %v540_v45 = vadd.f32 %v1374_v19, %v517_v38  ;;  %v1014_v46 = vpop.f32.mrb[4].mxu0 }
 0x104   : > { %v793_v47 = vmax.f32 %v777_v40, 0.0  ;;  %v763_v48 = vadd.f32 %v1380_v22, %v740_v42  ;;  %v520_v49 = vmul.f32 %v1014_v46, %v1364_v16  ;;  %v1070_v50 = vpop.f32.mrb[4].mxu1  ;;  %v449_v51 = vpop.f32.mrb[5].mxu0 }
 0x105   : > { %810 = vst [vmem:[%s1396_s9 + $0x8] sm:$0xff] %v794_v43  ;;  %v780_v52 = vadd.f32 %v764_v44, %v541_v41  ;;  %v743_v53 = vmul.f32 %v1070_v50, %v1369_v17  ;;  %v519_v54 = vmul.f32 %v1364_v16, %v449_v51  ;;  %v672_v55 = vpop.f32.mrb[5].mxu1 }
 0x106   : > { %809 = vst [vmem:[%s1396_s9] sm:$0xff] %v793_v47  ;;  %v779_v56 = vadd.f32 %v763_v48, %v540_v45  ;;  %v543_v57 = vadd.f32 %v1374_v19, %v520_v49  ;;  %v742_v58 = vmul.f32 %v1369_v17, %v672_v55 }
 0x107   : > { %v796_v59 = vmax.f32 %v780_v52, 0.0  ;;  %v766_v60 = vadd.f32 %v1380_v22, %v743_v53  ;;  %v542_v61 = vadd.f32 %v1374_v19, %v519_v54  ;;  %v1017_v62 = vpop.f32.mrb[6].mxu0 }
 0x108   : > { %v795_v63 = vmax.f32 %v779_v56, 0.0  ;;  %v765_v0 = vadd.f32 %v1380_v22, %v742_v58  ;;  %v522_v1 = vmul.f32 %v1017_v62, %v1364_v16  ;;  %v1073_v2 = vpop.f32.mrb[6].mxu1  ;;  %v459_v3 = vpop.f32.mrb[7].mxu0 }
 0x109   : > { %812 = vst [vmem:[%s1396_s9 + $0x18] sm:$0xff] %v796_v59  ;;  %v782_v4 = vadd.f32 %v766_v60, %v543_v57  ;;  %v745_v5 = vmul.f32 %v1073_v2, %v1369_v17  ;;  %v521_v6 = vmul.f32 %v1364_v16, %v459_v3  ;;  %v682_v7 = vpop.f32.mrb[7].mxu1 }
 0x10a   : > { %811 = vst [vmem:[%s1396_s9 + $0x10] sm:$0xff] %v795_v63  ;;  %v781_v8 = vadd.f32 %v765_v0, %v542_v61  ;;  %v545_v9 = vadd.f32 %v1374_v19, %v522_v1  ;;  %v744_v10 = vmul.f32 %v1369_v17, %v682_v7 }
 0x10b   : > { %v798_v11 = vmax.f32 %v782_v4, 0.0  ;;  %v768_v12 = vadd.f32 %v1380_v22, %v745_v5  ;;  %v544_v13 = vadd.f32 %v1374_v19, %v521_v6  ;;  %v1020_v14 = vpop.f32.mrb[8].mxu0 }
 0x10c   : > { %v797_v15 = vmax.f32 %v781_v8, 0.0  ;;  %v767_v18 = vadd.f32 %v1380_v22, %v744_v10  ;;  %v524_v20 = vmul.f32 %v1020_v14, %v1364_v16  ;;  %v1076_v21 = vpop.f32.mrb[8].mxu1  ;;  %v469_v23 = vpop.f32.mrb[9].mxu0 }
 0x10d   : > { %814 = vst [vmem:[%s1396_s9 + $0x28] sm:$0xff] %v798_v11  ;;  %v784_v24 = vadd.f32 %v768_v12, %v545_v9  ;;  %v747_v25 = vmul.f32 %v1076_v21, %v1369_v17  ;;  %v523_v26 = vmul.f32 %v1364_v16, %v469_v23  ;;  %v692_v27 = vpop.f32.mrb[9].mxu1 }
 0x10e   : > { %813 = vst [vmem:[%s1396_s9 + $0x20] sm:$0xff] %v797_v15  ;;  %v783_v28 = vadd.f32 %v767_v18, %v544_v13  ;;  %v547_v29 = vadd.f32 %v1374_v19, %v524_v20  ;;  %v746_v30 = vmul.f32 %v1369_v17, %v692_v27 }
 0x10f   : > { %v800_v31 = vmax.f32 %v784_v24, 0.0  ;;  %v770_v32 = vadd.f32 %v1380_v22, %v747_v25  ;;  %v546_v33 = vadd.f32 %v1374_v19, %v523_v26  ;;  %v1023_v34 = vpop.f32.mrb[10].mxu0 }
 0x110   : > { %v799_v35 = vmax.f32 %v783_v28, 0.0  ;;  %v769_v36 = vadd.f32 %v1380_v22, %v746_v30  ;;  %v526_v37 = vmul.f32 %v1023_v34, %v1364_v16  ;;  %v1079_v38 = vpop.f32.mrb[10].mxu1  ;;  %v479_v39 = vpop.f32.mrb[11].mxu0 }
 0x111   : > { %816 = vst [vmem:[%s1396_s9 + $0x38] sm:$0xff] %v800_v31  ;;  %v786_v40 = vadd.f32 %v770_v32, %v547_v29  ;;  %v749_v41 = vmul.f32 %v1079_v38, %v1369_v17  ;;  %v525_v42 = vmul.f32 %v1364_v16, %v479_v39  ;;  %v702_v43 = vpop.f32.mrb[11].mxu1 }
 0x112   : > { %815 = vst [vmem:[%s1396_s9 + $0x30] sm:$0xff] %v799_v35  ;;  %v785_v44 = vadd.f32 %v769_v36, %v546_v33  ;;  %v549_v45 = vadd.f32 %v1374_v19, %v526_v37  ;;  %v748_v46 = vmul.f32 %v1369_v17, %v702_v43 }
 0x113   : > { %v802_v47 = vmax.f32 %v786_v40, 0.0  ;;  %v772_v48 = vadd.f32 %v1380_v22, %v749_v41  ;;  %v548_v49 = vadd.f32 %v1374_v19, %v525_v42  ;;  %v1026_v50 = vpop.f32.mrb[12].mxu0 }
 0x114   : > { %v801_v51 = vmax.f32 %v785_v44, 0.0  ;;  %v771_v52 = vadd.f32 %v1380_v22, %v748_v46  ;;  %v528_v53 = vmul.f32 %v1026_v50, %v1364_v16  ;;  %v1082_v54 = vpop.f32.mrb[12].mxu1  ;;  %v489_v55 = vpop.f32.mrb[13].mxu0 }
 0x115   : > { %818 = vst [vmem:[%s1396_s9 + $0x48] sm:$0xff] %v802_v47  ;;  %v788_v56 = vadd.f32 %v772_v48, %v549_v45  ;;  %v751_v57 = vmul.f32 %v1082_v54, %v1369_v17  ;;  %v527_v58 = vmul.f32 %v1364_v16, %v489_v55  ;;  %v712_v59 = vpop.f32.mrb[13].mxu1 }
 0x116   : > { %817 = vst [vmem:[%s1396_s9 + $0x40] sm:$0xff] %v801_v51  ;;  %v787_v60 = vadd.f32 %v771_v52, %v548_v49  ;;  %v551_v61 = vadd.f32 %v1374_v19, %v528_v53  ;;  %v750_v62 = vmul.f32 %v1369_v17, %v712_v59 }
 0x117   : > { %v804_v63 = vmax.f32 %v788_v56, 0.0  ;;  %v774_v0 = vadd.f32 %v1380_v22, %v751_v57  ;;  %v550_v1 = vadd.f32 %v1374_v19, %v527_v58  ;;  %v1029_v2 = vpop.f32.mrb[14].mxu0 }
 0x118   : > { %v803_v3 = vmax.f32 %v787_v60, 0.0  ;;  %v773_v4 = vadd.f32 %v1380_v22, %v750_v62  ;;  %v530_v5 = vmul.f32 %v1029_v2, %v1364_v16  ;;  %v1085_v6 = vpop.f32.mrb[14].mxu1  ;;  %v499_v7 = vpop.f32.mrb[15].mxu0 }
 0x119   : > { %820 = vst [vmem:[%s1396_s9 + $0x58] sm:$0xff] %v804_v63  ;;  %v790_v8 = vadd.f32 %v774_v0, %v551_v61  ;;  %v753_v9 = vmul.f32 %v1085_v6, %v1369_v17  ;;  %v529_v10 = vmul.f32 %v1364_v16, %v499_v7  ;;  %v722_v11 = vpop.f32.mrb[15].mxu1 }
 0x11a   : > { %819 = vst [vmem:[%s1396_s9 + $0x50] sm:$0xff] %v803_v3  ;;  %v789_v12 = vadd.f32 %v773_v4, %v550_v1  ;;  %v553_v13 = vadd.f32 %v1374_v19, %v530_v5  ;;  %v752_v14 = vmul.f32 %v1369_v17, %v722_v11 }
 0x11b   : > { %v806_v15 = vmax.f32 %v790_v8, 0.0  ;;  %v776_v18 = vadd.f32 %v1380_v22, %v753_v9  ;;  %v552_v20 = vadd.f32 %v1374_v19, %v529_v10 }
 0x11c   : > { %v805_v21 = vmax.f32 %v789_v12, 0.0  ;;  %v775_v23 = vadd.f32 %v1380_v22, %v752_v14 }
 0x11d   : > { %822 = vst [vmem:[%s1396_s9 + $0x68] sm:$0xff] %v806_v15  ;;  %v792_v24 = vadd.f32 %v776_v18, %v553_v13 }
 0x11e   : > { %821 = vst [vmem:[%s1396_s9 + $0x60] sm:$0xff] %v805_v21  ;;  %v791_v16 = vadd.f32 %v775_v23, %v552_v20 }
 0x11f   : > { %v808_v25 = vmax.f32 %v792_v24, 0.0 }
 0x120   : > { %v807_v26 = vmax.f32 %v791_v16, 0.0 }
 0x121   : > { %824 = vst [vmem:[%s1396_s9 + $0x78] sm:$0xff] %v808_v25 }
 0x122   : > { %823 = vst [vmem:[%s1396_s9 + $0x70] sm:$0xff] %v807_v26 }
 0x123 PF: > { %s18_s27 = sadd.s32 1, %s1164_s27  }
 0x124   : > { %p15_p4 = scmp.ge.s32.totalorder %s18_s27, 6  }
 0x126   :  { %17 = sbr.rel (!%p15_p4) target bundleno = 1 (0x1), region = 85 }

// kernel: resnet_block_bottleneck.5
= control target key start
LH: loop header
LB: loop body
LE: loop exit
PB: predicated region body
PF: predicated region fallthrough
CT: control target
= control target key end

     0   :  { %s2858_s18 = smov 0   ;;  %s4564_s0 = inlined_call_operand.vmem [shape: f32[2,16,16,128], index: 0, kind: input, shape index: {}]   ;;  %s4565_s1 = inlined_call_operand.vmem [shape: f32[1152,128], index: 1, kind: input, shape index: {}]   ;;  %s4566_s2 = inlined_call_operand.vmem [shape: f32[1,128], index: 2, kind: input, shape index: {}]   ;;  %s4567_s3 = inlined_call_operand.vmem [shape: f32[1,128], index: 3, kind: input, shape index: {}]   ;;  %s4568_s4 = inlined_call_operand.vmem [shape: f32[2,16,16,128], index: 4, kind: output, shape index: {0}]   ;;  %s4569_s5 = inlined_call_operand.vmem [shape: f32[2,2,128], index: 5, kind: output, shape index: {1}]  }
   0x1 LB: > { %s2249_s19 = sadd.s32 4294967295, %s2824_s18   ;;  %p2253_p0 = scmp.ge.s32.totalorder %s2824_s18, 1  ;;  %s2824_s18 = sphi %s2858_s18, %s16_s18  }
   0x2   : > { %p190_p1 = scmp.lt.s32.totalorder %s2824_s18, 3 }
   0x4   : > { %p191_p2 = pnand %p2253_p0, %p190_p1 }
   0x6   : > { %194 = sbr.rel (%p191_p2) target bundleno = 645 (0x285), region = 36 }
   0xd   : > { %v2869_v0 = vld [vmem:[%s4565_s1] sm:$0xff]  ;;  %v2874_v1 = vld [vmem:[%s4565_s1 + $0x8] sm:$0xff]  ;;  %v4582_v3 = vmov 0.0|0.0   ;;  %v2893_v6 = vld [vmem:[%s4565_s1 + $0x10] sm:$0xff]  ;;  %v2827_v8 = vmov 0.0   ;;  %p222_p3 = scmp.lt.s32.totalorder %s2249_s19, 1 }
   0xe   : > { %v2879_v2 = vld [vmem:[%s4565_s1 + $0x100] sm:$0xff]  ;;  %2393 = vmatprep.subr.bf16.mxu1 %v4582_v3  ;;  %2441 = vmatprep.subr.bf16.mxu0 %v4582_v3  ;;  %v2394_v4 = vpack.c.bf16 %v2874_v1, %v2869_v0  ;;  %v2888_v5 = vld [vmem:[%s4565_s1 + $0x108] sm:$0xff]  ;;  %v2898_v7 = vld [vmem:[%s4565_s1 + $0x18] sm:$0xff]  ;;  %378 = vst [vmem:[#allocation2] sm:$0xff] %v2827_v8 }
   0xf   : > { %379 = vst [vmem:[#allocation2 + $0x8] sm:$0xff] %v2827_v8  ;;  %380 = vst [vmem:[#allocation2 + $0x10] sm:$0x3] %v2827_v8  ;;  %v2442_v9 = vpack.c.bf16 %v2888_v5, %v2879_v2  ;;  %v788_v10 = vld [vmem:[%s4565_s1 + $0x110] sm:$0xff]  ;;  %v789_v11 = vld [vmem:[%s4565_s1 + $0x118] sm:$0xff]  ;;  %v2397_v12 = vpack.c.bf16 %v2898_v7, %v2893_v6  ;;  %s4669_s19 = smov (!%p222_p3, %s2249_s19), 1 }
  0x10   : > { %381 = vst [vmem:[#allocation2 + $0x18] sm:$0xff] %v2827_v8  ;;  %382 = vst [vmem:[#allocation2 + $0x20] sm:$0xff] %v2827_v8  ;;  %2395 = vmatpush1.bf16.msra.mxu1 %v2394_v4  ;;  %v2445_v13 = vpack.c.bf16 %v789_v11, %v788_v10  ;;  %v758_v14 = vld [vmem:[%s4565_s1 + $0x20] sm:$0xff]  ;;  %v759_v15 = vld [vmem:[%s4565_s1 + $0x28] sm:$0xff]  ;;  %s2263_s12 = sshll.u32 %s4669_s19, 8 }
  0x11   : > { %383 = vst [vmem:[#allocation2 + $0x28] sm:$0x3] %v2827_v8  ;;  %384 = vst [vmem:[#allocation2 + $0x30] sm:$0xff] %v2827_v8  ;;  %2443 = vmatpush1.bf16.msra.mxu0 %v2442_v9  ;;  %2396 = vmatprep.subr.bf16.mxu1 %v4582_v3  ;;  %v790_v16 = vld [vmem:[%s4565_s1 + $0x120] sm:$0xff]  ;;  %v791_v17 = vld [vmem:[%s4565_s1 + $0x128] sm:$0xff]  ;;  %v2400_v18 = vpack.c.bf16 %v759_v15, %v758_v14  ;;  %s3032_s25 = scalar_lea.vmem %s4564_s0, %s2263_s12  ;;  %s4322_s9 = scalar_lea.vmem %s4568_s4, %s2263_s12 }
  0x12   : > { %385 = vst [vmem:[#allocation2 + $0x38] sm:$0xff] %v2827_v8  ;;  %386 = vst [vmem:[#allocation2 + $0x40] sm:$0x3] %v2827_v8  ;;  %2444 = vmatprep.subr.bf16.mxu0 %v4582_v3  ;;  %v2448_v19 = vpack.c.bf16 %v791_v17, %v790_v16  ;;  %v760_v20 = vld [vmem:[%s4565_s1 + $0x30] sm:$0xff]  ;;  %v761_v21 = vld [vmem:[%s4565_s1 + $0x38] sm:$0xff]  ;;  %s2258_s12 = sshll.u32 %s4669_s19, 1 }
  0x13   : > { %387 = vst [vmem:[#allocation2 + $0x48] sm:$0xff] %v2827_v8  ;;  %388 = vst [vmem:[#allocation2 + $0x50] sm:$0xff] %v2827_v8  ;;  %v792_v22 = vld [vmem:[%s4565_s1 + $0x130] sm:$0xff]  ;;  %v793_v23 = vld [vmem:[%s4565_s1 + $0x138] sm:$0xff]  ;;  %v2403_v24 = vpack.c.bf16 %v761_v21, %v760_v20  ;;  %s235_s13 = scalar_lea.vmem %s4569_s5, %s2258_s12 }
  0x14   : > { %389 = vst [vmem:[#allocation2 + $0x58] sm:$0x3] %v2827_v8  ;;  %390 = vst [vmem:[#allocation2 + $0x60] sm:$0xff] %v2827_v8  ;;  %2398 = vmatpush1.bf16.msra.mxu1 %v2397_v12  ;;  %v2451_v25 = vpack.c.bf16 %v793_v23, %v792_v22  ;;  %v762_v26 = vld [vmem:[%s4565_s1 + $0x40] sm:$0xff]  ;;  %v763_v27 = vld [vmem:[%s4565_s1 + $0x48] sm:$0xff] }
  0x15   : > { %391 = vst [vmem:[#allocation2 + $0x68] sm:$0xff] %v2827_v8  ;;  %392 = vst [vmem:[#allocation2 + $0x70] sm:$0x3] %v2827_v8  ;;  %2446 = vmatpush1.bf16.msra.mxu0 %v2445_v13  ;;  %2399 = vmatprep.subr.bf16.mxu1 %v4582_v3  ;;  %v794_v28 = vld [vmem:[%s4565_s1 + $0x140] sm:$0xff]  ;;  %v795_v29 = vld [vmem:[%s4565_s1 + $0x148] sm:$0xff]  ;;  %v2406_v30 = vpack.c.bf16 %v763_v27, %v762_v26 }
  0x16   : > { %393 = vst [vmem:[#allocation2 + $0x78] sm:$0xff] %v2827_v8  ;;  %394 = vst [vmem:[#allocation2 + $0x80] sm:$0xff] %v2827_v8  ;;  %2447 = vmatprep.subr.bf16.mxu0 %v4582_v3  ;;  %v2454_v31 = vpack.c.bf16 %v795_v29, %v794_v28  ;;  %v764_v32 = vld [vmem:[%s4565_s1 + $0x50] sm:$0xff]  ;;  %v765_v33 = vld [vmem:[%s4565_s1 + $0x58] sm:$0xff] }
  0x17   : > { %395 = vst [vmem:[#allocation2 + $0x88] sm:$0x3] %v2827_v8  ;;  %396 = vst [vmem:[#allocation2 + $0x90] sm:$0xff] %v2827_v8  ;;  %v796_v34 = vld [vmem:[%s4565_s1 + $0x150] sm:$0xff]  ;;  %v797_v35 = vld [vmem:[%s4565_s1 + $0x158] sm:$0xff]  ;;  %v2409_v36 = vpack.c.bf16 %v765_v33, %v764_v32 }
  0x18   : > { %397 = vst [vmem:[#allocation2 + $0x98] sm:$0xff] %v2827_v8  ;;  %398 = vst [vmem:[#allocation2 + $0xa0] sm:$0x3] %v2827_v8  ;;  %2401 = vmatpush1.bf16.msra.mxu1 %v2400_v18  ;;  %v2457_v37 = vpack.c.bf16 %v797_v35, %v796_v34  ;;  %v766_v38 = vld [vmem:[%s4565_s1 + $0x60] sm:$0xff]  ;;  %v767_v39 = vld [vmem:[%s4565_s1 + $0x68] sm:$0xff] }
  0x19   : > { %399 = vst [vmem:[#allocation2 + $0xa8] sm:$0xff] %v2827_v8  ;;  %400 = vst [vmem:[#allocation2 + $0xb0] sm:$0xff] %v2827_v8  ;;  %2449 = vmatpush1.bf16.msra.mxu0 %v2448_v19  ;;  %2402 = vmatprep.subr.bf16.mxu1 %v4582_v3  ;;  %v798_v40 = vld [vmem:[%s4565_s1 + $0x160] sm:$0xff]  ;;  %v799_v41 = vld [vmem:[%s4565_s1 + $0x168] sm:$0xff]  ;;  %v2412_v46 = vpack.c.bf16 %v767_v39, %v766_v38 }
  0x1a   : > { %401 = vst [vmem:[#allocation2 + $0xb8] sm:$0x3] %v2827_v8  ;;  %402 = vst [vmem:[#allocation2 + $0xc0] sm:$0xff] %v2827_v8  ;;  %2450 = vmatprep.subr.bf16.mxu0 %v4582_v3  ;;  %v497_v42 = vld [vmem:[#allocation2 + $0x1] sm:$0xff]  ;;  %v3052_v44 = vld [vmem:[%s4566_s2] ss:$0 sm:$0xff]  ;;  %v2460_v50 = vpack.c.bf16 %v799_v41, %v798_v40 }
  0x1b   : > { %403 = vst [vmem:[#allocation2 + $0xc8] sm:$0xff] %v2827_v8  ;;  %404 = vst [vmem:[#allocation2 + $0xd0] sm:$0x3] %v2827_v8  ;;  %v236_v43 = vld [vmem:[%s3032_s25] sm:$0xff]  ;;  %962 = vmatprep.mubr.f32.mxu1 %v497_v42  ;;  %v768_v47 = vld [vmem:[%s4565_s1 + $0x70] sm:$0xff] }
  0x1c   : > { %405 = vst [vmem:[#allocation2 + $0xd8] sm:$0xff] %v2827_v8  ;;  %406 = vst [vmem:[#allocation2 + $0xe0] sm:$0xff] %v2827_v8  ;;  %2404 = vmatpush1.bf16.msra.mxu1 %v2403_v24  ;;  %v3057_v45 = vld [vmem:[%s4567_s3] ss:$0 sm:$0xff]  ;;  %v769_v48 = vld [vmem:[%s4565_s1 + $0x78] sm:$0xff]  ;;  %v275_v49 = vmul.f32 %v3052_v44, %v236_v43 }
  0x1d   : > { %407 = vst [vmem:[#allocation2 + $0xe8] sm:$0x3] %v2827_v8  ;;  %408 = vst [vmem:[#allocation2 + $0xf0] sm:$0xff] %v2827_v8  ;;  %2452 = vmatpush1.bf16.msra.mxu0 %v2451_v25  ;;  %2405 = vmatprep.subr.bf16.mxu1 %v4582_v3  ;;  %v237_v51 = vld [vmem:[%s3032_s25 + $0x8] sm:$0xff]  ;;  %v238_v52 = vld [vmem:[%s3032_s25 + $0x10] sm:$0xff]  ;;  %v2415_v59 = vpack.c.bf16 %v769_v48, %v768_v47 }
  0x1e   : > { %409 = vst [vmem:[#allocation2 + $0xf8] sm:$0xff] %v2827_v8  ;;  %410 = vst [vmem:[#allocation2 + $0x100] sm:$0x3] %v2827_v8  ;;  %2453 = vmatprep.subr.bf16.mxu0 %v4582_v3  ;;  %v800_v53 = vld [vmem:[%s4565_s1 + $0x170] sm:$0xff]  ;;  %v801_v54 = vld [vmem:[%s4565_s1 + $0x178] sm:$0xff]  ;;  %v3077_v55 = vadd.f32 %v3057_v45, %v275_v49  ;;  %v276_v56 = vmul.f32 %v3052_v44, %v237_v51  ;;  %v277_v57 = vmul.f32 %v3052_v44, %v238_v52 }
  0x1f   : > { %411 = vst [vmem:[#allocation2 + $0x108] sm:$0xff] %v2827_v8  ;;  %412 = vst [vmem:[#allocation2 + $0x110] sm:$0xff] %v2827_v8  ;;  %v239_v58 = vld [vmem:[%s3032_s25 + $0x18] sm:$0xff]  ;;  %v3085_v60 = vld [vmem:[%s4565_s1 + $0x80] sm:$0xff]  ;;  %v2463_v9 = vpack.c.bf16 %v801_v54, %v800_v53 }
  0x20   : > { %413 = vst [vmem:[#allocation2 + $0x118] sm:$0x3] %v2827_v8  ;;  %414 = vst [vmem:[#allocation2 + $0x120] sm:$0xff] %v2827_v8  ;;  %2407 = vmatpush1.bf16.msra.mxu1 %v2406_v30  ;;  %v3090_v61 = vld [vmem:[%s4565_s1 + $0x88] sm:$0xff]  ;;  %v278_v62 = vmul.f32 %v3052_v44, %v239_v58  ;;  %v240_v63 = vld [vmem:[%s3032_s25 + $0x20] sm:$0xff]  ;;  %v346_v1 = vmax.f32 %v3077_v55, 0.0  ;;  %v3101_v2 = vadd.f32 %v3057_v45, %v276_v56 }
  0x21   : > { %415 = vst [vmem:[#allocation2 + $0x128] sm:$0xff] %v2827_v8  ;;  %416 = vst [vmem:[#allocation2 + $0x130] sm:$0x3] %v2827_v8  ;;  %2455 = vmatpush1.bf16.msra.mxu0 %v2454_v31  ;;  %2408 = vmatprep.subr.bf16.mxu1 %v4582_v3  ;;  %v3097_v0 = vld [vmem:[%s4565_s1 + $0x180] sm:$0xff]  ;;  %v3104_v4 = vadd.f32 %v3057_v45, %v277_v57  ;;  %v279_v5 = vmul.f32 %v3052_v44, %v240_v63  ;;  %v241_v6 = vld [vmem:[%s3032_s25 + $0x28] sm:$0xff] }
  0x22   : > { %417 = vst [vmem:[#allocation2 + $0x138] sm:$0xff] %v2827_v8  ;;  %418 = vst [vmem:[#allocation2 + $0x140] sm:$0xff] %v2827_v8  ;;  %2456 = vmatprep.subr.bf16.mxu0 %v4582_v3  ;;  %v242_v7 = vld [vmem:[%s3032_s25 + $0x30] sm:$0xff]  ;;  %v803_v10 = vld [vmem:[%s4565_s1 + $0x188] sm:$0xff]  ;;  %v3114_v11 = vadd.f32 %v3057_v45, %v278_v62  ;;  %v280_v12 = vmul.f32 %v3052_v44, %v241_v6  ;;  %v347_v15 = vmax.f32 %v3101_v2, 0.0 }
  0x23   : > { %419 = vst [vmem:[#allocation2 + $0x148] sm:$0x3] %v2827_v8  ;;  %420 = vst [vmem:[#allocation2 + $0x150] sm:$0xff] %v2827_v8  ;;  %v243_v13 = vld [vmem:[%s3032_s25 + $0x38] sm:$0xff]  ;;  %v244_v14 = vld [vmem:[%s3032_s25 + $0x40] sm:$0xff]  ;;  %v348_v16 = vmax.f32 %v3104_v4, 0.0  ;;  %v3125_v17 = vadd.f32 %v3057_v45, %v279_v5  ;;  %v281_v18 = vmul.f32 %v3052_v44, %v242_v7  ;;  %v2418_v20 = vpack.c.bf16 %v3090_v61, %v3085_v60 }
  0x24   : > { %421 = vst [vmem:[#allocation2 + $0x158] sm:$0xff] %v2827_v8  ;;  %422 = vst [vmem:[#allocation2 + $0x160] sm:$0x3] %v2827_v8  ;;  %2410 = vmatpush1.bf16.msra.mxu1 %v2409_v36  ;;  %v245_v19 = vld [vmem:[%s3032_s25 + $0x48] sm:$0xff]  ;;  %v349_v21 = vmax.f32 %v3114_v11, 0.0  ;;  %v3133_v22 = vadd.f32 %v3057_v45, %v280_v12  ;;  %v282_v23 = vmul.f32 %v3052_v44, %v243_v13  ;;  %v246_v24 = vld [vmem:[%s3032_s25 + $0x50] sm:$0xff] }
  0x25   : > { %423 = vst [vmem:[#allocation2 + $0x168] sm:$0xff] %v2827_v8  ;;  %424 = vst [vmem:[#allocation2 + $0x170] sm:$0xff] %v2827_v8  ;;  %2458 = vmatpush1.bf16.msra.mxu0 %v2457_v37  ;;  %2411 = vmatprep.subr.bf16.mxu1 %v4582_v3  ;;  %v2466_v25 = vpack.c.bf16 %v803_v10, %v3097_v0  ;;  %v3141_v26 = vld [vmem:[%s4565_s1 + $0x90] sm:$0xff]  ;;  %v350_v27 = vmax.f32 %v3125_v17, 0.0  ;;  %v3149_v28 = vadd.f32 %v3057_v45, %v281_v18  ;;  %v247_v30 = vld [vmem:[%s3032_s25 + $0x58] sm:$0xff] }
  0x26   : > { %425 = vst [vmem:[#allocation2 + $0x178] sm:$0x3] %v2827_v8  ;;  %426 = vst [vmem:[#allocation2 + $0x180] sm:$0xff] %v2827_v8  ;;  %2459 = vmatprep.subr.bf16.mxu0 %v4582_v3  ;;  %v283_v29 = vmul.f32 %v3052_v44, %v244_v14  ;;  %v248_v31 = vld [vmem:[%s3032_s25 + $0x60] sm:$0xff]  ;;  %v773_v32 = vld [vmem:[%s4565_s1 + $0x98] sm:$0xff]  ;;  %v351_v35 = vmax.f32 %v3133_v22, 0.0  ;;  %v3168_v36 = vadd.f32 %v3057_v45, %v282_v23 }
  0x27   : > { %427 = vst [vmem:[#allocation2 + $0x188] sm:$0xff] %v2827_v8  ;;  %428 = vst [vmem:[#allocation2 + $0x190] sm:$0x3] %v2827_v8  ;;  %v804_v33 = vld [vmem:[%s4565_s1 + $0x190] sm:$0xff]  ;;  %v805_v34 = vld [vmem:[%s4565_s1 + $0x198] sm:$0xff]  ;;  %v284_v37 = vmul.f32 %v3052_v44, %v245_v19  ;;  %v285_v38 = vmul.f32 %v3052_v44, %v246_v24  ;;  %v352_v39 = vmax.f32 %v3149_v28, 0.0  ;;  %v286_v41 = vmul.f32 %v3052_v44, %v247_v30 }
  0x28   : > { %429 = vst [vmem:[#allocation2 + $0x198] sm:$0xff] %v2827_v8  ;;  %430 = vst [vmem:[#allocation2 + $0x1a0] sm:$0xff] %v2827_v8  ;;  %2413 = vmatpush1.bf16.msra.mxu1 %v2412_v46  ;;  %v3177_v40 = vadd.f32 %v3057_v45, %v283_v29  ;;  %v249_v42 = vld [vmem:[%s3032_s25 + $0x68] sm:$0xff]  ;;  %v3184_v43 = vld [vmem:[%s4565_s1 + $0xa0] sm:$0xff]  ;;  %v353_v46 = vmax.f32 %v3168_v36, 0.0  ;;  %v287_v49 = vmul.f32 %v3052_v44, %v248_v31 }
  0x29   : > { %431 = vst [vmem:[#allocation2 + $0x1a8] sm:$0x3] %v2827_v8  ;;  %2461 = vmatpush1.bf16.msra.mxu0 %v2460_v50  ;;  %2414 = vmatprep.subr.bf16.mxu1 %v4582_v3  ;;  %433 = vst [vmem:[#allocation2 + $0x19] sm:$0xff] %v346_v1  ;;  %v3190_v47 = vadd.f32 %v3057_v45, %v284_v37  ;;  %v324_v48 = vadd.f32 %v3057_v45, %v285_v38  ;;  %v250_v50 = vld [vmem:[%s3032_s25 + $0x70] sm:$0xff]  ;;  %v775_v53 = vld [vmem:[%s4565_s1 + $0xa8] sm:$0xff] }
  0x2a   : > { %2462 = vmatprep.subr.bf16.mxu0 %v4582_v3  ;;  %434 = vst [vmem:[#allocation2 + $0x21] sm:$0xff] %v347_v15  ;;  %435 = vst [vmem:[#allocation2 + $0x31] sm:$0xff] %v348_v16  ;;  %v2421_v51 = vpack.c.bf16 %v773_v32, %v3141_v26  ;;  %v2469_v52 = vpack.c.bf16 %v805_v34, %v804_v33  ;;  %v354_v54 = vmax.f32 %v3177_v40, 0.0  ;;  %v251_v57 = vld [vmem:[%s3032_s25 + $0x78] sm:$0xff]  ;;  %v252_v58 = vld [vmem:[%s3032_s25 + $0x80] sm:$0xff] }
  0x2b   : > { %436 = vst [vmem:[#allocation2 + $0x39] sm:$0xff] %v349_v21  ;;  %437 = vst [vmem:[#allocation2 + $0x49] sm:$0xff] %v350_v27  ;;  %v325_v56 = vadd.f32 %v3057_v45, %v286_v41  ;;  %v807_v60 = vld [vmem:[%s4565_s1 + $0x1a8] sm:$0xff]  ;;  %v355_v62 = vmax.f32 %v3190_v47, 0.0  ;;  %v3217_v63 = vmax.f32 %v324_v48, 0.0  ;;  %v3220_v0 = vadd.f32 %v3057_v45, %v287_v49  ;;  %v254_v10 = vld [vmem:[%s3032_s25 + $0x90] sm:$0xff] }
  0x2c   : > { %2416 = vmatpush1.bf16.msra.mxu1 %v2415_v59  ;;  %438 = vst [vmem:[#allocation2 + $0x51] sm:$0xff] %v351_v35  ;;  %439 = vst [vmem:[#allocation2 + $0x61] sm:$0xff] %v352_v39  ;;  %v806_v59 = vld [vmem:[%s4565_s1 + $0x1a0] sm:$0xff]  ;;  %v288_v5 = vmul.f32 %v3052_v44, %v249_v42  ;;  %v289_v7 = vmul.f32 %v3052_v44, %v250_v50  ;;  %v290_v14 = vmul.f32 %v3052_v44, %v251_v57  ;;  %v777_v26 = vld [vmem:[%s4565_s1 + $0xb8] sm:$0xff] }
  0x2d   : > { %2464 = vmatpush1.bf16.msra.mxu0 %v2463_v9  ;;  %2417 = vmatprep.subr.bf16.mxu1 %v4582_v3  ;;  %440 = vst [vmem:[#allocation2 + $0x69] sm:$0xff] %v353_v46  ;;  %441 = vst [vmem:[#allocation2 + $0x79] sm:$0xff] %v354_v54  ;;  %v3227_v6 = vmax.f32 %v325_v56, 0.0  ;;  %v253_v9 = vld [vmem:[%s3032_s25 + $0x88] sm:$0xff]  ;;  %v358_v12 = vmax.f32 %v3220_v0, 0.0  ;;  %v291_v18 = vmul.f32 %v3052_v44, %v252_v58  ;;  %v808_v33 = vld [vmem:[%s4565_s1 + $0x1b0] sm:$0xff] }
  0x2e   : > { %2465 = vmatprep.subr.bf16.mxu0 %v4582_v3  ;;  %442 = vst [vmem:[#allocation2 + $0x81] sm:$0xff] %v355_v62  ;;  %443 = vst [vmem:[#allocation2 + $0x91] sm:$0xff] %v3217_v63  ;;  %v3237_v13 = vadd.f32 %v3057_v45, %v288_v5  ;;  %v2424_v19 = vpack.c.bf16 %v775_v53, %v3184_v43  ;;  %v3244_v23 = vadd.f32 %v3057_v45, %v289_v7  ;;  %v809_v34 = vld [vmem:[%s4565_s1 + $0x1b8] sm:$0xff]  ;;  %v810_v57 = vld [vmem:[%s4565_s1 + $0x1c0] sm:$0xff] }
  0x2f   : > { %444 = vst [vmem:[#allocation2 + $0x99] sm:$0xff] %v3227_v6  ;;  %v292_v24 = vmul.f32 %v3052_v44, %v253_v9  ;;  %445 = vst [vmem:[#allocation2 + $0xa9] sm:$0xff] %v358_v12  ;;  %v3258_v30 = vadd.f32 %v3057_v45, %v290_v14  ;;  %v3261_v31 = vadd.f32 %v3057_v45, %v291_v18  ;;  %v255_v56 = vld [vmem:[%s3032_s25 + $0x98] sm:$0xff]  ;;  %v811_v58 = vld [vmem:[%s4565_s1 + $0x1c8] sm:$0xff] }
  0x30   : > { %2419 = vmatpush1.bf16.msra.mxu1 %v2418_v20  ;;  %v3212_v61 = vld [vmem:[#allocation2 + $0x18] sm:$0xff]  ;;  %v2472_v20 = vpack.c.bf16 %v807_v60, %v806_v59  ;;  %v4579_v29 = vmax.f32 %v3237_v13, 0.0  ;;  %v293_v32 = vmul.f32 %v3052_v44, %v254_v10  ;;  %v4578_v37 = vmax.f32 %v3244_v23, 0.0  ;;  %v256_v7 = vld [vmem:[%s3032_s25 + $0xa0] sm:$0xff]  ;;  %v780_v10 = vld [vmem:[%s4565_s1 + $0xd0] sm:$0xff] }
  0x31   : > { %2467 = vmatpush1.bf16.msra.mxu0 %v2466_v25  ;;  %2420 = vmatprep.subr.bf16.mxu1 %v4582_v3  ;;  %v776_v25 = vld [vmem:[%s4565_s1 + $0xb0] sm:$0xff]  ;;  %v3273_v38 = vadd.f32 %v3057_v45, %v292_v24  ;;  %v4577_v41 = vmax.f32 %v3258_v30, 0.0  ;;  %v4576_v42 = vmax.f32 %v3261_v31, 0.0  ;;  %v2475_v50 = vpack.c.bf16 %v809_v34, %v808_v33  ;;  %v781_v14 = vld [vmem:[%s4565_s1 + $0xd8] sm:$0xff]  ;;  %v862_v11 = vld [vmem:[%s4565_s1 + $0x360] sm:$0xff] }
  0x32   : > { %2468 = vmatprep.subr.bf16.mxu0 %v4582_v3  ;;  %1187 = vmatprep.mubr.f32.mxu0 %v3212_v61  ;;  %446 = vst [vmem:[#allocation2 + $0xb1] sm:$0xff] %v4579_v29  ;;  %v3280_v43 = vadd.f32 %v3057_v45, %v293_v32  ;;  %v2427_v48 = vpack.c.bf16 %v777_v26, %v776_v25  ;;  %447 = vst [vmem:[#allocation2 + $0xc1] sm:$0xff] %v4578_v37  ;;  %v257_v26 = vld [vmem:[%s3032_s25 + $0xa8] sm:$0xff]  ;;  %v825_v55 = vld [vmem:[%s4565_s1 + $0x238] sm:$0xff] }
  0x33   : > { %v4575_v49 = vmax.f32 %v3273_v38, 0.0  ;;  %448 = vst [vmem:[#allocation2 + $0xc9] sm:$0xff] %v4577_v41  ;;  %449 = vst [vmem:[#allocation2 + $0xd9] sm:$0xff] %v4576_v42  ;;  %v294_v59 = vmul.f32 %v3052_v44, %v255_v56  ;;  %v2478_v9 = vpack.c.bf16 %v811_v58, %v810_v57  ;;  %v295_v18 = vmul.f32 %v3052_v44, %v256_v7  ;;  %v815_v56 = vld [vmem:[%s4565_s1 + $0x1e8] sm:$0xff]  ;;  %v258_v58 = vld [vmem:[%s3032_s25 + $0xb0] sm:$0xff] }
  0x34   : > { %2422 = vmatpush1.bf16.msra.mxu1 %v2421_v51  ;;  %v778_v51 = vld [vmem:[%s4565_s1 + $0xc0] sm:$0xff]  ;;  %v4574_v53 = vmax.f32 %v3280_v43, 0.0  ;;  %v2433_v32 = vpack.c.bf16 %v781_v14, %v780_v10  ;;  %v296_v33 = vmul.f32 %v3052_v44, %v257_v26  ;;  %v297_v7 = vmul.f32 %v3052_v44, %v258_v58  ;;  %v784_v10 = vld [vmem:[%s4565_s1 + $0xf0] sm:$0xff]  ;;  %v785_v14 = vld [vmem:[%s4565_s1 + $0xf8] sm:$0xff] }
  0x35   : > { %2470 = vmatpush1.bf16.msra.mxu0 %v2469_v52  ;;  %2423 = vmatprep.subr.bf16.mxu1 %v4582_v3  ;;  %v779_v52 = vld [vmem:[%s4565_s1 + $0xc8] sm:$0xff]  ;;  %450 = vst [vmem:[#allocation2 + $0xe1] sm:$0xff] %v4575_v49  ;;  %v3311_v5 = vadd.f32 %v3057_v45, %v294_v59  ;;  %v3331_v25 = vadd.f32 %v3057_v45, %v295_v18  ;;  %v259_v18 = vld [vmem:[%s3032_s25 + $0xb8] sm:$0xff]  ;;  %v860_v4 = vld [vmem:[%s4565_s1 + $0x350] sm:$0xff] }
  0x36   : > { %2471 = vmatprep.subr.bf16.mxu0 %v4582_v3  ;;  %451 = vst [vmem:[#allocation2 + $0xf1] sm:$0xff] %v4574_v53  ;;  %v2430_v60 = vpack.c.bf16 %v779_v52, %v778_v51  ;;  %v814_v52 = vld [vmem:[%s4565_s1 + $0x1e0] sm:$0xff]  ;;  %v3353_v57 = vadd.f32 %v3057_v45, %v296_v33  ;;  %v3378_v26 = vadd.f32 %v3057_v45, %v297_v7  ;;  %v530_v49 = vld [vmem:[#allocation2 + $0xa] sm:$0xff]  ;;  %v849_v0 = vld [vmem:[%s4565_s1 + $0x2f8] sm:$0xff] }
  0x37   : > { %v4573_v24 = vmax.f32 %v3311_v5, 0.0  ;;  %v4572_v51 = vmax.f32 %v3331_v25, 0.0  ;;  %v260_v33 = vld [vmem:[%s3032_s25 + $0xc0] sm:$0xff] }
  0x38   : > { %2425 = vmatpush1.bf16.msra.mxu1 %v2424_v19  ;;  %v812_v19 = vld [vmem:[%s4565_s1 + $0x1d0] sm:$0xff] }
  0x39   : > { %2473 = vmatpush1.bf16.msra.mxu0 %v2472_v20  ;;  %2426 = vmatprep.subr.bf16.mxu1 %v4582_v3  ;;  %v813_v20 = vld [vmem:[%s4565_s1 + $0x1d8] sm:$0xff]  ;;  %452 = vst [vmem:[#allocation2 + $0xf9] sm:$0xff] %v4573_v24  ;;  %453 = vst [vmem:[#allocation2 + $0x109] sm:$0xff] %v4572_v51  ;;  %v498_v24 = vld [vmem:[#allocation2 + $0x9] sm:$0xff] }
  0x3a   : > { %2474 = vmatprep.subr.bf16.mxu0 %v4582_v3  ;;  %v2481_v34 = vpack.c.bf16 %v813_v20, %v812_v19  ;;  %v816_v19 = vld [vmem:[%s4565_s1 + $0x1f0] sm:$0xff]  ;;  %v817_v20 = vld [vmem:[%s4565_s1 + $0x1f8] sm:$0xff] }
  0x3b   : > { %v2487_v58 = vpack.c.bf16 %v817_v20, %v816_v19  ;;  %v850_v19 = vld [vmem:[%s4565_s1 + $0x300] sm:$0xff]  ;;  %v851_v20 = vld [vmem:[%s4565_s1 + $0x308] sm:$0xff] }
  0x3c   : > { %2428 = vmatpush1.bf16.msra.mxu1 %v2427_v48  ;;  %v782_v48 = vld [vmem:[%s4565_s1 + $0xe0] sm:$0xff] }
  0x3d   : > { %2476 = vmatpush1.bf16.msra.mxu0 %v2475_v50  ;;  %2429 = vmatprep.subr.bf16.mxu1 %v4582_v3  ;;  %v783_v50 = vld [vmem:[%s4565_s1 + $0xe8] sm:$0xff] }
  0x3e   : > { %2477 = vmatprep.subr.bf16.mxu0 %v4582_v3  ;;  %v2436_v59 = vpack.c.bf16 %v783_v50, %v782_v48  ;;  %v2439_v48 = vpack.c.bf16 %v785_v14, %v784_v10  ;;  %v4571_v50 = vmax.f32 %v3378_v26, 0.0 }
  0x40   : > { %2431 = vmatpush1.bf16.msra.mxu1 %v2430_v60  ;;  %v4570_v60 = vmax.f32 %v3353_v57, 0.0  ;;  %455 = vst [vmem:[#allocation2 + $0x121] sm:$0xff] %v4571_v50  ;;  %v529_v50 = vld [vmem:[#allocation2 + $0x2] sm:$0xff] }
  0x41   : > { %2479 = vmatpush1.bf16.msra.mxu0 %v2478_v9  ;;  %2432 = vmatprep.subr.bf16.mxu1 %v4582_v3  ;;  %v2484_v9 = vpack.c.bf16 %v815_v56, %v814_v52  ;;  %v261_v56 = vld [vmem:[%s3032_s25 + $0xc8] sm:$0xff] }
  0x42   : > { %2480 = vmatprep.subr.bf16.mxu0 %v4582_v3  ;;  %454 = vst [vmem:[#allocation2 + $0x111] sm:$0xff] %v4570_v60  ;;  %v300_v60 = vmul.f32 %v3052_v44, %v261_v56 }
  0x44   : > { %2434 = vmatpush1.bf16.msra.mxu1 %v2433_v32  ;;  %v298_v32 = vmul.f32 %v3052_v44, %v259_v18  ;;  %v262_v18 = vld [vmem:[%s3032_s25 + $0xd0] sm:$0xff] }
  0x45   : > { %2482 = vmatpush1.bf16.msra.mxu0 %v2481_v34  ;;  %2435 = vmatprep.subr.bf16.mxu1 %v4582_v3  ;;  %v299_v34 = vmul.f32 %v3052_v44, %v260_v33  ;;  %v301_v14 = vmul.f32 %v3052_v44, %v262_v18  ;;  %v339_v33 = vadd.f32 %v3057_v45, %v300_v60  ;;  %v264_v18 = vld [vmem:[%s3032_s25 + $0xe0] sm:$0xff] }
  0x46   : > { %2483 = vmatprep.subr.bf16.mxu0 %v4582_v3  ;;  %v337_v52 = vadd.f32 %v3057_v45, %v298_v32  ;;  %v303_v60 = vmul.f32 %v3052_v44, %v264_v18  ;;  %v853_v18 = vld [vmem:[%s4565_s1 + $0x318] sm:$0xff] }
  0x47   : > { %v338_v7 = vadd.f32 %v3057_v45, %v299_v34  ;;  %v263_v34 = vld [vmem:[%s3032_s25 + $0xd8] sm:$0xff] }
  0x48   : > { %2437 = vmatpush1.bf16.msra.mxu1 %v2436_v59  ;;  %v818_v59 = vld [vmem:[%s4565_s1 + $0x200] sm:$0xff]  ;;  %v3399_v10 = vmax.f32 %v337_v52, 0.0  ;;  %v340_v52 = vadd.f32 %v3057_v45, %v301_v14  ;;  %v302_v56 = vmul.f32 %v3052_v44, %v263_v34  ;;  %v852_v34 = vld [vmem:[%s4565_s1 + $0x310] sm:$0xff]  ;;  %v342_v53 = vadd.f32 %v3057_v45, %v303_v60 }
  0x49   : > { %2485 = vmatpush1.bf16.msra.mxu0 %v2484_v9  ;;  %2438 = vmatprep.subr.bf16.mxu1 %v4582_v3  ;;  %v819_v9 = vld [vmem:[%s4565_s1 + $0x208] sm:$0xff]  ;;  %v3408_v32 = vmax.f32 %v338_v7, 0.0  ;;  %v3418_v7 = vmax.f32 %v339_v33, 0.0  ;;  %v822_v60 = vld [vmem:[%s4565_s1 + $0x220] sm:$0xff] }
  0x4a   : > { %2486 = vmatprep.subr.bf16.mxu0 %v4582_v3  ;;  %456 = vst [vmem:[#allocation2 + $0x129] sm:$0xff] %v3399_v10  ;;  %v2490_v51 = vpack.c.bf16 %v819_v9, %v818_v59  ;;  %v821_v59 = vld [vmem:[%s4565_s1 + $0x218] sm:$0xff]  ;;  %v3430_v9 = vpack.c.bf16 %v851_v20, %v850_v19  ;;  %v3432_v14 = vmax.f32 %v340_v52, 0.0  ;;  %v341_v33 = vadd.f32 %v3057_v45, %v302_v56  ;;  %v265_v19 = vld [vmem:[%s3032_s25 + $0xe8] sm:$0xff]  ;;  %v266_v56 = vld [vmem:[%s3032_s25 + $0xf0] sm:$0xff] }
  0x4b   : > { %457 = vst [vmem:[#allocation2 + $0x139] sm:$0xff] %v3408_v32  ;;  %458 = vst [vmem:[#allocation2 + $0x141] sm:$0xff] %v3418_v7  ;;  %v304_v52 = vmul.f32 %v3052_v44, %v265_v19  ;;  %v3454_v41 = vmax.f32 %v342_v53, 0.0  ;;  %v267_v53 = vld [vmem:[%s3032_s25 + $0xf8] sm:$0xff]  ;;  %v855_v19 = vld [vmem:[%s4565_s1 + $0x328] sm:$0xff] }
  0x4c   : > { %2440 = vmatpush1.bf16.msra.mxu1 %v2439_v48  ;;  %v3422_v48 = vld [vmem:[#allocation2 + $0x20] sm:$0xff]  ;;  %459 = vst [vmem:[#allocation2 + $0x151] sm:$0xff] %v3432_v14  ;;  %v3446_v20 = vmax.f32 %v341_v33, 0.0  ;;  %v3464_v33 = vpack.c.bf16 %v853_v18, %v852_v34  ;;  %v306_v18 = vmul.f32 %v3052_v44, %v267_v53  ;;  %v827_v53 = vld [vmem:[%s4565_s1 + $0x248] sm:$0xff] }
  0x4d   : > { %2488 = vmatpush1.bf16.msra.mxu0 %v2487_v58  ;;  %2617 = vmatprep.subr.bf16.mxu1 %v4582_v3  ;;  %v820_v58 = vld [vmem:[%s4565_s1 + $0x210] sm:$0xff]  ;;  %461 = vst [vmem:[#allocation2 + $0x169] sm:$0xff] %v3454_v41 }
  0x4e   : > { %2489 = vmatprep.subr.bf16.mxu0 %v4582_v3  ;;  %v2493_v42 = vpack.c.bf16 %v821_v59, %v820_v58  ;;  %460 = vst [vmem:[#allocation2 + $0x159] sm:$0xff] %v3446_v20  ;;  %v343_v58 = vadd.f32 %v3057_v45, %v304_v52  ;;  %v854_v59 = vld [vmem:[%s4565_s1 + $0x320] sm:$0xff]  ;;  %v3489_v29 = vadd.f32 %v3057_v45, %v306_v18 }
  0x4f   : > { %963 = vmatmul.mubr.f32.vlgmr.msra.gmra.mrb[0].mxu1 %v2827_v8  ;;  %v531_v52 = vld [vmem:[#allocation2 + $0x1a] sm:$0xff] }
  0x50   : > { %1188 = vmatmul.mubr.f32.vlgmr.msra.gmra.mrb[0].mxu0 %v529_v50  ;;  %967 = vmatprep.mubr.f32.mxu1 %v498_v24  ;;  %v305_v24 = vmul.f32 %v3052_v44, %v266_v56  ;;  %v3457_v50 = vld [vmem:[#allocation2 + $0x30] sm:$0xff]  ;;  %4615 = vst [vmem:[#allocation5_spill] sm:$0xff] %v3489_v29 }
  0x51   : > { %2491 = vmatpush1.bf16.msra.mxu0 %v2490_v51  ;;  %1192 = vmatprep.mubr.f32.mxu0 %v3422_v48  ;;  %v823_v51 = vld [vmem:[%s4565_s1 + $0x228] sm:$0xff]  ;;  %v824_v44 = vld [vmem:[%s4565_s1 + $0x230] sm:$0xff] }
  0x52   : > { %2492 = vmatprep.subr.bf16.mxu0 %v4582_v3  ;;  %2633 = vmatpush1.bf16.msra.mxu1 %v3430_v9  ;;  %v3479_v34 = vadd.f32 %v3057_v45, %v305_v24  ;;  %v2496_v56 = vpack.c.bf16 %v823_v51, %v822_v60  ;;  %v564_v24 = vld [vmem:[#allocation2 + $0x38] sm:$0xff]  ;;  %v856_v45 = vld [vmem:[%s4565_s1 + $0x330] sm:$0xff]  ;;  %v2499_v60 = vpack.c.bf16 %v825_v55, %v824_v44  ;;  %v565_v51 = vld [vmem:[#allocation2 + $0x48] sm:$0xff] }
  0x53   : > { %968 = vmatmul.mubr.f32.gmra.mrb[2].mxu1 %v2827_v8  ;;  %2618 = vmatprep.subr.bf16.mxu1 %v4582_v3  ;;  %v3484_v8 = vmax.f32 %v343_v58, 0.0  ;;  %v826_v58 = vld [vmem:[%s4565_s1 + $0x240] sm:$0xff] }
  0x54   : > { %4613 = vst [vmem:[#allocation3_spill] sm:$0xff] %v3479_v34  ;;  %1193 = vmatmul.mubr.f32.gmra.mrb[2].mxu0 %v530_v49  ;;  %972 = vmatprep.mubr.f32.mxu1 %v346_v1  ;;  %v4581_v37 = vmax.f32 %v3479_v34, 0.0  ;;  %v3499_v1 = vpack.c.bf16 %v855_v19, %v854_v59  ;;  %v4580_v49 = vmax.f32 %v3489_v29, 0.0  ;;  %v859_v59 = vld [vmem:[%s4565_s1 + $0x348] sm:$0xff]  ;;  %v533_v19 = vld [vmem:[#allocation2 + $0x32] sm:$0xff]  ;;  %v2502_v18 = vpack.c.bf16 %v827_v53, %v826_v58  ;;  %v534_v55 = vld [vmem:[#allocation2 + $0x3a] sm:$0xff] }
  0x55   : > { %4614 = vst [vmem:[#allocation4_spill] sm:$0xff] %v3484_v8  ;;  %1197 = vmatprep.mubr.f32.mxu0 %v3457_v50  ;;  %2494 = vmatpush1.bf16.msra.mxu0 %v2493_v42  ;;  %462 = vst [vmem:[#allocation2 + $0x171] sm:$0xff] %v3484_v8  ;;  %v857_v42 = vld [vmem:[%s4565_s1 + $0x338] sm:$0xff]  ;;  %v3576_v58 = vld [vmem:[#allocation2 + $0x4a] sm:$0xff] }
  0x56   : > { %2495 = vmatprep.subr.bf16.mxu0 %v4582_v3  ;;  %2634 = vmatpush1.bf16.msra.mxu1 %v3464_v33  ;;  %463 = vst [vmem:[#allocation2 + $0x181] sm:$0xff] %v4581_v37  ;;  %464 = vst [vmem:[#allocation2 + $0x189] sm:$0xff] %v4580_v49  ;;  %v3525_v2 = vpack.c.bf16 %v857_v42, %v856_v45  ;;  %v567_v42 = vld [vmem:[#allocation2 + $0x60] sm:$0xff]  ;;  %v3801_v49 = vld [vmem:[#allocation2 + $0xd8] sm:$0xff]  ;;  %v4617_v37 = vmax.f32 %v3244_v23, 0.0  ;;  %v4618_v23 = vmax.f32 %v3258_v30, 0.0 }
  0x57   : > { %973 = vmatmul.mubr.f32.gmra.mrb[4].mxu1 %v3212_v61  ;;  %2619 = vmatprep.subr.bf16.mxu1 %v4582_v3  ;;  %v532_v61 = vld [vmem:[#allocation2 + $0x22] sm:$0xff]  ;;  %v4620_v30 = vmax.f32 %v3273_v38, 0.0  ;;  %v4624_v38 = vmax.f32 %v3311_v5, 0.0  ;;  %v4628_v5 = vmax.f32 %v3353_v57, 0.0  ;;  %v3883_v34 = vld [vmem:[#allocation2 + $0x138] sm:$0xff]  ;;  %v3898_v57 = vld [vmem:[#allocation2 + $0x12a] sm:$0xff] }
  0x58   : > { %1198 = vmatmul.mubr.f32.gmra.mrb[4].mxu0 %v531_v52  ;;  %977 = vmatprep.mubr.f32.mxu1 %v347_v15  ;;  %v858_v15 = vld [vmem:[%s4565_s1 + $0x340] sm:$0xff]  ;;  %v566_v52 = vld [vmem:[#allocation2 + $0x50] sm:$0xff]  ;;  %v3874_v29 = vld [vmem:[#allocation2 + $0x128] sm:$0xff]  ;;  %4632 = vst [vmem:[#allocation12_spill] sm:$0xff] %v3898_v57 }
  0x59   : > { %1202 = vmatprep.mubr.f32.mxu0 %v564_v24  ;;  %2497 = vmatpush1.bf16.msra.mxu0 %v2496_v56  ;;  %v829_v56 = vld [vmem:[%s4565_s1 + $0x258] sm:$0xff]  ;;  %v3545_v44 = vpack.c.bf16 %v859_v59, %v858_v15  ;;  %v832_v15 = vld [vmem:[%s4565_s1 + $0x270] sm:$0xff] }
  0x5a   : > { %2498 = vmatprep.subr.bf16.mxu0 %v4582_v3  ;;  %2635 = vmatpush1.bf16.msra.mxu1 %v3499_v1  ;;  %v833_v59 = vld [vmem:[%s4565_s1 + $0x278] sm:$0xff] }
  0x5b   : > { %978 = vmatmul.mubr.f32.gmra.mrb[6].mxu1 %v3422_v48  ;;  %2620 = vmatprep.subr.bf16.mxu1 %v4582_v3  ;;  %v828_v48 = vld [vmem:[%s4565_s1 + $0x250] sm:$0xff] }
  0x5c   : > { %1203 = vmatmul.mubr.f32.gmra.mrb[6].mxu0 %v532_v61  ;;  %982 = vmatprep.mubr.f32.mxu1 %v348_v16  ;;  %v861_v16 = vld [vmem:[%s4565_s1 + $0x358] sm:$0xff]  ;;  %v2505_v45 = vpack.c.bf16 %v829_v56, %v828_v48  ;;  %v831_v61 = vld [vmem:[%s4565_s1 + $0x268] sm:$0xff]  ;;  %v834_v56 = vld [vmem:[%s4565_s1 + $0x280] sm:$0xff] }
  0x5d   : > { %1207 = vmatprep.mubr.f32.mxu0 %v565_v51  ;;  %2500 = vmatpush1.bf16.msra.mxu0 %v2499_v60  ;;  %v3565_v60 = vpack.c.bf16 %v861_v16, %v860_v4  ;;  %v569_v48 = vld [vmem:[#allocation2 + $0x78] sm:$0xff]  ;;  %v835_v4 = vld [vmem:[%s4565_s1 + $0x288] sm:$0xff] }
  0x5e   : > { %2501 = vmatprep.subr.bf16.mxu0 %v4582_v3  ;;  %2636 = vmatpush1.bf16.msra.mxu1 %v3525_v2  ;;  %v867_v16 = vld [vmem:[%s4565_s1 + $0x388] sm:$0xff] }
  0x5f   : > { %983 = vmatmul.mubr.f32.gmra.mrb[8].mxu1 %v3457_v50  ;;  %2621 = vmatprep.subr.bf16.mxu1 %v4582_v3  ;;  %v830_v50 = vld [vmem:[%s4565_s1 + $0x260] sm:$0xff] }
  0x60   : > { %1208 = vmatmul.mubr.f32.gmra.mrb[8].mxu0 %v533_v19  ;;  %987 = vmatprep.mubr.f32.mxu1 %v349_v21  ;;  %v863_v21 = vld [vmem:[%s4565_s1 + $0x368] sm:$0xff]  ;;  %v2508_v53 = vpack.c.bf16 %v831_v61, %v830_v50  ;;  %v865_v19 = vld [vmem:[%s4565_s1 + $0x378] sm:$0xff]  ;;  %v836_v50 = vld [vmem:[%s4565_s1 + $0x290] sm:$0xff] }
  0x61   : > { %1212 = vmatprep.mubr.f32.mxu0 %v566_v52  ;;  %2503 = vmatpush1.bf16.msra.mxu0 %v2502_v18  ;;  %v3586_v17 = vpack.c.bf16 %v863_v21, %v862_v11  ;;  %v3598_v18 = vld [vmem:[#allocation2 + $0x52] sm:$0xff]  ;;  %v3642_v21 = vld [vmem:[#allocation2 + $0x6a] sm:$0xff] }
  0x62   : > { %2504 = vmatprep.subr.bf16.mxu0 %v4582_v3  ;;  %2637 = vmatpush1.bf16.msra.mxu1 %v3545_v44  ;;  %v837_v61 = vld [vmem:[%s4565_s1 + $0x298] sm:$0xff] }
  0x63   : > { %988 = vmatmul.mubr.f32.gmra.mrb[10].mxu1 %v564_v24  ;;  %2622 = vmatprep.subr.bf16.mxu1 %v4582_v3  ;;  %v568_v24 = vld [vmem:[#allocation2 + $0x68] sm:$0xff]  ;;  %v869_v11 = vld [vmem:[%s4565_s1 + $0x398] sm:$0xff] }
  0x64   : > { %1213 = vmatmul.mubr.f32.gmra.mrb[10].mxu0 %v534_v55  ;;  %992 = vmatprep.mubr.f32.mxu1 %v350_v27  ;;  %v864_v27 = vld [vmem:[%s4565_s1 + $0x370] sm:$0xff]  ;;  %v3620_v55 = vld [vmem:[#allocation2 + $0x62] sm:$0xff] }
  0x65   : > { %1217 = vmatprep.mubr.f32.mxu0 %v567_v42  ;;  %2506 = vmatpush1.bf16.msra.mxu0 %v2505_v45  ;;  %v3608_v22 = vpack.c.bf16 %v865_v19, %v864_v27  ;;  %v570_v45 = vld [vmem:[#allocation2 + $0x80] sm:$0xff]  ;;  %v871_v27 = vld [vmem:[%s4565_s1 + $0x3a8] sm:$0xff] }
  0x66   : > { %2507 = vmatprep.subr.bf16.mxu0 %v4582_v3  ;;  %2638 = vmatpush1.bf16.msra.mxu1 %v3565_v60  ;;  %v3667_v19 = vld [vmem:[#allocation2 + $0x7a] sm:$0xff] }
  0x67   : > { %993 = vmatmul.mubr.f32.gmra.mrb[12].mxu1 %v565_v51  ;;  %2623 = vmatprep.subr.bf16.mxu1 %v4582_v3  ;;  %v2511_v51 = vpack.c.bf16 %v833_v59, %v832_v15  ;;  %v838_v15 = vld [vmem:[%s4565_s1 + $0x2a0] sm:$0xff]  ;;  %v839_v59 = vld [vmem:[%s4565_s1 + $0x2a8] sm:$0xff] }
  0x68   : > { %1218 = vmatmul.mubr.f32.gmra.mrb[12].mxu0 %v3576_v58  ;;  %997 = vmatprep.mubr.f32.mxu1 %v351_v35  ;;  %v866_v35 = vld [vmem:[%s4565_s1 + $0x380] sm:$0xff] }
  0x69   : > { %1222 = vmatprep.mubr.f32.mxu0 %v568_v24  ;;  %2509 = vmatpush1.bf16.msra.mxu0 %v2508_v53  ;;  %v3630_v28 = vpack.c.bf16 %v867_v16, %v866_v35  ;;  %v3644_v53 = vld [vmem:[#allocation2 + $0x90] sm:$0xff]  ;;  %v873_v35 = vld [vmem:[%s4565_s1 + $0x3b8] sm:$0xff]  ;;  %v3692_v16 = vld [vmem:[#allocation2 + $0x82] sm:$0xff] }
  0x6a   : > { %2510 = vmatprep.subr.bf16.mxu0 %v4582_v3  ;;  %2639 = vmatpush1.bf16.msra.mxu1 %v3586_v17 }
  0x6b   : > { %998 = vmatmul.mubr.f32.gmra.mrb[14].mxu1 %v566_v52  ;;  %2624 = vmatprep.subr.bf16.mxu1 %v4582_v3  ;;  %v2514_v52 = vpack.c.bf16 %v835_v4, %v834_v56  ;;  %v840_v56 = vld [vmem:[%s4565_s1 + $0x2b0] sm:$0xff]  ;;  %v841_v4 = vld [vmem:[%s4565_s1 + $0x2b8] sm:$0xff] }
  0x6c   : > { %1223 = vmatmul.mubr.f32.gmra.mrb[14].mxu0 %v3598_v18  ;;  %1002 = vmatprep.mubr.f32.mxu1 %v352_v39  ;;  %v868_v39 = vld [vmem:[%s4565_s1 + $0x390] sm:$0xff] }
  0x6d   : > { %1227 = vmatprep.mubr.f32.mxu0 %v569_v48  ;;  %2512 = vmatpush1.bf16.msra.mxu0 %v2511_v51  ;;  %v3654_v36 = vpack.c.bf16 %v869_v11, %v868_v39  ;;  %v3669_v51 = vld [vmem:[#allocation2 + $0x98] sm:$0xff]  ;;  %v875_v39 = vld [vmem:[%s4565_s1 + $0x3c8] sm:$0xff] }
  0x6e   : > { %2513 = vmatprep.subr.bf16.mxu0 %v4582_v3  ;;  %2640 = vmatpush1.bf16.msra.mxu1 %v3608_v22  ;;  %v3716_v11 = vld [vmem:[#allocation2 + $0x92] sm:$0xff] }
  0x6f   : > { %1003 = vmatmul.mubr.f32.gmra.mrb[16].mxu1 %v567_v42  ;;  %2625 = vmatprep.subr.bf16.mxu1 %v4582_v3  ;;  %v2517_v42 = vpack.c.bf16 %v837_v61, %v836_v50  ;;  %v842_v50 = vld [vmem:[%s4565_s1 + $0x2c0] sm:$0xff]  ;;  %v843_v61 = vld [vmem:[%s4565_s1 + $0x2c8] sm:$0xff] }
  0x70   : > { %1228 = vmatmul.mubr.f32.gmra.mrb[16].mxu0 %v3620_v55  ;;  %1007 = vmatprep.mubr.f32.mxu1 %v353_v46  ;;  %v870_v46 = vld [vmem:[%s4565_s1 + $0x3a0] sm:$0xff] }
  0x71   : > { %1232 = vmatprep.mubr.f32.mxu0 %v570_v45  ;;  %2515 = vmatpush1.bf16.msra.mxu0 %v2514_v52  ;;  %v3679_v40 = vpack.c.bf16 %v871_v27, %v870_v46  ;;  %v3694_v52 = vld [vmem:[#allocation2 + $0xa8] sm:$0xff]  ;;  %v876_v27 = vld [vmem:[%s4565_s1 + $0x3d0] sm:$0xff] }
  0x72   : > { %2516 = vmatprep.subr.bf16.mxu0 %v4582_v3  ;;  %2641 = vmatpush1.bf16.msra.mxu1 %v3630_v28 }
  0x73   : > { %1008 = vmatmul.mubr.f32.gmra.mrb[18].mxu1 %v568_v24  ;;  %2626 = vmatprep.subr.bf16.mxu1 %v4582_v3  ;;  %v2520_v24 = vpack.c.bf16 %v839_v59, %v838_v15  ;;  %v844_v15 = vld [vmem:[%s4565_s1 + $0x2d0] sm:$0xff]  ;;  %v845_v59 = vld [vmem:[%s4565_s1 + $0x2d8] sm:$0xff] }
  0x74   : > { %1233 = vmatmul.mubr.f32.gmra.mrb[18].mxu0 %v3642_v21  ;;  %1012 = vmatprep.mubr.f32.mxu1 %v354_v54  ;;  %v872_v54 = vld [vmem:[%s4565_s1 + $0x3b0] sm:$0xff] }
  0x75   : > { %1237 = vmatprep.mubr.f32.mxu0 %v3644_v53  ;;  %2518 = vmatpush1.bf16.msra.mxu0 %v2517_v42  ;;  %v3704_v47 = vpack.c.bf16 %v873_v35, %v872_v54  ;;  %v3718_v42 = vld [vmem:[#allocation2 + $0xb0] sm:$0xff]  ;;  %v3743_v54 = vld [vmem:[#allocation2 + $0xc0] sm:$0xff] }
  0x76   : > { %2519 = vmatprep.subr.bf16.mxu0 %v4582_v3  ;;  %2642 = vmatpush1.bf16.msra.mxu1 %v3654_v36  ;;  %v846_v35 = vld [vmem:[%s4565_s1 + $0x2e0] sm:$0xff] }
  0x77   : > { %1013 = vmatmul.mubr.f32.gmra.mrb[20].mxu1 %v569_v48  ;;  %2627 = vmatprep.subr.bf16.mxu1 %v4582_v3  ;;  %v2523_v48 = vpack.c.bf16 %v841_v4, %v840_v56  ;;  %v3741_v56 = vld [vmem:[#allocation2 + $0x9a] sm:$0xff]  ;;  %v2529_v4 = vpack.c.bf16 %v845_v59, %v844_v15  ;;  %v3769_v15 = vld [vmem:[#allocation2 + $0xc8] sm:$0xff]  ;;  %v848_v59 = vld [vmem:[%s4565_s1 + $0x2f0] sm:$0xff] }
  0x78   : > { %1238 = vmatmul.mubr.f32.gmra.mrb[20].mxu0 %v3667_v19  ;;  %1017 = vmatprep.mubr.f32.mxu1 %v355_v62  ;;  %v874_v62 = vld [vmem:[%s4565_s1 + $0x3c0] sm:$0xff] }
  0x79   : > { %1242 = vmatprep.mubr.f32.mxu0 %v3669_v51  ;;  %2521 = vmatpush1.bf16.msra.mxu0 %v2520_v24  ;;  %v3728_v46 = vpack.c.bf16 %v875_v39, %v874_v62  ;;  %v877_v24 = vld [vmem:[%s4565_s1 + $0x3d8] sm:$0xff]  ;;  %v879_v62 = vld [vmem:[%s4565_s1 + $0x3e8] sm:$0xff] }
  0x7a   : > { %2522 = vmatprep.subr.bf16.mxu0 %v4582_v3  ;;  %2643 = vmatpush1.bf16.msra.mxu1 %v3679_v40  ;;  %v3767_v39 = vld [vmem:[#allocation2 + $0xaa] sm:$0xff] }
  0x7b   : > { %1018 = vmatmul.mubr.f32.gmra.mrb[22].mxu1 %v570_v45  ;;  %2628 = vmatprep.subr.bf16.mxu1 %v4582_v3  ;;  %v2526_v45 = vpack.c.bf16 %v843_v61, %v842_v50  ;;  %v3753_v50 = vpack.c.bf16 %v877_v24, %v876_v27  ;;  %v878_v61 = vld [vmem:[%s4565_s1 + $0x3e0] sm:$0xff]  ;;  %v880_v27 = vld [vmem:[%s4565_s1 + $0x3f0] sm:$0xff]  ;;  %v881_v24 = vld [vmem:[%s4565_s1 + $0x3f8] sm:$0xff] }
  0x7c   : > { %1243 = vmatmul.mubr.f32.gmra.mrb[22].mxu0 %v3692_v16  ;;  %1022 = vmatprep.mubr.f32.mxu1 %v3217_v63 }
  0x7d   : > { %1247 = vmatprep.mubr.f32.mxu0 %v3694_v52  ;;  %2524 = vmatpush1.bf16.msra.mxu0 %v2523_v48  ;;  %v847_v48 = vld [vmem:[%s4565_s1 + $0x2e8] sm:$0xff] }
  0x7e   : > { %2525 = vmatprep.subr.bf16.mxu0 %v4582_v3  ;;  %2644 = vmatpush1.bf16.msra.mxu1 %v3704_v47 }
  0x7f   : > { %1023 = vmatmul.mubr.f32.gmra.mrb[24].mxu1 %v3644_v53  ;;  %2629 = vmatprep.subr.bf16.mxu1 %v4582_v3 }
  0x80   : > { %1248 = vmatmul.mubr.f32.gmra.mrb[24].mxu0 %v3716_v11  ;;  %1027 = vmatprep.mubr.f32.mxu1 %v3227_v6 }
  0x81   : > { %1252 = vmatprep.mubr.f32.mxu0 %v3718_v42  ;;  %2527 = vmatpush1.bf16.msra.mxu0 %v2526_v45  ;;  %v2532_v45 = vpack.c.bf16 %v847_v48, %v846_v35  ;;  %v882_v35 = vld [vmem:[%s4565_s1 + $0x400] sm:$0xff]  ;;  %v883_v48 = vld [vmem:[%s4565_s1 + $0x408] sm:$0xff] }
  0x82   : > { %2528 = vmatprep.subr.bf16.mxu0 %v4582_v3  ;;  %2645 = vmatpush1.bf16.msra.mxu1 %v3728_v46 }
  0x83   : > { %1028 = vmatmul.mubr.f32.gmra.mrb[26].mxu1 %v3669_v51  ;;  %2630 = vmatprep.subr.bf16.mxu1 %v4582_v3 }
  0x84   : > { %1253 = vmatmul.mubr.f32.gmra.mrb[26].mxu0 %v3741_v56  ;;  %1032 = vmatprep.mubr.f32.mxu1 %v358_v12  ;;  %v3779_v12 = vpack.c.bf16 %v879_v62, %v878_v61  ;;  %v3799_v61 = vld [vmem:[#allocation2 + $0xb2] sm:$0xff]  ;;  %v2535_v62 = vpack.c.bf16 %v849_v0, %v848_v59  ;;  %v3817_v59 = vld [vmem:[#allocation2 + $0xe0] sm:$0xff] }
  0x85   : > { %1257 = vmatprep.mubr.f32.mxu0 %v3743_v54  ;;  %2530 = vmatpush1.bf16.msra.mxu0 %v2529_v4  ;;  %v4616_v4 = vmax.f32 %v3237_v13, 0.0  ;;  %v3805_v13 = vpack.c.bf16 %v881_v24, %v880_v27  ;;  %v3829_v0 = vld [vmem:[#allocation2 + $0xf0] sm:$0xff]  ;;  %v4619_v27 = vmax.f32 %v3261_v31, 0.0  ;;  %v3836_v24 = vld [vmem:[#allocation2 + $0xda] sm:$0xff]  ;;  %v4622_v31 = vmax.f32 %v3280_v43, 0.0 }
  0x86   : > { %2531 = vmatprep.subr.bf16.mxu0 %v4582_v3  ;;  %2646 = vmatpush1.bf16.msra.mxu1 %v3753_v50  ;;  %v4626_v43 = vmax.f32 %v3331_v25, 0.0  ;;  %v4630_v25 = vmax.f32 %v3378_v26, 0.0  ;;  %v3906_v26 = vld [vmem:[#allocation2 + $0x13a] sm:$0xff] }
  0x87   : > { %1033 = vmatmul.mubr.f32.gmra.mrb[28].mxu1 %v3694_v52  ;;  %2631 = vmatprep.subr.bf16.mxu1 %v4582_v3  ;;  %4633 = vst [vmem:[#allocation13_spill] sm:$0xff] %v3906_v26 }
  0x88   : > { %1258 = vmatmul.mubr.f32.gmra.mrb[28].mxu0 %v3767_v39  ;;  %1037 = vmatprep.mubr.f32.mxu1 %v4616_v4  ;;  %v3809_v4 = vpack.c.bf16 %v883_v48, %v882_v35  ;;  %v3838_v35 = vld [vmem:[#allocation2 + $0xf8] sm:$0xff]  ;;  %v3845_v48 = vld [vmem:[#allocation2 + $0xe2] sm:$0xff] }
  0x89   : > { %1262 = vmatprep.mubr.f32.mxu0 %v3769_v15  ;;  %2533 = vmatpush1.bf16.msra.mxu0 %v2532_v45  ;;  %v3815_v45 = vld [vmem:[#allocation2 + $0xc2] sm:$0xff]  ;;  %4621 = vst [vmem:[#allocation6_spill] sm:$0xff] %v3845_v48 }
  0x8a   : > { %2534 = vmatprep.subr.bf16.mxu0 %v4582_v3  ;;  %2647 = vmatpush1.bf16.msra.mxu1 %v3779_v12 }
  0x8b   : > { %1038 = vmatmul.mubr.f32.gmra.mrb[30].mxu1 %v3718_v42  ;;  %2632 = vmatprep.subr.bf16.mxu1 %v4582_v3 }
  0x8c   : > { %1263 = vmatmul.mubr.f32.gmra.mrb[30].mxu0 %v3799_v61  ;;  %1042 = vmatprep.mubr.f32.mxu1 %v4617_v37  ;;  %v3827_v37 = vld [vmem:[#allocation2 + $0xca] sm:$0xff] }
  0x8d   : > { %1267 = vmatprep.mubr.f32.mxu0 %v3801_v49  ;;  %2536 = vmatpush1.bf16.msra.mxu0 %v2535_v62  ;;  %v3847_v62 = vld [vmem:[#allocation2 + $0x108] sm:$0xff] }
  0x8e   : > { %2648 = vmatpush1.bf16.msra.mxu1 %v3805_v13  ;;  %2537 = vmatprep.subr.bf16.mxu0 %v4582_v3  ;;  %v3865_v3 = vld [vmem:[#allocation2 + $0x120] sm:$0xff] }
  0x8f   : > { %1043 = vmatmul.mubr.f32.gmra.mrb[32].mxu1 %v3743_v54  ;;  %2586 = vmatprep.subr.bf16.mxu1 %v3809_v4 }
  0x90   : > { %1268 = vmatmul.mubr.f32.gmra.mrb[32].mxu0 %v3815_v45  ;;  %1047 = vmatprep.mubr.f32.mxu1 %v4618_v23  ;;  %v3854_v23 = vld [vmem:[#allocation2 + $0xf2] sm:$0xff] }
  0x91   : > { %1272 = vmatprep.mubr.f32.mxu0 %v3817_v59  ;;  %4623 = vst [vmem:[#allocation7_spill] sm:$0xff] %v3854_v23 }
  0x93   : > { %1048 = vmatmul.mubr.f32.gmra.mrb[34].mxu1 %v3769_v15 }
  0x94   : > { %1273 = vmatmul.mubr.f32.gmra.mrb[34].mxu0 %v3827_v37  ;;  %1052 = vmatprep.mubr.f32.mxu1 %v4619_v27  ;;  %v3856_v27 = vld [vmem:[#allocation2 + $0x110] sm:$0xff] }
  0x95   : > { %1277 = vmatprep.mubr.f32.mxu0 %v3829_v0 }
  0x97   : > { %1053 = vmatmul.mubr.f32.gmra.mrb[36].mxu1 %v3801_v49 }
  0x98   : > { %1278 = vmatmul.mubr.f32.gmra.mrb[36].mxu0 %v3836_v24  ;;  %1057 = vmatprep.mubr.f32.mxu1 %v4620_v30  ;;  %v3863_v30 = vld [vmem:[#allocation2 + $0xfa] sm:$0xff] }
  0x99   : > { %1282 = vmatprep.mubr.f32.mxu0 %v3838_v35  ;;  %4625 = vst [vmem:[#allocation8_spill] sm:$0xff] %v3863_v30 }
  0x9b   : > { %1058 = vmatmul.mubr.f32.gmra.mrb[38].mxu1 %v3817_v59 }
  0x9c   : > { %1283 = vmatmul.mubr.f32.gmra.mrb[38].mxu0 %v3845_v48  ;;  %1062 = vmatprep.mubr.f32.mxu1 %v4622_v31  ;;  %v3872_v31 = vld [vmem:[#allocation2 + $0x10a] sm:$0xff] }
  0x9d   : > { %1287 = vmatprep.mubr.f32.mxu0 %v3847_v62  ;;  %4627 = vst [vmem:[#allocation9_spill] sm:$0xff] %v3872_v31  ;;  %v3940_v48 = vld [vmem:[#allocation2 + $0x188] sm:$0xff] }
  0x9e   : > { %4642 = vst [vmem:[#allocation22_spill] sm:$0xff] %v3940_v48 }
  0x9f   : > { %1063 = vmatmul.mubr.f32.gmra.mrb[40].mxu1 %v3829_v0 }
  0xa0   : > { %1288 = vmatmul.mubr.f32.gmra.mrb[40].mxu0 %v3854_v23  ;;  %1067 = vmatprep.mubr.f32.mxu1 %v4624_v38  ;;  %v3881_v38 = vld [vmem:[#allocation2 + $0x112] sm:$0xff]  ;;  %v3932_v23 = vld [vmem:[#allocation2 + $0x180] sm:$0xff] }
  0xa1   : > { %1292 = vmatprep.mubr.f32.mxu0 %v3856_v27  ;;  %4629 = vst [vmem:[#allocation10_spill] sm:$0xff] %v3881_v38  ;;  %4640 = vst [vmem:[#allocation20_spill] sm:$0xff] %v3932_v23 }
  0xa3   : > { %1068 = vmatmul.mubr.f32.gmra.mrb[42].mxu1 %v3838_v35 }
  0xa4   : > { %1293 = vmatmul.mubr.f32.gmra.mrb[42].mxu0 %v3863_v30  ;;  %1072 = vmatprep.mubr.f32.mxu1 %v4626_v43  ;;  %v3890_v43 = vld [vmem:[#allocation2 + $0x122] sm:$0xff]  ;;  %v3924_v30 = vld [vmem:[#allocation2 + $0x170] sm:$0xff] }
  0xa5   : > { %1297 = vmatprep.mubr.f32.mxu0 %v3865_v3  ;;  %4631 = vst [vmem:[#allocation11_spill] sm:$0xff] %v3890_v43  ;;  %4638 = vst [vmem:[#allocation18_spill] sm:$0xff] %v3924_v30 }
  0xa7   : > { %1073 = vmatmul.mubr.f32.gmra.mrb[44].mxu1 %v3847_v62 }
  0xa8   : > { %1298 = vmatmul.mubr.f32.gmra.mrb[44].mxu0 %v3872_v31  ;;  %1077 = vmatprep.mubr.f32.mxu1 %v4628_v5  ;;  %v3892_v31 = vld [vmem:[#allocation2 + $0x140] sm:$0xff]  ;;  %v3900_v5 = vld [vmem:[#allocation2 + $0x150] sm:$0xff] }
  0xa9   : > { %1302 = vmatprep.mubr.f32.mxu0 %v3874_v29 }
  0xab   : > { %1078 = vmatmul.mubr.f32.gmra.mrb[46].mxu1 %v3856_v27 }
  0xac   : > { %1303 = vmatmul.mubr.f32.gmra.mrb[46].mxu0 %v3881_v38  ;;  %1082 = vmatprep.mubr.f32.mxu1 %v4630_v25  ;;  %v3908_v25 = vld [vmem:[#allocation2 + $0x158] sm:$0xff]  ;;  %v3916_v38 = vld [vmem:[#allocation2 + $0x168] sm:$0xff] }
  0xad   : > { %1307 = vmatprep.mubr.f32.mxu0 %v3883_v34  ;;  %4634 = vst [vmem:[#allocation14_spill] sm:$0xff] %v3908_v25  ;;  %4636 = vst [vmem:[#allocation16_spill] sm:$0xff] %v3916_v38 }
  0xaf   : > { %1083 = vmatmul.mubr.f32.gmra.mrb[48].mxu1 %v3865_v3 }
  0xb0   : > { %1308 = vmatmul.mubr.f32.gmra.mrb[48].mxu0 %v3890_v43  ;;  %1087 = vmatprep.mubr.f32.mxu1 %v3399_v10  ;;  %v3914_v43 = vld [vmem:[#allocation2 + $0x142] sm:$0xff] }
  0xb1   : > { %1312 = vmatprep.mubr.f32.mxu0 %v3892_v31  ;;  %4635 = vst [vmem:[#allocation15_spill] sm:$0xff] %v3914_v43 }
  0xb3   : > { %1088 = vmatmul.mubr.f32.gmra.mrb[50].mxu1 %v3874_v29 }
  0xb4   : > { %1313 = vmatmul.mubr.f32.gmra.mrb[50].mxu0 %v3898_v57  ;;  %1092 = vmatprep.mubr.f32.mxu1 %v3408_v32  ;;  %v3922_v57 = vld [vmem:[#allocation2 + $0x152] sm:$0xff] }
  0xb5   : > { %1317 = vmatprep.mubr.f32.mxu0 %v3900_v5  ;;  %4637 = vst [vmem:[#allocation17_spill] sm:$0xff] %v3922_v57 }
  0xb7   : > { %1093 = vmatmul.mubr.f32.gmra.mrb[52].mxu1 %v3883_v34 }
  0xb8   : > { %1318 = vmatmul.mubr.f32.gmra.mrb[52].mxu0 %v3906_v26  ;;  %1097 = vmatprep.mubr.f32.mxu1 %v3418_v7  ;;  %v3930_v26 = vld [vmem:[#allocation2 + $0x15a] sm:$0xff] }
  0xb9   : > { %1322 = vmatprep.mubr.f32.mxu0 %v3908_v25  ;;  %4639 = vst [vmem:[#allocation19_spill] sm:$0xff] %v3930_v26 }
  0xbb   : > { %1098 = vmatmul.mubr.f32.gmra.mrb[54].mxu1 %v3892_v31 }
  0xbc   : > { %1323 = vmatmul.mubr.f32.gmra.mrb[54].mxu0 %v3914_v43  ;;  %1102 = vmatprep.mubr.f32.mxu1 %v3432_v14  ;;  %v3938_v43 = vld [vmem:[#allocation2 + $0x16a] sm:$0xff] }
  0xbd   : > { %1327 = vmatprep.mubr.f32.mxu0 %v3916_v38  ;;  %4641 = vst [vmem:[#allocation21_spill] sm:$0xff] %v3938_v43 }
  0xbf   : > { %1103 = vmatmul.mubr.f32.gmra.mrb[56].mxu1 %v3900_v5 }
  0xc0   : > { %1328 = vmatmul.mubr.f32.gmra.mrb[56].mxu0 %v3922_v57  ;;  %1107 = vmatprep.mubr.f32.mxu1 %v3446_v20  ;;  %v3946_v57 = vld [vmem:[#allocation2 + $0x172] sm:$0xff] }
  0xc1   : > { %1332 = vmatprep.mubr.f32.mxu0 %v3924_v30  ;;  %4643 = vst [vmem:[#allocation23_spill] sm:$0xff] %v3946_v57 }
  0xc3   : > { %1108 = vmatmul.mubr.f32.gmra.mrb[58].mxu1 %v3908_v25  ;;  %v625_v25 = vld [vmem:[#allocation2 + $0x1a] sm:$0xff] }
  0xc4   : > { %1333 = vmatmul.mubr.f32.gmra.mrb[58].mxu0 %v3930_v26  ;;  %1112 = vmatprep.mubr.f32.mxu1 %v3454_v41  ;;  %v884_v26 = vld [vmem:[%s4565_s1 + $0x410] sm:$0xff] }
  0xc5   : > { %1337 = vmatprep.mubr.f32.mxu0 %v3932_v23  ;;  %v593_v23 = vld [vmem:[#allocation2 + $0x19] sm:$0xff] }
  0xc7   : > { %1113 = vmatmul.mubr.f32.gmra.mrb[60].mxu1 %v3916_v38  ;;  %v4644_v38 = vmov 0.0|0.0  }
  0xc8   : > { %1338 = vmatmul.mubr.f32.gmra.mrb[60].mxu0 %v3938_v43  ;;  %1117 = vmatprep.mubr.f32.mxu1 %v3484_v8  ;;  %v885_v43 = vld [vmem:[%s4565_s1 + $0x418] sm:$0xff] }
  0xc9   : > { %1342 = vmatprep.mubr.f32.mxu0 %v3940_v48  ;;  %v626_v48 = vld [vmem:[#allocation2 + $0x22] sm:$0xff]  ;;  %v2589_v8 = vpack.c.bf16 %v885_v43, %v884_v26  ;;  %v3989_v43 = vld [vmem:[#allocation2 + $0xb1] sm:$0xff] }
  0xca   : > { %v4005_v26 = vld [vmem:[#allocation2 + $0xc1] sm:$0xff] }
  0xcb   : > { %1118 = vmatmul.mubr.f32.gmra.mrb[62].mxu1 %v3924_v30  ;;  %v3966_v30 = vld [vmem:[#allocation2 + $0x32] sm:$0xff] }
  0xcc   : > { %1343 = vmatmul.mubr.f32.gmra.mrb[62].mxu0 %v3946_v57  ;;  %1677 = vmatprep.mubr.f32.mxu1 %v3217_v63  ;;  %v886_v63 = vld [vmem:[%s4565_s1 + $0x420] sm:$0xff]  ;;  %v887_v57 = vld [vmem:[%s4565_s1 + $0x428] sm:$0xff] }
  0xcd   : > { %1412 = vmatprep.mubr.f32.mxu0 %v625_v25  ;;  %v594_v25 = vld [vmem:[#allocation2 + $0x21] sm:$0xff] }
  0xcf   : > { %1678 = vmatmul.mubr.f32.vlgmr.msra.gmra.mrb[64].mxu1 %v3644_v53  ;;  %v3971_v53 = vld [vmem:[#allocation2 + $0xa9] sm:$0xff] }
  0xd0   : > { %1413 = vmatmul.mubr.f32.vlgmr.msra.gmra.mrb[0].mxu0 %v593_v23  ;;  %1682 = vmatprep.mubr.f32.mxu1 %v3227_v6  ;;  %v2593_v6 = vpack.c.bf16 %v887_v57, %v886_v63  ;;  %v890_v57 = vld [vmem:[%s4565_s1 + $0x440] sm:$0xff]  ;;  %v892_v63 = vld [vmem:[%s4565_s1 + $0x450] sm:$0xff] }
  0xd1   : > { %2539 = vmatpush1.bf16.msra.mxu0 %v3430_v9  ;;  %1417 = vmatprep.mubr.f32.mxu0 %v626_v48  ;;  %v888_v9 = vld [vmem:[%s4565_s1 + $0x430] sm:$0xff]  ;;  %v889_v48 = vld [vmem:[%s4565_s1 + $0x438] sm:$0xff] }
  0xd2   : > { %2540 = vmatprep.subr.bf16.mxu0 %v4644_v38  ;;  %2588 = vmatpush3.bf16.msra.mxu1 %v3809_v4  ;;  %v3981_v4 = vld [vmem:[#allocation2 + $0x31] sm:$0xff]  ;;  %v2597_v23 = vpack.c.bf16 %v889_v48, %v888_v9  ;;  %v4037_v48 = vld [vmem:[#allocation2 + $0xd9] sm:$0xff] }
  0xd3   : > { %1683 = vmatmul.mubr.f32.gmra.mrb[66].mxu1 %v3669_v51  ;;  %2590 = vmatprep.subr.bf16.mxu1 %v2589_v8  ;;  %v3984_v51 = vld [vmem:[#allocation2 + $0x3a] sm:$0xff]  ;;  %v4031_v9 = vld [vmem:[#allocation2 + $0x51] sm:$0xff] }
  0xd4   : > { %1418 = vmatmul.mubr.f32.gmra.mrb[2].mxu0 %v594_v25  ;;  %1687 = vmatprep.mubr.f32.mxu1 %v3971_v53  ;;  %v4015_v25 = vld [vmem:[#allocation2 + $0x49] sm:$0xff] }
  0xd5   : > { %1422 = vmatprep.mubr.f32.mxu0 %v3966_v30  ;;  %2542 = vmatpush1.bf16.msra.mxu0 %v3464_v33  ;;  %v891_v33 = vld [vmem:[%s4565_s1 + $0x448] sm:$0xff] }
  0xd6   : > { %2543 = vmatprep.subr.bf16.mxu0 %v4644_v38  ;;  %2592 = vmatpush3.bf16.msra.mxu1 %v2589_v8  ;;  %v3999_v8 = vld [vmem:[#allocation2 + $0x39] sm:$0xff] }
  0xd7   : > { %1688 = vmatmul.mubr.f32.gmra.mrb[68].mxu1 %v3694_v52  ;;  %2594 = vmatprep.subr.bf16.mxu1 %v2593_v6  ;;  %v2601_v52 = vpack.c.bf16 %v891_v33, %v890_v57  ;;  %v4053_v57 = vld [vmem:[#allocation2 + $0xe1] sm:$0xff]  ;;  %v725_v33 = vld [vmem:[#allocation2 + $0x52] sm:$0xff] }
  0xd8   : > { %1423 = vmatmul.mubr.f32.gmra.mrb[4].mxu0 %v3981_v4  ;;  %1692 = vmatprep.mubr.f32.mxu1 %v3989_v43 }
  0xd9   : > { %1427 = vmatprep.mubr.f32.mxu0 %v3984_v51  ;;  %2545 = vmatpush1.bf16.msra.mxu0 %v3499_v1  ;;  %v893_v1 = vld [vmem:[%s4565_s1 + $0x458] sm:$0xff] }
  0xda   : > { %2546 = vmatprep.subr.bf16.mxu0 %v4644_v38  ;;  %2596 = vmatpush3.bf16.msra.mxu1 %v2593_v6  ;;  %v4021_v6 = vld [vmem:[#allocation2 + $0xc9] sm:$0xff] }
  0xdb   : > { %1693 = vmatmul.mubr.f32.gmra.mrb[70].mxu1 %v3718_v42  ;;  %2598 = vmatprep.subr.bf16.mxu1 %v2597_v23  ;;  %v2605_v42 = vpack.c.bf16 %v893_v1, %v892_v63 }
  0xdc   : > { %1428 = vmatmul.mubr.f32.gmra.mrb[6].mxu0 %v3999_v8  ;;  %1697 = vmatprep.mubr.f32.mxu1 %v4005_v26 }
  0xdd   : > { %1432 = vmatprep.mubr.f32.mxu0 %v3576_v58  ;;  %2548 = vmatpush1.bf16.msra.mxu0 %v3525_v2  ;;  %v894_v58 = vld [vmem:[%s4565_s1 + $0x460] sm:$0xff]  ;;  %v895_v2 = vld [vmem:[%s4565_s1 + $0x468] sm:$0xff] }
  0xde   : > { %2549 = vmatprep.subr.bf16.mxu0 %v4644_v38  ;;  %2600 = vmatpush3.bf16.msra.mxu1 %v2597_v23  ;;  %v4047_v23 = vld [vmem:[#allocation2 + $0x61] sm:$0xff] }
  0xdf   : > { %1698 = vmatmul.mubr.f32.gmra.mrb[72].mxu1 %v3743_v54  ;;  %2602 = vmatprep.subr.bf16.mxu1 %v2601_v52  ;;  %v2609_v54 = vpack.c.bf16 %v895_v2, %v894_v58  ;;  %v728_v58 = vld [vmem:[#allocation2 + $0x7a] sm:$0xff] }
  0xe0   : > { %1433 = vmatmul.mubr.f32.gmra.mrb[8].mxu0 %v4015_v25  ;;  %1702 = vmatprep.mubr.f32.mxu1 %v4021_v6 }
  0xe1   : > { %1437 = vmatprep.mubr.f32.mxu0 %v3598_v18  ;;  %2551 = vmatpush1.bf16.msra.mxu0 %v3545_v44  ;;  %v896_v18 = vld [vmem:[%s4565_s1 + $0x470] sm:$0xff]  ;;  %v897_v44 = vld [vmem:[%s4565_s1 + $0x478] sm:$0xff] }
  0xe2   : > { %2552 = vmatprep.subr.bf16.mxu0 %v4644_v38  ;;  %2604 = vmatpush3.bf16.msra.mxu1 %v2601_v52  ;;  %v4663_v52 = vld [vmem:[#allocation15_spill] sm:$0xff] }
  0xe3   : > { %1703 = vmatmul.mubr.f32.gmra.mrb[74].mxu1 %v3769_v15  ;;  %2606 = vmatprep.subr.bf16.mxu1 %v2605_v42  ;;  %v2613_v15 = vpack.c.bf16 %v897_v44, %v896_v18  ;;  %v4665_v18 = vld [vmem:[#allocation19_spill] sm:$0xff] }
  0xe4   : > { %1438 = vmatmul.mubr.f32.gmra.mrb[10].mxu0 %v4031_v9  ;;  %1707 = vmatprep.mubr.f32.mxu1 %v4037_v48  ;;  %v730_v44 = vld [vmem:[#allocation2 + $0x92] sm:$0xff] }
  0xe5   : > { %1442 = vmatprep.mubr.f32.mxu0 %v3620_v55  ;;  %2554 = vmatpush1.bf16.msra.mxu0 %v3565_v60  ;;  %v4057_v55 = vld [vmem:[#allocation2 + $0x69] sm:$0xff]  ;;  %v4067_v60 = vld [vmem:[#allocation2 + $0x79] sm:$0xff] }
  0xe6   : > { %2555 = vmatprep.subr.bf16.mxu0 %v4644_v38  ;;  %2608 = vmatpush3.bf16.msra.mxu1 %v2605_v42  ;;  %v727_v42 = vld [vmem:[#allocation2 + $0x6a] sm:$0xff] }
  0xe7   : > { %1708 = vmatmul.mubr.f32.gmra.mrb[76].mxu1 %v3801_v49  ;;  %2610 = vmatprep.subr.bf16.mxu1 %v2609_v54  ;;  %v4063_v49 = vld [vmem:[#allocation2 + $0xf1] sm:$0xff] }
  0xe8   : > { %1443 = vmatmul.mubr.f32.gmra.mrb[12].mxu0 %v4047_v23  ;;  %1712 = vmatprep.mubr.f32.mxu1 %v4053_v57 }
  0xe9   : > { %1447 = vmatprep.mubr.f32.mxu0 %v3642_v21  ;;  %2557 = vmatpush1.bf16.msra.mxu0 %v3586_v17  ;;  %v4073_v17 = vld [vmem:[#allocation2 + $0xf9] sm:$0xff]  ;;  %v4077_v21 = vld [vmem:[#allocation2 + $0x81] sm:$0xff] }
  0xea   : > { %2558 = vmatprep.subr.bf16.mxu0 %v4644_v38  ;;  %2612 = vmatpush3.bf16.msra.mxu1 %v2609_v54  ;;  %v2812_v54 = vld [vmem:[#allocation2 + $0x151] sm:$0xff] }
  0xeb   : > { %1713 = vmatmul.mubr.f32.gmra.mrb[78].mxu1 %v3817_v59  ;;  %2614 = vmatprep.subr.bf16.mxu1 %v2613_v15 }
  0xec   : > { %1448 = vmatmul.mubr.f32.gmra.mrb[14].mxu0 %v4057_v55  ;;  %1717 = vmatprep.mubr.f32.mxu1 %v4063_v49 }
  0xed   : > { %1452 = vmatprep.mubr.f32.mxu0 %v3667_v19  ;;  %2560 = vmatpush1.bf16.msra.mxu0 %v3608_v22  ;;  %v2803_v22 = vld [vmem:[#allocation2 + $0x109] sm:$0xff]  ;;  %v2804_v19 = vld [vmem:[#allocation2 + $0x91] sm:$0xff] }
  0xee   : > { %2561 = vmatprep.subr.bf16.mxu0 %v4644_v38  ;;  %2616 = vmatpush3.bf16.msra.mxu1 %v2613_v15 }
  0xef   : > { %1718 = vmatmul.mubr.f32.gmra.mrb[80].mxu1 %v3829_v0 }
  0xf0   : > { %1453 = vmatmul.mubr.f32.gmra.mrb[16].mxu0 %v4067_v60  ;;  %1722 = vmatprep.mubr.f32.mxu1 %v4073_v17 }
  0xf1   : > { %1457 = vmatprep.mubr.f32.mxu0 %v3692_v16  ;;  %2563 = vmatpush1.bf16.msra.mxu0 %v3630_v28  ;;  %v2805_v16 = vld [vmem:[#allocation2 + $0x111] sm:$0xff]  ;;  %v2806_v28 = vld [vmem:[#allocation2 + $0x99] sm:$0xff] }
  0xf2   : > { %2564 = vmatprep.subr.bf16.mxu0 %v4644_v38 }
  0xf3   : > { %1723 = vmatmul.mubr.f32.gmra.mrb[82].mxu1 %v3838_v35 }
  0xf4   : > { %1458 = vmatmul.mubr.f32.gmra.mrb[18].mxu0 %v4077_v21  ;;  %1727 = vmatprep.mubr.f32.mxu1 %v2803_v22 }
  0xf5   : > { %1462 = vmatprep.mubr.f32.mxu0 %v3716_v11  ;;  %2566 = vmatpush1.bf16.msra.mxu0 %v3654_v36  ;;  %v2807_v11 = vld [vmem:[#allocation2 + $0x121] sm:$0xff] }
  0xf6   : > { %2567 = vmatprep.subr.bf16.mxu0 %v4644_v38 }
  0xf7   : > { %1728 = vmatmul.mubr.f32.gmra.mrb[84].mxu1 %v3847_v62 }
  0xf8   : > { %1463 = vmatmul.mubr.f32.gmra.mrb[20].mxu0 %v2804_v19  ;;  %1732 = vmatprep.mubr.f32.mxu1 %v2805_v16  ;;  %v732_v19 = vld [vmem:[#allocation2 + $0xaa] sm:$0xff] }
  0xf9   : > { %1467 = vmatprep.mubr.f32.mxu0 %v3741_v56  ;;  %2569 = vmatpush1.bf16.msra.mxu0 %v3679_v40  ;;  %v4654_v40 = vld [vmem:[#allocation9_spill] sm:$0xff]  ;;  %v4658_v56 = vld [vmem:[#allocation10_spill] sm:$0xff] }
  0xfa   : > { %2570 = vmatprep.subr.bf16.mxu0 %v4644_v38 }
  0xfb   : > { %1733 = vmatmul.mubr.f32.gmra.mrb[86].mxu1 %v3856_v27  ;;  %v2809_v27 = vld [vmem:[#allocation2 + $0x129] sm:$0xff] }
  0xfc   : > { %1468 = vmatmul.mubr.f32.gmra.mrb[22].mxu0 %v2806_v28  ;;  %1737 = vmatprep.mubr.f32.mxu1 %v2807_v11 }
  0xfd   : > { %1472 = vmatprep.mubr.f32.mxu0 %v3767_v39  ;;  %2572 = vmatpush1.bf16.msra.mxu0 %v3704_v47  ;;  %v4656_v47 = vld [vmem:[#allocation5_spill] sm:$0xff] }
  0xfe   : > { %2573 = vmatprep.subr.bf16.mxu0 %v4644_v38 }
  0xff   : > { %1738 = vmatmul.mubr.f32.gmra.mrb[88].mxu1 %v3865_v3  ;;  %v4645_v3 = vld [vmem:[#allocation6_spill] sm:$0xff] }
 0x100   : > { %1473 = vmatmul.mubr.f32.gmra.mrb[24].mxu0 %v3971_v53  ;;  %1742 = vmatprep.mubr.f32.mxu1 %v3399_v10  ;;  %v4647_v10 = vld [vmem:[#allocation7_spill] sm:$0xff] }
 0x101   : > { %1477 = vmatprep.mubr.f32.mxu0 %v3799_v61  ;;  %2575 = vmatpush1.bf16.msra.mxu0 %v3728_v46  ;;  %v4657_v46 = vmax.f32 %v4656_v47, 0.0 }
 0x102   : > { %2576 = vmatprep.subr.bf16.mxu0 %v4644_v38 }
 0x103   : > { %1743 = vmatmul.mubr.f32.gmra.mrb[90].mxu1 %v3874_v29  ;;  %v4646_v29 = vld [vmem:[#allocation14_spill] sm:$0xff] }
 0x104   : > { %1478 = vmatmul.mubr.f32.gmra.mrb[26].mxu0 %v3989_v43  ;;  %1747 = vmatprep.mubr.f32.mxu1 %v3408_v32  ;;  %v4648_v32 = vld [vmem:[#allocation16_spill] sm:$0xff] }
 0x105   : > { %1482 = vmatprep.mubr.f32.mxu0 %v3815_v45  ;;  %2578 = vmatpush1.bf16.msra.mxu0 %v3753_v50  ;;  %v720_v50 = vld [vmem:[#allocation2 + $0x199] sm:$0xff]  ;;  %v721_v45 = vld [vmem:[#allocation2 + $0x1a1] sm:$0xff] }
 0x106   : > { %2579 = vmatprep.subr.bf16.mxu0 %v4644_v38  ;;  %v2810_v43 = vld [vmem:[#allocation2 + $0x139] sm:$0xff] }
 0x107   : > { %1748 = vmatmul.mubr.f32.gmra.mrb[92].mxu1 %v3883_v34  ;;  %v4651_v34 = vld [vmem:[#allocation18_spill] sm:$0xff] }
 0x108   : > { %1483 = vmatmul.mubr.f32.gmra.mrb[28].mxu0 %v4005_v26  ;;  %1752 = vmatprep.mubr.f32.mxu1 %v3418_v7  ;;  %v4649_v7 = vld [vmem:[#allocation4_spill] sm:$0xff]  ;;  %v726_v26 = vld [vmem:[#allocation2 + $0x62] sm:$0xff] }
 0x109   : > { %1487 = vmatprep.mubr.f32.mxu0 %v3827_v37  ;;  %2581 = vmatpush1.bf16.msra.mxu0 %v3779_v12  ;;  %v4659_v12 = vld [vmem:[#allocation22_spill] sm:$0xff]  ;;  %v2808_v37 = vld [vmem:[#allocation2] sm:$0xff] }
 0x10a   : > { %2582 = vmatprep.subr.bf16.mxu0 %v4644_v38  ;;  %v724_v38 = vld [vmem:[#allocation2 + $0x4a] sm:$0xff] }
 0x10b   : > { %1753 = vmatmul.mubr.f32.gmra.mrb[94].mxu1 %v3892_v31  ;;  %v4662_v31 = vld [vmem:[#allocation13_spill] sm:$0xff] }
 0x10c   : > { %1488 = vmatmul.mubr.f32.gmra.mrb[30].mxu0 %v4021_v6  ;;  %1757 = vmatprep.mubr.f32.mxu1 %v3432_v14  ;;  %v4650_v14 = vld [vmem:[#allocation8_spill] sm:$0xff]  ;;  %v4664_v6 = vld [vmem:[#allocation17_spill] sm:$0xff] }
 0x10d   : > { %1492 = vmatprep.mubr.f32.mxu0 %v3836_v24  ;;  %2584 = vmatpush1.bf16.msra.mxu0 %v3805_v13  ;;  %v4660_v13 = vld [vmem:[#allocation11_spill] sm:$0xff]  ;;  %v4661_v24 = vld [vmem:[#allocation12_spill] sm:$0xff] }
 0x10f   : > { %1758 = vmatmul.mubr.f32.gmra.mrb[96].mxu1 %v3900_v5 }
 0x110   : > { %1493 = vmatmul.mubr.f32.gmra.mrb[32].mxu0 %v4037_v48  ;;  %1762 = vmatprep.mubr.f32.mxu1 %v3446_v20  ;;  %v4652_v20 = vld [vmem:[#allocation3_spill] sm:$0xff]  ;;  %v729_v48 = vld [vmem:[#allocation2 + $0x82] sm:$0xff] }
 0x111   : > { %1497 = vmatprep.mubr.f32.mxu0 %v4645_v3  ;;  %v4653_v36 = vmax.f32 %v4652_v20, 0.0  ;;  %v733_v3 = vld [vmem:[#allocation2 + $0xb2] sm:$0xff]  ;;  %v735_v20 = vld [vmem:[#allocation2 + $0xca] sm:$0xff] }
 0x113   : > { %1763 = vmatmul.mubr.f32.gmra.mrb[98].mxu1 %v4646_v29  ;;  %v4667_v29 = vld [vmem:[#allocation23_spill] sm:$0xff] }
 0x114   : > { %1498 = vmatmul.mubr.f32.gmra.mrb[34].mxu0 %v4053_v57  ;;  %1767 = vmatprep.mubr.f32.mxu1 %v3454_v41  ;;  %v4655_v41 = vld [vmem:[#allocation20_spill] sm:$0xff] }
 0x115   : > { %1502 = vmatprep.mubr.f32.mxu0 %v4647_v10  ;;  %v734_v10 = vld [vmem:[#allocation2 + $0xc2] sm:$0xff] }
 0x117   : > { %1768 = vmatmul.mubr.f32.gmra.mrb[100].mxu1 %v4648_v32  ;;  %v4165_v32 = vld [vmem:[#allocation2 + $0x182] sm:$0xff] }
 0x118   : > { %1503 = vmatmul.mubr.f32.gmra.mrb[36].mxu0 %v4063_v49  ;;  %1772 = vmatprep.mubr.f32.mxu1 %v4649_v7  ;;  %v2813_v49 = vld [vmem:[#allocation2 + $0x159] sm:$0xff] }
 0x119   : > { %1507 = vmatprep.mubr.f32.mxu0 %v4650_v14 }
 0x11b   : > { %1773 = vmatmul.mubr.f32.gmra.mrb[102].mxu1 %v4651_v34  ;;  %v2815_v34 = vld [vmem:[#allocation2 + $0x171] sm:$0xff] }
 0x11c   : > { %1508 = vmatmul.mubr.f32.gmra.mrb[38].mxu0 %v4073_v17  ;;  %1777 = vmatprep.mubr.f32.mxu1 %v4653_v36  ;;  %v731_v17 = vld [vmem:[#allocation2 + $0x9a] sm:$0xff] }
 0x11d   : > { %1512 = vmatprep.mubr.f32.mxu0 %v4654_v40  ;;  %v736_v36 = vld [vmem:[#allocation2 + $0xda] sm:$0xff]  ;;  %v4170_v40 = vld [vmem:[#allocation2 + $0x18a] sm:$0xff] }
 0x11f   : > { %1778 = vmatmul.mubr.f32.gmra.mrb[104].mxu1 %v4655_v41 }
 0x120   : > { %1513 = vmatmul.mubr.f32.gmra.mrb[40].mxu0 %v2803_v22  ;;  %1782 = vmatprep.mubr.f32.mxu1 %v4657_v46  ;;  %v4666_v22 = vld [vmem:[#allocation21_spill] sm:$0xff] }
 0x121   : > { %1517 = vmatprep.mubr.f32.mxu0 %v4658_v56  ;;  %v2816_v46 = vld [vmem:[#allocation2 + $0x181] sm:$0xff] }
 0x122   : > { %v4138_v39 = vpop.f32.mrb[0].mxu1  ;;  %v737_v56 = vld [vmem:[#allocation2 + $0xe2] sm:$0xff] }
 0x123   : > { %1783 = vmatmul.mubr.f32.gmra.mrb[106].mxu1 %v4659_v12  ;;  %v966_v61 = vpop.f32.mrb[1].mxu1 }
 0x124   : > { %1518 = vmatmul.mubr.f32.gmra.mrb[42].mxu0 %v2805_v16  ;;  %1787 = vmatprep.mubr.f32.mxu1 %v720_v50  ;;  %v738_v50 = vld [vmem:[#allocation2 + $0xf2] sm:$0xff] }
 0x125   : > { %1522 = vmatprep.mubr.f32.mxu0 %v4660_v13 }
 0x126   : > { %v4142_v59 = vpop.f32.mrb[2].mxu1 }
 0x127   : > { %1788 = vmatmul.mubr.f32.gmra.mrb[108].mxu1 %v2808_v37  ;;  %v971_v0 = vpop.f32.mrb[3].mxu1 }
 0x128   : > { %1523 = vmatmul.mubr.f32.gmra.mrb[44].mxu0 %v2807_v11  ;;  %1792 = vmatprep.mubr.f32.mxu1 %v721_v45  ;;  %v2814_v11 = vld [vmem:[#allocation2 + $0x169] sm:$0xff] }
 0x129   : > { %1527 = vmatprep.mubr.f32.mxu0 %v4661_v24  ;;  %v2817_v45 = vld [vmem:[#allocation2 + $0x189] sm:$0xff] }
 0x12a   : > { %v4145_v35 = vpop.f32.mrb[4].mxu1  ;;  %v658_v0 = vld [vmem:[#allocation2 + $0x30] sm:$0xff] }
 0x12b   : > { %1793 = vmatmul.mubr.f32.gmra.mrb[110].mxu1 %v2808_v37  ;;  %v976_v62 = vpop.f32.mrb[5].mxu1  ;;  %v739_v37 = vld [vmem:[#allocation2 + $0xfa] sm:$0xff] }
 0x12c   : > { %1528 = vmatmul.mubr.f32.gmra.mrb[46].mxu0 %v2809_v27  ;;  %2345 = vmatprep.mubr.f32.mxu1 %v3966_v30  ;;  %v2811_v30 = vld [vmem:[#allocation2 + $0x141] sm:$0xff]  ;;  %v740_v62 = vld [vmem:[#allocation2 + $0x10a] sm:$0xff] }
 0x12d   : > { %1532 = vmatprep.mubr.f32.mxu0 %v4662_v31 }
 0x12e   : > { %v4149_v5 = vpop.f32.mrb[6].mxu1 }
 0x12f   : > { %2346 = vmatmul.mubr.f32.vlgmr.msra.gmra.mrb[112].mxu1 %v3984_v51  ;;  %v981_v53 = vpop.f32.mrb[7].mxu1 }
 0x130   : > { %1533 = vmatmul.mubr.f32.gmra.mrb[48].mxu0 %v2810_v43  ;;  %2348 = vmatprep.mubr.f32.mxu1 %v724_v38  ;;  %v741_v53 = vld [vmem:[#allocation2 + $0x112] sm:$0xff] }
 0x131   : > { %1537 = vmatprep.mubr.f32.mxu0 %v4663_v52  ;;  %v659_v43 = vld [vmem:[#allocation2 + $0x38] sm:$0xff] }
 0x132   : > { %v4153_v63 = vpop.f32.mrb[8].mxu1 }
 0x133   : > { %2349 = vmatmul.mubr.f32.gmra.mrb[114].mxu1 %v725_v33  ;;  %v986_v1 = vpop.f32.mrb[9].mxu1 }
 0x134   : > { %1538 = vmatmul.mubr.f32.gmra.mrb[50].mxu0 %v2811_v30  ;;  %2351 = vmatprep.mubr.f32.mxu1 %v726_v26 }
 0x135   : > { %1542 = vmatprep.mubr.f32.mxu0 %v4664_v6 }
 0x136   : > { %v4156_v51 = vpop.f32.mrb[10].mxu1 }
 0x137   : > { %2352 = vmatmul.mubr.f32.gmra.mrb[116].mxu1 %v727_v42  ;;  %v991_v2 = vpop.f32.mrb[11].mxu1 }
 0x138   : > { %1543 = vmatmul.mubr.f32.gmra.mrb[52].mxu0 %v2812_v54  ;;  %2354 = vmatprep.mubr.f32.mxu1 %v728_v58 }
 0x139   : > { %1547 = vmatprep.mubr.f32.mxu0 %v4665_v18 }
 0x13a   : > { %v4159_v15 = vpop.f32.mrb[12].mxu1 }
 0x13b   : > { %2355 = vmatmul.mubr.f32.gmra.mrb[118].mxu1 %v729_v48  ;;  %v996_v57 = vpop.f32.mrb[13].mxu1  ;;  %v665_v48 = vld [vmem:[#allocation2 + $0x80] sm:$0xff] }
 0x13c   : > { %1548 = vmatmul.mubr.f32.gmra.mrb[54].mxu0 %v2813_v49  ;;  %2357 = vmatprep.mubr.f32.mxu1 %v730_v44 }
 0x13d   : > { %1552 = vmatprep.mubr.f32.mxu0 %v4666_v22 }
 0x13e   : > { %v4162_v16 = vpop.f32.mrb[14].mxu1 }
 0x13f   : > { %2358 = vmatmul.mubr.f32.gmra.mrb[120].mxu1 %v731_v17  ;;  %v1001_v28 = vpop.f32.mrb[15].mxu1 }
 0x140   : > { %1553 = vmatmul.mubr.f32.gmra.mrb[56].mxu0 %v2814_v11  ;;  %2360 = vmatprep.mubr.f32.mxu1 %v732_v19 }
 0x141   : > { %1557 = vmatprep.mubr.f32.mxu0 %v4667_v29 }
 0x142   : > { %v4167_v7 = vpop.f32.mrb[16].mxu1 }
 0x143   : > { %2361 = vmatmul.mubr.f32.gmra.mrb[122].mxu1 %v733_v3  ;;  %v1006_v14 = vpop.f32.mrb[17].mxu1 }
 0x144   : > { %1558 = vmatmul.mubr.f32.gmra.mrb[58].mxu0 %v2815_v34  ;;  %2363 = vmatprep.mubr.f32.mxu1 %v734_v10 }
 0x145   : > { %1562 = vmatprep.mubr.f32.mxu0 %v4165_v32 }
 0x146   : > { %v4172_v41 = vpop.f32.mrb[18].mxu1 }
 0x147   : > { %2364 = vmatmul.mubr.f32.gmra.mrb[124].mxu1 %v735_v20  ;;  %v1011_v47 = vpop.f32.mrb[19].mxu1 }
 0x148   : > { %1563 = vmatmul.mubr.f32.gmra.mrb[60].mxu0 %v2816_v46  ;;  %2366 = vmatprep.mubr.f32.mxu1 %v736_v36 }
 0x149   : > { %1567 = vmatprep.mubr.f32.mxu0 %v4170_v40 }
 0x14a   : > { %v4175_v12 = vpop.f32.mrb[20].mxu1 }
 0x14b   : > { %2367 = vmatmul.mubr.f32.gmra.mrb[126].mxu1 %v737_v56  ;;  %v1016_v61 = vpop.f32.mrb[21].mxu1 }
 0x14c   : > { %1568 = vmatmul.mubr.f32.gmra.mrb[62].mxu0 %v2817_v45  ;;  %2369 = vmatprep.mubr.f32.mxu1 %v738_v50 }
 0x14d   : > { %1637 = vmatprep.mubr.f32.mxu0 %v3981_v4  ;;  %v660_v4 = vld [vmem:[#allocation2 + $0x48] sm:$0xff] }
 0x14e   : > { %v4178_v27 = vpop.f32.mrb[22].mxu1 }
 0x14f   : > { %2370 = vmatmul.mubr.f32.gmra.mrb[128].mxu1 %v739_v37  ;;  %v1021_v38 = vpop.f32.mrb[23].mxu1 }
 0x150   : > { %1638 = vmatmul.mubr.f32.vlgmr.msra.gmra.mrb[0].mxu0 %v658_v0  ;;  %2372 = vmatprep.mubr.f32.mxu1 %v740_v62 }
 0x151   : > { %1642 = vmatprep.mubr.f32.mxu0 %v3999_v8  ;;  %v661_v8 = vld [vmem:[#allocation2 + $0x50] sm:$0xff] }
 0x152   : > { %v4181_v33 = vpop.f32.mrb[24].mxu1 }
 0x153   : > { %2373 = vmatmul.mubr.f32.gmra.mrb[130].mxu1 %v741_v53  ;;  %v1026_v26 = vpop.f32.mrb[25].mxu1 }
 0x154   : > { %1643 = vmatmul.mubr.f32.gmra.mrb[2].mxu0 %v659_v43  ;;  %2375 = vmatprep.mubr.f32.mxu1 %v4660_v13 }
 0x155   : > { %1647 = vmatprep.mubr.f32.mxu0 %v4015_v25  ;;  %v662_v25 = vld [vmem:[#allocation2 + $0x60] sm:$0xff] }
 0x156   : > { %v4185_v1 = vpop.f32.mrb[26].mxu1 }
 0x157   : > { %2376 = vmatmul.mubr.f32.gmra.mrb[132].mxu1 %v4661_v24  ;;  %v1031_v30 = vpop.f32.mrb[27].mxu1 }
 0x158   : > { %1648 = vmatmul.mubr.f32.gmra.mrb[4].mxu0 %v660_v4  ;;  %2378 = vmatprep.mubr.f32.mxu1 %v4662_v31 }
 0x159   : > { %1652 = vmatprep.mubr.f32.mxu0 %v4031_v9  ;;  %v663_v9 = vld [vmem:[#allocation2 + $0x68] sm:$0xff] }
 0x15a   : > { %v4190_v42 = vpop.f32.mrb[28].mxu1 }
 0x15b   : > { %2379 = vmatmul.mubr.f32.gmra.mrb[134].mxu1 %v4663_v52  ;;  %v1036_v58 = vpop.f32.mrb[29].mxu1 }
 0x15c   : > { %1653 = vmatmul.mubr.f32.gmra.mrb[6].mxu0 %v661_v8  ;;  %2381 = vmatprep.mubr.f32.mxu1 %v4664_v6  ;;  %v752_v6 = vld [vmem:[#allocation2 + $0x19a] sm:$0xff] }
 0x15d   : > { %1657 = vmatprep.mubr.f32.mxu0 %v4047_v23  ;;  %v664_v23 = vld [vmem:[#allocation2 + $0x78] sm:$0xff] }
 0x15e   : > { %v4195_v13 = vpop.f32.mrb[30].mxu1 }
 0x15f   : > { %2382 = vmatmul.mubr.f32.gmra.mrb[136].mxu1 %v4665_v18  ;;  %v1041_v24 = vpop.f32.mrb[31].mxu1 }
 0x160   : > { %1658 = vmatmul.mubr.f32.gmra.mrb[8].mxu0 %v662_v25  ;;  %2384 = vmatprep.mubr.f32.mxu1 %v4666_v22 }
 0x161   : > { %1662 = vmatprep.mubr.f32.mxu0 %v4057_v55  ;;  %v753_v55 = vld [vmem:[#allocation2 + $0x1a2] sm:$0xff] }
 0x162   : > { %v4200_v31 = vpop.f32.mrb[32].mxu1 }
 0x163   : > { %2385 = vmatmul.mubr.f32.gmra.mrb[138].mxu1 %v4667_v29  ;;  %v1046_v52 = vpop.f32.mrb[33].mxu1 }
 0x164   : > { %1663 = vmatmul.mubr.f32.gmra.mrb[10].mxu0 %v663_v9  ;;  %2387 = vmatprep.mubr.f32.mxu1 %v4165_v32 }
 0x165   : > { %1667 = vmatprep.mubr.f32.mxu0 %v4067_v60 }
 0x166   : > { %v4205_v2 = vpop.f32.mrb[34].mxu1 }
 0x167   : > { %2388 = vmatmul.mubr.f32.gmra.mrb[140].mxu1 %v4170_v40  ;;  %v1051_v54 = vpop.f32.mrb[35].mxu1 }
 0x168   : > { %1668 = vmatmul.mubr.f32.gmra.mrb[12].mxu0 %v664_v23  ;;  %2390 = vmatprep.mubr.f32.mxu1 %v752_v6 }
 0x169   : > { %1672 = vmatprep.mubr.f32.mxu0 %v4077_v21 }
 0x16a   : > { %v4209_v18 = vpop.f32.mrb[36].mxu1 }
 0x16b   : > { %2391 = vmatmul.mubr.f32.gmra.mrb[142].mxu1 %v753_v55  ;;  %v1056_v44 = vpop.f32.mrb[37].mxu1 }
 0x16c   : > { %1673 = vmatmul.mubr.f32.gmra.mrb[14].mxu0 %v665_v48 }
 0x16e   : > { %v4211_v57 = vpop.f32.mrb[38].mxu1 }
 0x16f   : > { %v1061_v60 = vpop.f32.mrb[39].mxu1 }
 0x172   : > { %v4213_v49 = vpop.f32.mrb[40].mxu1 }
 0x173   : > { %v1066_v17 = vpop.f32.mrb[41].mxu1 }
 0x176   : > { %v4215_v22 = vpop.f32.mrb[42].mxu1 }
 0x177   : > { %v1071_v19 = vpop.f32.mrb[43].mxu1 }
 0x17a   : > { %v4217_v28 = vpop.f32.mrb[44].mxu1 }
 0x17b   : > { %v1076_v11 = vpop.f32.mrb[45].mxu1 }
 0x17e   : > { %v4219_v3 = vpop.f32.mrb[46].mxu1 }
 0x17f   : > { %v1081_v21 = vpop.f32.mrb[47].mxu1 }
 0x182   : > { %v4221_v29 = vpop.f32.mrb[48].mxu1 }
 0x183   : > { %v1086_v10 = vpop.f32.mrb[49].mxu1 }
 0x186   : > { %v4223_v32 = vpop.f32.mrb[50].mxu1 }
 0x187   : > { %v1091_v14 = vpop.f32.mrb[51].mxu1 }
 0x18a   : > { %v4225_v34 = vpop.f32.mrb[52].mxu1 }
 0x18b   : > { %v1096_v20 = vpop.f32.mrb[53].mxu1 }
 0x18e   : > { %v4227_v36 = vpop.f32.mrb[54].mxu1 }
 0x18f   : > { %v1101_v40 = vpop.f32.mrb[55].mxu1 }
 0x192   : > { %v4229_v47 = vpop.f32.mrb[56].mxu1 }
 0x193   : > { %v1106_v46 = vpop.f32.mrb[57].mxu1 }
 0x196   : > { %v4231_v56 = vpop.f32.mrb[58].mxu1 }
 0x197   : > { %v1111_v50 = vpop.f32.mrb[59].mxu1 }
 0x19a   : > { %v4233_v61 = vpop.f32.mrb[60].mxu1 }
 0x19b   : > { %v1116_v45 = vpop.f32.mrb[61].mxu1 }
 0x19e   : > { %v4235_v37 = vpop.f32.mrb[62].mxu1 }
 0x19f   : > { %v1121_v0 = vpop.f32.mrb[63].mxu1 }
 0x1a2   : > { %v1679_v62 = vpop.f32.mrb[64].mxu1 }
 0x1a3   : > { %v1681_v38 = vpop.f32.mrb[65].mxu1 }
 0x1a6   : > { %v1684_v53 = vpop.f32.mrb[66].mxu1 }
 0x1a7   : > { %v1686_v43 = vpop.f32.mrb[67].mxu1 }
 0x1aa   : > { %v1689_v26 = vpop.f32.mrb[68].mxu1 }
 0x1ab   : > { %v1691_v4 = vpop.f32.mrb[69].mxu1 }
 0x1ae   : > { %v1694_v30 = vpop.f32.mrb[70].mxu1 }
 0x1af   : > { %v1696_v8 = vpop.f32.mrb[71].mxu1 }
 0x1b2   : > { %v1699_v58 = vpop.f32.mrb[72].mxu1 }
 0x1b3   : > { %v1701_v25 = vpop.f32.mrb[73].mxu1 }
 0x1b6   : > { %v1704_v24 = vpop.f32.mrb[74].mxu1 }
 0x1b7   : > { %v1706_v9 = vpop.f32.mrb[75].mxu1 }
 0x1ba   : > { %v1709_v52 = vpop.f32.mrb[76].mxu1 }
 0x1bb   : > { %v1711_v23 = vpop.f32.mrb[77].mxu1 }
 0x1be   : > { %v1714_v6 = vpop.f32.mrb[78].mxu1 }
 0x1bf   : > { %v1716_v54 = vpop.f32.mrb[79].mxu1 }
 0x1c2   : > { %v1719_v55 = vpop.f32.mrb[80].mxu1 }
 0x1c3   : > { %v1454_v48 = vpop.f32.mrb[16].mxu0  ;;  %v1721_v44 = vpop.f32.mrb[81].mxu1 }
 0x1c4   : > { %v2657_v60 = vadd.f32 %v1454_v48, %v4167_v7  ;;  %v1456_v17 = vpop.f32.mrb[17].mxu0 }
 0x1c6   : > { %v4238_v19 = vadd.f32 %v2657_v60, %v1679_v62  ;;  %v1724_v11 = vpop.f32.mrb[82].mxu1 }
 0x1c7   : > { %v1459_v21 = vpop.f32.mrb[18].mxu0  ;;  %v1726_v10 = vpop.f32.mrb[83].mxu1 }
 0x1c8   : > { %v2659_v14 = vadd.f32 %v1459_v21, %v4172_v41  ;;  %v1461_v20 = vpop.f32.mrb[19].mxu0 }
 0x1ca   : > { %v4241_v40 = vadd.f32 %v2659_v14, %v1684_v53  ;;  %v1729_v46 = vpop.f32.mrb[84].mxu1 }
 0x1cb   : > { %v1464_v50 = vpop.f32.mrb[20].mxu0  ;;  %v1731_v45 = vpop.f32.mrb[85].mxu1 }
 0x1cc   : > { %v2661_v0 = vadd.f32 %v1464_v50, %v4175_v12  ;;  %v1466_v38 = vpop.f32.mrb[21].mxu0 }
 0x1ce   : > { %v4244_v43 = vadd.f32 %v2661_v0, %v1689_v26  ;;  %v1734_v7 = vpop.f32.mrb[86].mxu1 }
 0x1cf   : > { %v1469_v4 = vpop.f32.mrb[22].mxu0  ;;  %v1736_v62 = vpop.f32.mrb[87].mxu1 }
 0x1d0   : > { %v2663_v8 = vadd.f32 %v1469_v4, %v4178_v27  ;;  %v1471_v25 = vpop.f32.mrb[23].mxu0 }
 0x1d2   : > { %v4247_v9 = vadd.f32 %v2663_v8, %v1694_v30  ;;  %v1739_v41 = vpop.f32.mrb[88].mxu1 }
 0x1d3   : > { %v1474_v23 = vpop.f32.mrb[24].mxu0  ;;  %v1741_v53 = vpop.f32.mrb[89].mxu1 }
 0x1d4   : > { %v2665_v54 = vadd.f32 %v1474_v23, %v4181_v33  ;;  %v1476_v48 = vpop.f32.mrb[25].mxu0 }
 0x1d6   : > { %v4250_v44 = vadd.f32 %v2665_v54, %v1699_v58  ;;  %v1744_v12 = vpop.f32.mrb[90].mxu1 }
 0x1d7   : > { %v1479_v60 = vpop.f32.mrb[26].mxu0  ;;  %v1746_v26 = vpop.f32.mrb[91].mxu1 }
 0x1d8   : > { %v2667_v17 = vadd.f32 %v1479_v60, %v4185_v1  ;;  %v1481_v21 = vpop.f32.mrb[27].mxu0 }
 0x1da   : > { %v4253_v10 = vadd.f32 %v2667_v17, %v1704_v24  ;;  %v1749_v27 = vpop.f32.mrb[92].mxu1 }
 0x1db   : > { %v1484_v14 = vpop.f32.mrb[28].mxu0  ;;  %v1751_v30 = vpop.f32.mrb[93].mxu1 }
 0x1dc   : > { %v2669_v20 = vadd.f32 %v1484_v14, %v4190_v42  ;;  %v1486_v50 = vpop.f32.mrb[29].mxu0 }
 0x1de   : > { %v4256_v45 = vadd.f32 %v2669_v20, %v1709_v52  ;;  %v1754_v33 = vpop.f32.mrb[94].mxu1 }
 0x1df   : > { %v1489_v0 = vpop.f32.mrb[30].mxu0  ;;  %v1756_v58 = vpop.f32.mrb[95].mxu1 }
 0x1e0   : > { %v2671_v38 = vadd.f32 %v1489_v0, %v4195_v13  ;;  %v1491_v4 = vpop.f32.mrb[31].mxu0 }
 0x1e2   : > { %v4259_v62 = vadd.f32 %v2671_v38, %v1714_v6  ;;  %v1759_v1 = vpop.f32.mrb[96].mxu1 }
 0x1e3   : > { %v1494_v8 = vpop.f32.mrb[32].mxu0  ;;  %v1761_v24 = vpop.f32.mrb[97].mxu1 }
 0x1e4   : > { %v2673_v25 = vadd.f32 %v1494_v8, %v4200_v31  ;;  %v1496_v23 = vpop.f32.mrb[33].mxu0 }
 0x1e6   : > { %v4262_v53 = vadd.f32 %v2673_v25, %v1719_v55  ;;  %v1764_v42 = vpop.f32.mrb[98].mxu1 }
 0x1e7   : > { %v1499_v54 = vpop.f32.mrb[34].mxu0  ;;  %v1766_v52 = vpop.f32.mrb[99].mxu1 }
 0x1e8   : > { %v2675_v48 = vadd.f32 %v1499_v54, %v4205_v2  ;;  %v1501_v60 = vpop.f32.mrb[35].mxu0 }
 0x1ea   : > { %v4265_v26 = vadd.f32 %v2675_v48, %v1724_v11  ;;  %v1769_v13 = vpop.f32.mrb[100].mxu1 }
 0x1eb   : > { %v1504_v17 = vpop.f32.mrb[36].mxu0  ;;  %v1771_v6 = vpop.f32.mrb[101].mxu1 }
 0x1ec   : > { %v2677_v21 = vadd.f32 %v1504_v17, %v4209_v18  ;;  %v1506_v14 = vpop.f32.mrb[37].mxu0 }
 0x1ee   : > { %v4268_v30 = vadd.f32 %v2677_v21, %v1729_v46  ;;  %v1774_v31 = vpop.f32.mrb[102].mxu1 }
 0x1ef   : > { %v1509_v20 = vpop.f32.mrb[38].mxu0  ;;  %v1776_v55 = vpop.f32.mrb[103].mxu1 }
 0x1f0   : > { %v2679_v50 = vadd.f32 %v1509_v20, %v4211_v57  ;;  %v1511_v0 = vpop.f32.mrb[39].mxu0 }
 0x1f2   : > { %v4271_v58 = vadd.f32 %v2679_v50, %v1734_v7  ;;  %v1779_v2 = vpop.f32.mrb[104].mxu1 }
 0x1f3   : > { %v1514_v38 = vpop.f32.mrb[40].mxu0  ;;  %v1781_v11 = vpop.f32.mrb[105].mxu1 }
 0x1f4   : > { %v2681_v4 = vadd.f32 %v1514_v38, %v4213_v49  ;;  %v1516_v8 = vpop.f32.mrb[41].mxu0 }
 0x1f6   : > { %v4274_v24 = vadd.f32 %v2681_v4, %v1739_v41  ;;  %v4276_v18 = vpop.f32.mrb[106].mxu1 }
 0x1f7   : > { %v1519_v46 = vpop.f32.mrb[42].mxu0  ;;  %v1786_v25 = vpop.f32.mrb[107].mxu1 }
 0x1f8   : > { %v2683_v23 = vadd.f32 %v1519_v46, %v4215_v22  ;;  %v1521_v54 = vpop.f32.mrb[43].mxu0 }
 0x1fa   : > { %v4279_v52 = vpop.f32.mrb[108].mxu1  ;;  %v4281_v57 = vadd.f32 %v2683_v23, %v1744_v12 }
 0x1fb   : > { %v1524_v7 = vpop.f32.mrb[44].mxu0  ;;  %v1791_v48 = vpop.f32.mrb[109].mxu1 }
 0x1fc   : > { %v2685_v60 = vadd.f32 %v1524_v7, %v4217_v28  ;;  %v1526_v17 = vpop.f32.mrb[45].mxu0 }
 0x1fe   : > { %v4284_v49 = vpop.f32.mrb[110].mxu1  ;;  %v4286_v41 = vadd.f32 %v2685_v60, %v1749_v27 }
 0x1ff   : > { %v1529_v6 = vpop.f32.mrb[46].mxu0  ;;  %v1796_v21 = vpop.f32.mrb[111].mxu1 }
 0x200   : > { %v2687_v14 = vadd.f32 %v1529_v6, %v4219_v3  ;;  %v1531_v20 = vpop.f32.mrb[47].mxu0 }
 0x202   : > { %v4289_v22 = vpop.f32.mrb[112].mxu1  ;;  %v4291_v55 = vadd.f32 %v2687_v14, %v1754_v33 }
 0x203   : > { %v1534_v12 = vpop.f32.mrb[48].mxu0  ;;  %v4293_v50 = vpop.f32.mrb[113].mxu1 }
 0x204   : > { %v2689_v0 = vadd.f32 %v1534_v12, %v4221_v29  ;;  %v1536_v28 = vpop.f32.mrb[49].mxu0 }
 0x206   : > { %v4296_v38 = vpop.f32.mrb[114].mxu1  ;;  %v4298_v11 = vadd.f32 %v2689_v0, %v1759_v1 }
 0x207   : > { %v1539_v27 = vpop.f32.mrb[50].mxu0  ;;  %v4300_v4 = vpop.f32.mrb[115].mxu1 }
 0x208   : > { %v2691_v3 = vadd.f32 %v1539_v27, %v4223_v32  ;;  %v1541_v8 = vpop.f32.mrb[51].mxu0 }
 0x20a   : > { %v4303_v46 = vpop.f32.mrb[116].mxu1  ;;  %v4305_v33 = vadd.f32 %v2691_v3, %v1764_v42 }
 0x20b   : > { %v1544_v25 = vpop.f32.mrb[52].mxu0  ;;  %v4307_v23 = vpop.f32.mrb[117].mxu1 }
 0x20c   : > { %v2693_v29 = vadd.f32 %v1544_v25, %v4225_v34  ;;  %v1546_v54 = vpop.f32.mrb[53].mxu0 }
 0x20e   : > { %v4310_v7 = vpop.f32.mrb[118].mxu1  ;;  %v4312_v1 = vadd.f32 %v2693_v29, %v1769_v13 }
 0x20f   : > { %v1549_v48 = vpop.f32.mrb[54].mxu0  ;;  %v4314_v60 = vpop.f32.mrb[119].mxu1 }
 0x210   : > { %v2695_v32 = vadd.f32 %v1549_v48, %v4227_v36  ;;  %v1551_v17 = vpop.f32.mrb[55].mxu0 }
 0x212   : > { %v2359_v34 = vpop.f32.mrb[120].mxu1  ;;  %v4324_v42 = vadd.f32 %v2695_v32, %v1774_v31 }
 0x213   : > { %v1554_v6 = vpop.f32.mrb[56].mxu0  ;;  %v4327_v13 = vadd.f32 %v4241_v40, %v2359_v34  ;;  %v1904_v21 = vpop.f32.mrb[121].mxu1 }
 0x214   : > { %v2697_v36 = vadd.f32 %v1554_v6, %v4229_v47  ;;  %v1556_v14 = vpop.f32.mrb[57].mxu0  ;;  %v4331_v20 = vadd.f32 %v4238_v19, %v1904_v21 }
 0x215   : > { %2140 = vst [vmem:[%s4322_s9 + $0x48] sm:$0xff] %v4327_v13 }
 0x216   : > { %2139 = vst [vmem:[%s4322_s9 + $0x40] sm:$0xff] %v4331_v20  ;;  %v2362_v12 = vpop.f32.mrb[122].mxu1  ;;  %v4337_v31 = vadd.f32 %v2697_v36, %v1779_v2 }
 0x217   : > { %v1559_v0 = vpop.f32.mrb[58].mxu0  ;;  %v4340_v40 = vadd.f32 %v4247_v9, %v2362_v12  ;;  %v1914_v28 = vpop.f32.mrb[123].mxu1 }
 0x218   : > { %v2699_v47 = vadd.f32 %v1559_v0, %v4231_v56  ;;  %v1561_v27 = vpop.f32.mrb[59].mxu0  ;;  %v4344_v19 = vadd.f32 %v4244_v43, %v1914_v28 }
 0x219   : > { %2142 = vst [vmem:[%s4322_s9 + $0x58] sm:$0xff] %v4340_v40 }
 0x21a   : > { %2141 = vst [vmem:[%s4322_s9 + $0x50] sm:$0xff] %v4344_v19  ;;  %v2365_v3 = vpop.f32.mrb[124].mxu1  ;;  %v4351_v2 = vadd.f32 %v2699_v47, %v4276_v18 }
 0x21b   : > { %v1564_v8 = vpop.f32.mrb[60].mxu0  ;;  %v4354_v9 = vadd.f32 %v4253_v10, %v2365_v3  ;;  %v1924_v25 = vpop.f32.mrb[125].mxu1 }
 0x21c   : > { %v2701_v56 = vadd.f32 %v1564_v8, %v4233_v61  ;;  %v1566_v29 = vpop.f32.mrb[61].mxu0  ;;  %v4358_v43 = vadd.f32 %v4250_v44, %v1924_v25 }
 0x21d   : > { %2144 = vst [vmem:[%s4322_s9 + $0x68] sm:$0xff] %v4354_v9 }
 0x21e   : > { %2143 = vst [vmem:[%s4322_s9 + $0x60] sm:$0xff] %v4358_v43  ;;  %v2368_v54 = vpop.f32.mrb[126].mxu1  ;;  %v4365_v18 = vadd.f32 %v2701_v56, %v4279_v52 }
 0x21f   : > { %v1569_v48 = vpop.f32.mrb[62].mxu0  ;;  %v4368_v10 = vadd.f32 %v4259_v62, %v2368_v54  ;;  %v1934_v32 = vpop.f32.mrb[127].mxu1 }
 0x220   : > { %v2703_v61 = vadd.f32 %v1569_v48, %v4235_v37  ;;  %v1571_v17 = vpop.f32.mrb[63].mxu0  ;;  %v4372_v44 = vadd.f32 %v4256_v45, %v1934_v32 }
 0x221   : > { %2146 = vst [vmem:[%s4322_s9 + $0x78] sm:$0xff] %v4368_v10 }
 0x222   : > { %2145 = vst [vmem:[%s4322_s9 + $0x70] sm:$0xff] %v4372_v44  ;;  %v2371_v52 = vpop.f32.mrb[128].mxu1  ;;  %v4379_v34 = vadd.f32 %v2703_v61, %v4284_v49 }
 0x223   : > { %v1639_v6 = vpop.f32.mrb[0].mxu0  ;;  %v4382_v62 = vadd.f32 %v4265_v26, %v2371_v52  ;;  %v1944_v21 = vpop.f32.mrb[129].mxu1 }
 0x224   : > { %v2649_v37 = vadd.f32 %v1639_v6, %v4138_v39  ;;  %v1641_v45 = vpop.f32.mrb[1].mxu0  ;;  %v4386_v36 = vadd.f32 %v4262_v53, %v1944_v21 }
 0x225   : > { %2148 = vst [vmem:[%s4322_s9 + $0x88] sm:$0xff] %v4382_v62 }
 0x226   : > { %v1865_v14 = vadd.f32 %v2649_v37, %v4293_v50  ;;  %2147 = vst [vmem:[%s4322_s9 + $0x80] sm:$0xff] %v4386_v36  ;;  %v2374_v49 = vpop.f32.mrb[130].mxu1 }
 0x227   : > { %v1644_v12 = vpop.f32.mrb[2].mxu0  ;;  %v4394_v26 = vadd.f32 %v4271_v58, %v2374_v49  ;;  %v1954_v0 = vpop.f32.mrb[131].mxu1 }
 0x228   : > { %2131 = vst [vmem:[%s4322_s9] sm:$0xff] %v1865_v14  ;;  %v2650_v39 = vadd.f32 %v1644_v12, %v4142_v59  ;;  %v1646_v28 = vpop.f32.mrb[3].mxu0  ;;  %v4399_v53 = vadd.f32 %v4268_v30, %v1954_v0  ;;  %v2061_v58 = vmul.f32 %v1865_v14, %v1865_v14 }
 0x229   : > { %2150 = vst [vmem:[%s4322_s9 + $0x98] sm:$0xff] %v4394_v26 }
 0x22a   : > { %v1870_v50 = vadd.f32 %v2650_v39, %v4289_v22  ;;  %2149 = vst [vmem:[%s4322_s9 + $0x90] sm:$0xff] %v4399_v53  ;;  %v2377_v47 = vpop.f32.mrb[132].mxu1 }
 0x22b   : > { %v1649_v27 = vpop.f32.mrb[4].mxu0  ;;  %v4407_v3 = vadd.f32 %v4281_v57, %v2377_v47  ;;  %v1964_v8 = vpop.f32.mrb[133].mxu1 }
 0x22c   : > { %v2023_v59 = vadd.f32 %v1870_v50, %v1865_v14  ;;  %v2062_v25 = vmul.f32 %v1870_v50, %v1870_v50  ;;  %2132 = vst [vmem:[%s4322_s9 + $0x8] sm:$0xff] %v1870_v50  ;;  %v2651_v30 = vadd.f32 %v1649_v27, %v4145_v35  ;;  %v1651_v56 = vpop.f32.mrb[5].mxu0  ;;  %v4412_v22 = vadd.f32 %v4274_v24, %v1964_v8 }
 0x22d   : > { %2152 = vst [vmem:[%s4322_s9 + $0xa8] sm:$0xff] %v4407_v3 }
 0x22e   : > { %v2093_v29 = vadd.f32 %v2062_v25, %v2061_v58  ;;  %v1875_v54 = vadd.f32 %v2651_v30, %v4300_v4  ;;  %2151 = vst [vmem:[%s4322_s9 + $0xa0] sm:$0xff] %v4412_v22  ;;  %v2380_v57 = vpop.f32.mrb[134].mxu1 }
 0x22f   : > { %v1654_v48 = vpop.f32.mrb[6].mxu0  ;;  %v4420_v32 = vadd.f32 %v4291_v55, %v2380_v57  ;;  %v1974_v61 = vpop.f32.mrb[135].mxu1 }
 0x230   : > { %v2024_v35 = vadd.f32 %v2023_v59, %v1875_v54  ;;  %v2063_v17 = vmul.f32 %v1875_v54, %v1875_v54  ;;  %2133 = vst [vmem:[%s4322_s9 + $0x10] sm:$0xff] %v1875_v54  ;;  %v2652_v24 = vadd.f32 %v1654_v48, %v4149_v5  ;;  %v1656_v52 = vpop.f32.mrb[7].mxu0  ;;  %v4425_v6 = vadd.f32 %v4286_v41, %v1974_v61 }
 0x231   : > { %2154 = vst [vmem:[%s4322_s9 + $0xb8] sm:$0xff] %v4420_v32 }
 0x232   : > { %v2094_v4 = vadd.f32 %v2093_v29, %v2063_v17  ;;  %v1880_v21 = vadd.f32 %v2652_v24, %v4296_v38  ;;  %2153 = vst [vmem:[%s4322_s9 + $0xb0] sm:$0xff] %v4425_v6  ;;  %v2383_v55 = vpop.f32.mrb[136].mxu1 }
 0x233   : > { %v1659_v37 = vpop.f32.mrb[8].mxu0  ;;  %v4433_v45 = vadd.f32 %v4305_v33, %v2383_v55  ;;  %v1984_v14 = vpop.f32.mrb[137].mxu1 }
 0x234   : > { %v2025_v5 = vadd.f32 %v2024_v35, %v1880_v21  ;;  %v2064_v49 = vmul.f32 %v1880_v21, %v1880_v21  ;;  %2134 = vst [vmem:[%s4322_s9 + $0x18] sm:$0xff] %v1880_v21  ;;  %v2653_v41 = vadd.f32 %v1659_v37, %v4153_v63  ;;  %v1661_v12 = vpop.f32.mrb[9].mxu0  ;;  %v4438_v0 = vadd.f32 %v4298_v11, %v1984_v14 }
 0x235   : > { %2156 = vst [vmem:[%s4322_s9 + $0xc8] sm:$0xff] %v4433_v45  ;;  %v2069_v37 = vmul.f32 %v4331_v20, %v4331_v20 }
 0x236   : > { %v2095_v38 = vadd.f32 %v2094_v4, %v2064_v49  ;;  %v1885_v39 = vadd.f32 %v2653_v41, %v4307_v23  ;;  %2155 = vst [vmem:[%s4322_s9 + $0xc0] sm:$0xff] %v4438_v0  ;;  %v2386_v33 = vpop.f32.mrb[138].mxu1 }
 0x237   : > { %v1664_v28 = vpop.f32.mrb[10].mxu0  ;;  %v4446_v50 = vadd.f32 %v4324_v42, %v2386_v33  ;;  %v1994_v47 = vpop.f32.mrb[139].mxu1 }
 0x238   : > { %v2026_v63 = vadd.f32 %v2025_v5, %v1885_v39  ;;  %v2065_v58 = vmul.f32 %v1885_v39, %v1885_v39  ;;  %2135 = vst [vmem:[%s4322_s9 + $0x20] sm:$0xff] %v1885_v39  ;;  %v2654_v11 = vadd.f32 %v1664_v28, %v4156_v51  ;;  %v1666_v27 = vpop.f32.mrb[11].mxu0  ;;  %v4451_v8 = vadd.f32 %v4312_v1, %v1994_v47 }
 0x239   : > { %2158 = vst [vmem:[%s4322_s9 + $0xd8] sm:$0xff] %v4446_v50 }
 0x23a   : > { %v2096_v23 = vadd.f32 %v2095_v38, %v2065_v58  ;;  %v1890_v59 = vadd.f32 %v2654_v11, %v4303_v46  ;;  %2157 = vst [vmem:[%s4322_s9 + $0xd0] sm:$0xff] %v4451_v8  ;;  %v2389_v42 = vpop.f32.mrb[140].mxu1  ;;  %v2072_v38 = vmul.f32 %v4340_v40, %v4340_v40 }
 0x23b   : > { %v1669_v25 = vpop.f32.mrb[12].mxu0  ;;  %v4459_v30 = vadd.f32 %v4351_v2, %v2389_v42  ;;  %v2004_v56 = vpop.f32.mrb[141].mxu1 }
 0x23c   : > { %v2027_v51 = vadd.f32 %v2026_v63, %v1890_v59  ;;  %v2066_v29 = vmul.f32 %v1890_v59, %v1890_v59  ;;  %2136 = vst [vmem:[%s4322_s9 + $0x28] sm:$0xff] %v1890_v59  ;;  %v2655_v1 = vadd.f32 %v1669_v25, %v4159_v15  ;;  %v1671_v54 = vpop.f32.mrb[13].mxu0  ;;  %v4464_v57 = vadd.f32 %v4337_v31, %v2004_v56 }
 0x23d   : > { %2160 = vst [vmem:[%s4322_s9 + $0xe8] sm:$0xff] %v4459_v30 }
 0x23e   : > { %v2097_v46 = vadd.f32 %v2096_v23, %v2066_v29  ;;  %v1895_v48 = vadd.f32 %v2655_v1, %v4314_v60  ;;  %2159 = vst [vmem:[%s4322_s9 + $0xe0] sm:$0xff] %v4464_v57  ;;  %v2392_v2 = vpop.f32.mrb[142].mxu1 }
 0x23f   : > { %v1674_v61 = vpop.f32.mrb[14].mxu0  ;;  %v4472_v35 = vadd.f32 %v4379_v34, %v2392_v2  ;;  %v2014_v15 = vpop.f32.mrb[143].mxu1 }
 0x240   : > { %v2028_v17 = vadd.f32 %v2027_v51, %v1895_v48  ;;  %v2067_v24 = vmul.f32 %v1895_v48, %v1895_v48  ;;  %2137 = vst [vmem:[%s4322_s9 + $0x30] sm:$0xff] %v1895_v48  ;;  %v2656_v31 = vadd.f32 %v1674_v61, %v4162_v16  ;;  %v1676_v52 = vpop.f32.mrb[15].mxu0  ;;  %v4477_v4 = vadd.f32 %v4365_v18, %v2014_v15 }
 0x241   : > { %2162 = vst [vmem:[%s4322_s9 + $0xf8] sm:$0xff] %v4472_v35  ;;  %v2070_v18 = vmul.f32 %v4327_v13, %v4327_v13 }
 0x242   : > { %v2098_v60 = vadd.f32 %v2097_v46, %v2067_v24  ;;  %v1900_v21 = vadd.f32 %v2656_v31, %v4310_v7  ;;  %2161 = vst [vmem:[%s4322_s9 + $0xf0] sm:$0xff] %v4477_v4  ;;  %v2071_v7 = vmul.f32 %v4344_v19, %v4344_v19 }
 0x244   : > { %v2029_v55 = vadd.f32 %v2028_v17, %v1900_v21  ;;  %v2068_v34 = vmul.f32 %v1900_v21, %v1900_v21  ;;  %2138 = vst [vmem:[%s4322_s9 + $0x38] sm:$0xff] %v1900_v21 }
 0x246   : > { %v2030_v14 = vadd.f32 %v2029_v55, %v4331_v20  ;;  %v2099_v16 = vadd.f32 %v2098_v60, %v2068_v34  ;;  %v2073_v20 = vmul.f32 %v4358_v43, %v4358_v43 }
 0x248   : > { %v2031_v5 = vadd.f32 %v2030_v14, %v4327_v13  ;;  %v2100_v49 = vadd.f32 %v2099_v16, %v2069_v37  ;;  %v2074_v13 = vmul.f32 %v4354_v9, %v4354_v9 }
 0x24a   : > { %v2032_v41 = vadd.f32 %v2031_v5, %v4344_v19  ;;  %v2101_v12 = vadd.f32 %v2100_v49, %v2070_v18  ;;  %v2075_v19 = vmul.f32 %v4372_v44, %v4372_v44 }
 0x24c   : > { %v2033_v39 = vadd.f32 %v2032_v41, %v4340_v40  ;;  %v2102_v33 = vadd.f32 %v2101_v12, %v2071_v7  ;;  %v2076_v40 = vmul.f32 %v4368_v10, %v4368_v10  ;;  %v2091_v12 = vmul.f32 %v4477_v4, %v4477_v4 }
 0x24e   : > { %v2034_v28 = vadd.f32 %v2033_v39, %v4358_v43  ;;  %v2103_v47 = vadd.f32 %v2102_v33, %v2072_v38  ;;  %v2077_v43 = vmul.f32 %v4386_v36, %v4386_v36  ;;  %v2092_v38 = vmul.f32 %v4472_v35, %v4472_v35 }
 0x250   : > { %v2035_v63 = vadd.f32 %v2034_v28, %v4354_v9  ;;  %v2104_v58 = vadd.f32 %v2103_v47, %v2073_v20  ;;  %v2078_v9 = vmul.f32 %v4382_v62, %v4382_v62 }
 0x252   : > { %v2036_v11 = vadd.f32 %v2035_v63, %v4372_v44  ;;  %v2105_v27 = vadd.f32 %v2104_v58, %v2074_v13  ;;  %v2079_v44 = vmul.f32 %v4399_v53, %v4399_v53 }
 0x254   : > { %v2037_v23 = vadd.f32 %v2036_v11, %v4368_v10  ;;  %v2106_v59 = vadd.f32 %v2105_v27, %v2075_v19  ;;  %v2080_v10 = vmul.f32 %v4394_v26, %v4394_v26 }
 0x256   : > { %v2038_v42 = vadd.f32 %v2037_v23, %v4386_v36  ;;  %v2107_v25 = vadd.f32 %v2106_v59, %v2076_v40  ;;  %v2081_v36 = vmul.f32 %v4412_v22, %v4412_v22 }
 0x258   : > { %v2039_v56 = vadd.f32 %v2038_v42, %v4382_v62  ;;  %v2108_v51 = vadd.f32 %v2107_v25, %v2077_v43  ;;  %v2082_v62 = vmul.f32 %v4407_v3, %v4407_v3 }
 0x25a   : > { %v2109_v29 = vadd.f32 %v2108_v51, %v2078_v9  ;;  %v2040_v1 = vadd.f32 %v2039_v56, %v4399_v53  ;;  %v2083_v53 = vmul.f32 %v4425_v6, %v4425_v6 }
 0x25c   : > { %v2041_v54 = vadd.f32 %v2040_v1, %v4394_v26  ;;  %v2110_v46 = vadd.f32 %v2109_v29, %v2079_v44  ;;  %v2084_v26 = vmul.f32 %v4420_v32, %v4420_v32 }
 0x25e   : > { %v2042_v48 = vadd.f32 %v2041_v54, %v4412_v22  ;;  %v2111_v2 = vadd.f32 %v2110_v46, %v2080_v10  ;;  %v2085_v22 = vmul.f32 %v4438_v0, %v4438_v0 }
 0x260   : > { %v2043_v61 = vadd.f32 %v2042_v48, %v4407_v3  ;;  %v2112_v15 = vadd.f32 %v2111_v2, %v2081_v36  ;;  %v2086_v3 = vmul.f32 %v4433_v45, %v4433_v45 }
 0x262   : > { %v2044_v17 = vadd.f32 %v2043_v61, %v4425_v6  ;;  %v2113_v24 = vadd.f32 %v2112_v15, %v2082_v62  ;;  %v2087_v6 = vmul.f32 %v4451_v8, %v4451_v8 }
 0x264   : > { %v2045_v31 = vadd.f32 %v2044_v17, %v4420_v32  ;;  %v2114_v52 = vadd.f32 %v2113_v24, %v2083_v53  ;;  %v2088_v32 = vmul.f32 %v4446_v50, %v4446_v50 }
 0x266   : > { %v2046_v60 = vadd.f32 %v2045_v31, %v4438_v0  ;;  %v2115_v21 = vadd.f32 %v2114_v52, %v2084_v26  ;;  %v2089_v0 = vmul.f32 %v4464_v57, %v4464_v57 }
 0x268   : > { %v2047_v55 = vadd.f32 %v2046_v60, %v4433_v45  ;;  %v2116_v34 = vadd.f32 %v2115_v21, %v2085_v22  ;;  %v2090_v45 = vmul.f32 %v4459_v30, %v4459_v30 }
 0x26a   : > { %v2048_v37 = vadd.f32 %v2047_v55, %v4451_v8  ;;  %v2117_v14 = vadd.f32 %v2116_v34, %v2086_v3 }
 0x26c   : > { %v2049_v16 = vadd.f32 %v2048_v37, %v4446_v50  ;;  %v2118_v18 = vadd.f32 %v2117_v14, %v2087_v6 }
 0x26e   : > { %v2050_v5 = vadd.f32 %v2049_v16, %v4464_v57  ;;  %v2119_v49 = vadd.f32 %v2118_v18, %v2088_v32 }
 0x270   : > { %v2051_v7 = vadd.f32 %v2050_v5, %v4459_v30  ;;  %v2120_v8 = vadd.f32 %v2119_v49, %v2089_v0 }
 0x272   : > { %v2052_v41 = vadd.f32 %v2051_v7, %v4477_v4  ;;  %v2121_v50 = vadd.f32 %v2120_v8, %v2090_v45 }
 0x274   : > { %v2053_v39 = vadd.f32 %v2052_v41, %v4472_v35  ;;  %v2122_v57 = vadd.f32 %v2121_v50, %v2091_v12 }
 0x276   : > { %v2054_v33 = vrot.slane %v2053_v39, 4  ;;  %v2123_v20 = vadd.f32 %v2122_v57, %v2092_v38 }
 0x278   : > { %v2055_v28 = vadd.f32 %v2054_v33, %v2053_v39  ;;  %v2124_v47 = vrot.slane %v2123_v20, 4 }
 0x27a   : > { %v2056_v13 = vrot.slane %v2055_v28, 2  ;;  %v2125_v63 = vadd.f32 %v2124_v47, %v2123_v20 }
 0x27c   : > { %v2057_v30 = vadd.f32 %v2056_v13, %v2055_v28  ;;  %v2126_v58 = vrot.slane %v2125_v63, 2 }
 0x27e   : > { %v2058_v19 = vrot.slane %v2057_v30, 1  ;;  %v2127_v11 = vadd.f32 %v2126_v58, %v2125_v63 }
 0x280   : > { %v2059_v4 = vadd.f32 %v2058_v19, %v2057_v30  ;;  %v2128_v27 = vrot.slane %v2127_v11, 1 }
 0x282   : > { %2060 = vst [vmem:[%s235_s13] sm:$0x1] %v2059_v4  ;;  %v2129_v35 = vadd.f32 %v2128_v27, %v2127_v11 }
 0x284   : > { %2130 = vst [vmem:[%s235_s13 + $0x1] sm:$0x1] %v2129_v35 }
 0x285 PF: > { %s16_s18 = sadd.s32 1, %s2824_s18  }
 0x286   : > { %p13_p4 = scmp.ge.s32.totalorder %s16_s18, 4  }
 0x288   :  { %15 = sbr.rel (!%p13_p4) target bundleno = 1 (0x1), region = 80 }

</bundles_post_ra>
